<compile_context>
chip_gen: v7x
topology: tpu7x:2x2x1
jax: 0.10.0
libtpu: 0.0.40
codegen_flags: <defaults>
</compile_context>

<pallas_src>
import functools

import jax
import jax.numpy as jnp
from jax import lax
from jax.experimental import pallas as pl
from jax.experimental.pallas import tpu as pltpu

_LEFT = 8  # sublane-aligned start of the valid conv2 interior inside the halo scratch


def _bottleneck_kernel(x_ref, w_in_ref, b1_ref, w2_ref, b2_ref, w3_ref, bo_ref,
                       out_ref, pad_ref, sc_ref, *, im2col=True):
    """One (batch_tile, H, W) slab of the bottleneck block.

    x_ref   : (TB, H, W, Cin)          bf16  input activations
    w_in_ref: (Cin, Cpad + Cbp)        bf16  [shortcut_proj*BNs | conv1*BN1] fused
    b1_ref  : (1, Cbp)                 f32   BN1 bias (lane-padded)
    w2_ref  : (9*Cbp, Cbp)             bf16  conv2 (3x3) * BN2, tap-major (dy, dx, ci)
    b2_ref  : (1, Cbp)                 f32   BN2 bias
    w3_ref  : (Cbp, Cpad)              bf16  conv3 * BN3, lane-padded both axes
    bo_ref  : (1, Cpad)                f32   BN3 bias + shortcut-BN bias
    out_ref : (TB, H, W, Cpad)         bf16  output (lane-dense, unmasked stores)
    pad_ref : (TB, H+2, W+9, Cbp)      bf16  conv2 halo scratch (interior at _LEFT)
    sc_ref  : (TB, H, W, Cpad)         f32   shortcut parking scratch
    """
    TB, H, W, Cin = x_ref.shape
    Cb = w2_ref.shape[1]            # lane-padded bottleneck width
    Cpad = w3_ref.shape[1]          # lane-padded output width
    rows = TB * H * W
    mm_dtype = w2_ref.dtype
    Wp = pad_ref.shape[2]

    # conv1 (1x1, BN folded) fused with the 1x1 projection shortcut: one MXU matmul
    # over the shared LHS, output split at a 128-lane-aligned boundary.
    x2d = x_ref[...].reshape(rows, Cin)
    fused = jnp.dot(x2d, w_in_ref[...], preferred_element_type=jnp.float32)
    # Park the shortcut branch in VMEM so it is not live across conv2/conv3.
    sc_ref[...] = fused[:, :Cpad].reshape(TB, H, W, Cpad)
    o1 = jnp.maximum(fused[:, Cpad:] + b1_ref[...], 0.0).astype(mm_dtype)  # (rows, Cb)

    # conv2 (3x3, stride 1, pad 1, BN folded) + ReLU.
    # Zero only the 1-wide halo ring the taps actually read (NOT the whole scratch),
    # every step (scratch is uninitialized per-core; megacore-safe).  The interior is
    # then fully overwritten at a sublane-aligned offset, so no stale data is read.
    zrow = jnp.zeros((TB, 1, Wp, Cb), mm_dtype)
    zcol = jnp.zeros((TB, H + 2, 1, Cb), mm_dtype)
    pad_ref[:, 0:1, :, :] = zrow                                   # top halo row
    pad_ref[:, H + 1:H + 2, :, :] = zrow                           # bottom halo row
    pad_ref[:, :, _LEFT - 1:_LEFT, :] = zcol                       # left halo column
    pad_ref[:, :, _LEFT + W:_LEFT + W + 1, :] = zcol               # right halo column
    pad_ref[:, 1:H + 1, _LEFT:_LEFT + W, :] = o1.reshape(TB, H, W, Cb)  # aligned store

    taps = [pad_ref[:, dy:dy + H, _LEFT - 1 + dx:_LEFT - 1 + dx + W, :].reshape(rows, Cb)
            for dy in range(3) for dx in range(3)]
    if im2col:
        # Single K = 9*Cb matmul over the im2col matrix (best on v5e/v6e where the MXU
        # result path is a FIFO).  Cb is lane-padded to 128 so the concat is aligned.
        cols = jnp.concatenate(taps, axis=-1)                      # (rows, 9*Cb) bf16
        o2 = jnp.dot(cols, w2_ref[...], preferred_element_type=jnp.float32)
    else:
        # Per-tap path (preferred on v7x where the MRB accumulates in place).
        o2 = jnp.zeros((rows, Cb), jnp.float32)
        for k, tap in enumerate(taps):
            o2 += jnp.dot(tap, w2_ref[k * Cb:(k + 1) * Cb, :],
                          preferred_element_type=jnp.float32)
    o2 = jnp.maximum(o2 + b2_ref[...], 0.0).astype(mm_dtype)       # (rows, Cb)

    # conv3 (1x1, BN folded) + residual add (f32) + ReLU + single bf16 store.
    o3 = jnp.dot(o2, w3_ref[...], preferred_element_type=jnp.float32)
    res = o3.reshape(TB, H, W, Cpad) + sc_ref[...] + bo_ref[...]
    out_ref[...] = jnp.maximum(res, 0.0).astype(out_ref.dtype)


def _auto_batch_tile(B, H, W, target_rows=256):
    """Smallest divisor of B whose matmul M-dim (TB*H*W) fills the MXU (>=256 rows);
    picking the smallest keeps >=2 grid steps when possible (v7x has 2 TensorCores)."""
    for d in range(1, B + 1):
        if B % d == 0 and d * H * W >= target_rows:
            return d
    return B


def _default_vmem_limit():
    """Generation-aware VMEM budget: ~56 MiB on v7x (64 MiB physical per core),
    ~100 MiB on v5e/v6e (128 MiB physical)."""
    mib = 1024 * 1024
    try:
        cap = int(getattr(pltpu.get_tpu_info(), "vmem_capacity_bytes", 64 * mib))
    except Exception:
        cap = 64 * mib                      # conservative fallback, valid everywhere
    return 56 * mib if cap <= 64 * mib else 100 * mib


def bottleneck_block(x_nhwc, fp, *, batch_tile=None, im2col=True,
                     vmem_limit_bytes=None):
    """BottleneckBlock forward (stride=1, groups=1, eval-mode BN). NHWC in / NHWC out."""
    B, H, W, Cin = x_nhwc.shape
    Cbp = fp["b1"].shape[-1]
    Cpad = fp["b_out"].shape[-1]
    compute_dtype = fp["w_in"].dtype
    if batch_tile is None:
        batch_tile = _auto_batch_tile(B, H, W)
    assert B % batch_tile == 0, "batch_tile must divide the batch"
    if vmem_limit_bytes is None:
        vmem_limit_bytes = _default_vmem_limit()
    # TODO(synk): ideally the previous layer already emits bf16 NHWC; this cast is an
    # extra un-hidden HBM round trip when the input arrives as f32.
    x = x_nhwc if x_nhwc.dtype == compute_dtype else x_nhwc.astype(compute_dtype)

    grid = (B // batch_tile,)
    tile_map = lambda b: (b, 0, 0, 0)
    const2d = lambda b: (0, 0)             # weights/biases stay VMEM-resident
    # Constant operands: single-buffered (no wasted second VMEM copy of the weights).
    wspec = lambda a: pl.BlockSpec(a.shape, const2d, pipeline_mode=pl.Buffered(1))

    kernel = functools.partial(_bottleneck_kernel, im2col=im2col)
    out = pl.pallas_call(
        kernel,
        out_shape=jax.ShapeDtypeStruct((B, H, W, Cpad), compute_dtype),
        grid_spec=pltpu.PrefetchScalarGridSpec(
            num_scalar_prefetch=0,
            grid=grid,
            in_specs=[
                pl.BlockSpec((batch_tile, H, W, Cin), tile_map),
                wspec(fp["w_in"]), wspec(fp["b1"]), wspec(fp["w2"]),
                wspec(fp["b2"]), wspec(fp["w3"]), wspec(fp["b_out"]),
            ],
            out_specs=pl.BlockSpec((batch_tile, H, W, Cpad), tile_map),
            scratch_shapes=[
                pltpu.VMEM((batch_tile, H + 2, W + _LEFT + 1, Cbp), compute_dtype),
                pltpu.VMEM((batch_tile, H, W, Cpad), jnp.float32),
            ],
        ),
        compiler_params=pltpu.CompilerParams(
            dimension_semantics=("parallel",),
            vmem_limit_bytes=vmem_limit_bytes),
    )(x, fp["w_in"], fp["b1"], fp["w2"], fp["b2"], fp["w3"], fp["b_out"])
    # Slice off the lane padding; a no-op whenever Cout is already a multiple of 128.
    return out[..., :fp["cout"]]


# -------------------------- host-side parameter handling --------------------------

def make_raw_params(key, cin, cb, cout):
    """PyTorch-style raw parameters: OIHW conv weights + BN statistics."""
    ks = jax.random.split(key, 8)

    def bn_stats(k, c):
        k1, k2, k3, k4 = jax.random.split(k, 4)
        return dict(gamma=1.0 + 0.1 * jax.random.normal(k1, (c,)),
                    beta=0.1 * jax.random.normal(k2, (c,)),
                    mean=0.05 * jax.random.normal(k3, (c,)),
                    var=1.0 + 0.1 * jax.random.uniform(k4, (c,)))

    raw = dict(
        w1=0.1 * jax.random.normal(ks[0], (cb, cin, 1, 1)),     # conv1
        w2=0.1 * jax.random.normal(ks[1], (cb, cb, 3, 3)),      # conv2
        w3=0.1 * jax.random.normal(ks[2], (cout, cb, 1, 1)),    # conv3
        ws=0.1 * jax.random.normal(ks[3], (cout, cin, 1, 1)),   # shortcut
        bn1=bn_stats(ks[4], cb), bn2=bn_stats(ks[5], cb),
        bn3=bn_stats(ks[6], cout), bns=bn_stats(ks[7], cout))
    return jax.tree.map(lambda a: a.astype(jnp.float32), raw)


def fold_params(raw, *, eps=1e-5, compute_dtype=jnp.bfloat16, lane=128):
    """Fold eval-mode BN into conv weights, fuse conv1+shortcut, lane-pad Cb and Cout."""
    def scale_bias(bn):
        s = bn["gamma"] / jnp.sqrt(bn["var"] + eps)
        return s, bn["beta"] - bn["mean"] * s

    s1, b1 = scale_bias(raw["bn1"])
    s2, b2 = scale_bias(raw["bn2"])
    s3, b3 = scale_bias(raw["bn3"])
    ss, bs = scale_bias(raw["bns"])
    cb, cin = raw["w1"].shape[0], raw["w1"].shape[1]
    cout = raw["w3"].shape[0]
    rup = lambda c: max(lane, ((c + lane - 1) // lane) * lane)
    cbp, cpad = rup(cb), rup(cout)

    w1f = raw["w1"][:, :, 0, 0].T * s1[None, :]                       # (Cin, Cb)
    w1f = jnp.pad(w1f, ((0, 0), (0, cbp - cb)))                       # (Cin, Cbp)
    w2f = jnp.transpose(raw["w2"], (2, 3, 1, 0)) * s2[None, None, None, :]  # (3,3,Cb,Cb)
    w2f = jnp.pad(w2f, ((0, 0), (0, 0), (0, cbp - cb), (0, cbp - cb)))
    w2f = w2f.reshape(9 * cbp, cbp)                                   # (9Cbp, Cbp)
    w3f = raw["w3"][:, :, 0, 0].T * s3[None, :]                       # (Cb, Cout)
    w3f = jnp.pad(w3f, ((0, cbp - cb), (0, cpad - cout)))             # (Cbp, Cpad)
    wsf = raw["ws"][:, :, 0, 0].T * ss[None, :]                       # (Cin, Cout)
    wsf = jnp.pad(wsf, ((0, 0), (0, cpad - cout)))                    # (Cin, Cpad)
    w_in = jnp.concatenate([wsf, w1f], axis=1)                        # (Cin, Cpad+Cbp)

    return dict(
        w_in=w_in.astype(compute_dtype),
        w2=w2f.astype(compute_dtype),
        w3=w3f.astype(compute_dtype),
        b1=jnp.pad(b1, (0, cbp - cb)).reshape(1, cbp).astype(jnp.float32),
        b2=jnp.pad(b2, (0, cbp - cb)).reshape(1, cbp).astype(jnp.float32),
        b_out=jnp.pad(b3 + bs, (0, cpad - cout)).reshape(1, cpad).astype(jnp.float32),
        cout=cout)


# ----------------------------------- references -----------------------------------

def reference_folded(x_nhwc, fp):
    """Pure-JAX reference with the SAME folded bf16 weights / cast points as the kernel."""
    cpad = fp["b_out"].shape[-1]
    cbp = fp["b1"].shape[-1]
    dt = fp["w_in"].dtype
    xb = x_nhwc.astype(dt)
    fused = jnp.einsum('bhwc,cd->bhwd', xb, fp["w_in"],
                       preferred_element_type=jnp.float32)
    sc = fused[..., :cpad]
    o1 = jnp.maximum(fused[..., cpad:] + fp["b1"], 0.0)
    w2_hwio = fp["w2"].reshape(3, 3, cbp, cbp)
    o2 = lax.conv_general_dilated(o1.astype(dt), w2_hwio, (1, 1), ((1, 1), (1, 1)),
                                  dimension_numbers=('NHWC', 'HWIO', 'NHWC'),
                                  preferred_element_type=jnp.float32)
    o2 = jnp.maximum(o2 + fp["b2"], 0.0)
    o3 = jnp.einsum('bhwc,cd->bhwd', o2.astype(dt), fp["w3"],
                    preferred_element_type=jnp.float32)
    out = jnp.maximum(o3 + sc + fp["b_out"], 0.0).astype(dt)   # kernel emits bf16
    return out[..., :fp["cout"]].astype(jnp.float32)


def reference_torch(x_nhwc, raw, eps=1e-5):
    """f32, unfolded reference matching the PyTorch module forward (eval-mode BN)."""
    def bn(h, p):
        s = p["gamma"] / jnp.sqrt(p["var"] + eps)
        return h * s + (p["beta"] - p["mean"] * s)

    def conv1x1(h, w_oihw):
        return jnp.einsum('bhwc,dc->bhwd', h, w_oihw[:, :, 0, 0])

    x = x_nhwc.astype(jnp.float32)
    o = jnp.maximum(bn(conv1x1(x, raw["w1"]), raw["bn1"]), 0.0)
    o = lax.conv_general_dilated(o, jnp.transpose(raw["w2"], (2, 3, 1, 0)),
                                 (1, 1), ((1, 1), (1, 1)),
                                 dimension_numbers=('NHWC', 'HWIO', 'NHWC'))
    o = jnp.maximum(bn(o, raw["bn2"]), 0.0)
    o = bn(conv1x1(o, raw["w3"]), raw["bn3"])
    sc = bn(conv1x1(x, raw["ws"]), raw["bns"])
    return jnp.maximum(o + sc, 0.0)


if __name__ == "__main__":
    # BottleneckBlock(in_channels=16, out_channels=32, bottleneck_channels=8,
    #                 stride=1, num_groups=1, norm='BN', stride_in_1x1=False, dilation=1)
    B, H, W = 2, 16, 16
    Cin, Cb, Cout = 16, 8, 32

    key = jax.random.PRNGKey(0)
    kx, kp = jax.random.split(key)
    x_f32 = jax.random.normal(kx, (B, H, W, Cin), dtype=jnp.float32)
    raw = make_raw_params(kp, Cin, Cb, Cout)
    fp = fold_params(raw)
    x_bf16 = x_f32.astype(fp["w_in"].dtype)     # "previous layer" emits bf16 NHWC

    out = jax.block_until_ready(bottleneck_block(x_bf16, fp))
    assert out.shape == (B, H, W, Cout)

    out_f32 = out.astype(jnp.float32)
    ref_matched = reference_folded(x_f32, fp)   # same bf16 quantization as the kernel
    ref_f32 = reference_torch(x_f32, raw)       # unfolded f32 PyTorch-style math
    err_m = float(jnp.max(jnp.abs(out_f32 - ref_matched)))
    err_f = float(jnp.max(jnp.abs(out_f32 - ref_f32)))
    assert err_m < 1e-2, f"max abs err vs dtype-matched reference: {err_m}"
    assert err_f < 1.5e-1, f"max abs err vs f32 reference: {err_f}"
    print("KERNEL_OK")
</pallas_src>

<mosaic_0001>
module attributes {stable_mosaic.version = 11 : i64} {
  func.func @_bottleneck_kernel(%arg0: i32, %arg1: memref<1x16x16x16xbf16, #tpu.memory_space<vmem>>, %arg2: memref<16x256xbf16, #tpu.memory_space<vmem>>, %arg3: memref<1x128xf32, #tpu.memory_space<vmem>>, %arg4: memref<1152x128xbf16, #tpu.memory_space<vmem>>, %arg5: memref<1x128xf32, #tpu.memory_space<vmem>>, %arg6: memref<128x128xbf16, #tpu.memory_space<vmem>>, %arg7: memref<1x128xf32, #tpu.memory_space<vmem>>, %arg8: memref<1x16x16x128xbf16, #tpu.memory_space<vmem>>, %arg9: memref<1x18x25x128xbf16, #tpu.memory_space<vmem>>, %arg10: memref<1x16x16x128xf32, #tpu.memory_space<vmem>>) attributes {dimension_semantics = [#tpu.dimension_semantics<parallel>], iteration_bounds = array<i64: 2>, scalar_prefetch = 0 : i64, scratch_operands = 2 : i64, tpu.core_type = #tpu.core_type<tc>, window_params = [{transform_indices = @transform_0, window_bounds = array<i64: 1, 16, 16, 16>}, {pipeline_mode = #tpu.pipeline_mode<synchronous>, transform_indices = @transform_1, window_bounds = array<i64: 16, 256>}, {pipeline_mode = #tpu.pipeline_mode<synchronous>, transform_indices = @transform_2, window_bounds = array<i64: 1, 128>}, {pipeline_mode = #tpu.pipeline_mode<synchronous>, transform_indices = @transform_3, window_bounds = array<i64: 1152, 128>}, {pipeline_mode = #tpu.pipeline_mode<synchronous>, transform_indices = @transform_4, window_bounds = array<i64: 1, 128>}, {pipeline_mode = #tpu.pipeline_mode<synchronous>, transform_indices = @transform_5, window_bounds = array<i64: 128, 128>}, {pipeline_mode = #tpu.pipeline_mode<synchronous>, transform_indices = @transform_6, window_bounds = array<i64: 1, 128>}, {transform_indices = @transform_7, window_bounds = array<i64: 1, 16, 16, 128>}]} {
    %c0 = arith.constant 0 : index
    %c0_0 = arith.constant 0 : index
    %c0_1 = arith.constant 0 : index
    %c0_2 = arith.constant 0 : index
    %0 = vector.load %arg1[%c0, %c0_0, %c0_1, %c0_2] : memref<1x16x16x16xbf16, #tpu.memory_space<vmem>>, vector<1x16x16x16xbf16>
    %1 = vector.shape_cast %0 : vector<1x16x16x16xbf16> to vector<256x16xbf16>
    %c0_3 = arith.constant 0 : index
    %c0_4 = arith.constant 0 : index
    %2 = vector.load %arg2[%c0_3, %c0_4] : memref<16x256xbf16, #tpu.memory_space<vmem>>, vector<16x256xbf16>
    %cst = arith.constant dense<0.000000e+00> : vector<256x256xf32>
    %3 = tpu.matmul %1, %2, %cst {dimension_numbers = #tpu.dot_dimension_numbers<[1], [0], [0], [1], [0, 0, 1, 1], [], []>} : vector<256x16xbf16>, vector<16x256xbf16>, vector<256x256xf32> -> vector<256x256xf32>
    %4 = vector.extract_strided_slice %3 {offsets = [0, 0], sizes = [256, 128], strides = [1, 1]} : vector<256x256xf32> to vector<256x128xf32>
    %5 = vector.shape_cast %4 : vector<256x128xf32> to vector<1x16x16x128xf32>
    %c0_5 = arith.constant 0 : index
    %c0_6 = arith.constant 0 : index
    %c0_7 = arith.constant 0 : index
    %c0_8 = arith.constant 0 : index
    %6 = vector.load %arg10[%c0_5, %c0_6, %c0_7, %c0_8] : memref<1x16x16x128xf32, #tpu.memory_space<vmem>>, vector<1x16x16x128xf32>
    tpu.vector_store %arg10[%c0_5, %c0_6, %c0_7, %c0_8], %5 {strides = array<i32>} : memref<1x16x16x128xf32, #tpu.memory_space<vmem>>, vector<1x16x16x128xf32>,
    %7 = vector.extract_strided_slice %3 {offsets = [0, 128], sizes = [256, 128], strides = [1, 1]} : vector<256x256xf32> to vector<256x128xf32>
    %c0_9 = arith.constant 0 : index
    %c0_10 = arith.constant 0 : index
    %8 = vector.load %arg3[%c0_9, %c0_10] : memref<1x128xf32, #tpu.memory_space<vmem>>, vector<1x128xf32>
    %9 = vector.broadcast %8 : vector<1x128xf32> to vector<256x128xf32>
    %10 = arith.addf %7, %9 : vector<256x128xf32>
    %cst_11 = arith.constant 0.000000e+00 : f32
    %11 = vector.broadcast %cst_11 : f32 to vector<256x128xf32>
    %12 = arith.maximumf %10, %11 : vector<256x128xf32>
    %13 = arith.truncf %12 : vector<256x128xf32> to vector<256x128xbf16>
    %cst_12 = arith.constant 0.000000e+00 : bf16
    %14 = vector.broadcast %cst_12 : bf16 to vector<1x1x25x128xbf16>
    %cst_13 = arith.constant 0.000000e+00 : bf16
    %15 = vector.broadcast %cst_13 : bf16 to vector<1x18x1x128xbf16>
    %c0_14 = arith.constant 0 : index
    %c0_15 = arith.constant 0 : index
    %c0_16 = arith.constant 0 : index
    %c0_17 = arith.constant 0 : index
    %16 = vector.load %arg9[%c0_14, %c0_15, %c0_16, %c0_17] : memref<1x18x25x128xbf16, #tpu.memory_space<vmem>>, vector<1x1x25x128xbf16>
    tpu.vector_store %arg9[%c0_14, %c0_15, %c0_16, %c0_17], %14 {strides = array<i32>} : memref<1x18x25x128xbf16, #tpu.memory_space<vmem>>, vector<1x1x25x128xbf16>,
    %c0_18 = arith.constant 0 : index
    %c17 = arith.constant 17 : index
    %c0_19 = arith.constant 0 : index
    %c0_20 = arith.constant 0 : index
    %17 = vector.load %arg9[%c0_18, %c17, %c0_19, %c0_20] : memref<1x18x25x128xbf16, #tpu.memory_space<vmem>>, vector<1x1x25x128xbf16>
    tpu.vector_store %arg9[%c0_18, %c17, %c0_19, %c0_20], %14 {strides = array<i32>} : memref<1x18x25x128xbf16, #tpu.memory_space<vmem>>, vector<1x1x25x128xbf16>,
    %c0_21 = arith.constant 0 : index
    %c0_22 = arith.constant 0 : index
    %c7 = arith.constant 7 : index
    %c0_23 = arith.constant 0 : index
    %18 = vector.load %arg9[%c0_21, %c0_22, %c7, %c0_23] : memref<1x18x25x128xbf16, #tpu.memory_space<vmem>>, vector<1x18x1x128xbf16>
    tpu.vector_store %arg9[%c0_21, %c0_22, %c7, %c0_23], %15 {strides = array<i32>} : memref<1x18x25x128xbf16, #tpu.memory_space<vmem>>, vector<1x18x1x128xbf16>,
    %c0_24 = arith.constant 0 : index
    %c0_25 = arith.constant 0 : index
    %c24 = arith.constant 24 : index
    %c0_26 = arith.constant 0 : index
    %19 = vector.load %arg9[%c0_24, %c0_25, %c24, %c0_26] : memref<1x18x25x128xbf16, #tpu.memory_space<vmem>>, vector<1x18x1x128xbf16>
    tpu.vector_store %arg9[%c0_24, %c0_25, %c24, %c0_26], %15 {strides = array<i32>} : memref<1x18x25x128xbf16, #tpu.memory_space<vmem>>, vector<1x18x1x128xbf16>,
    %20 = vector.shape_cast %13 : vector<256x128xbf16> to vector<1x16x16x128xbf16>
    %c0_27 = arith.constant 0 : index
    %c1 = arith.constant 1 : index
    %c8 = arith.constant 8 : index
    %c0_28 = arith.constant 0 : index
    %21 = vector.load %arg9[%c0_27, %c1, %c8, %c0_28] : memref<1x18x25x128xbf16, #tpu.memory_space<vmem>>, vector<1x16x16x128xbf16>
    tpu.vector_store %arg9[%c0_27, %c1, %c8, %c0_28], %20 {strides = array<i32>} : memref<1x18x25x128xbf16, #tpu.memory_space<vmem>>, vector<1x16x16x128xbf16>,
    %c0_29 = arith.constant 0 : index
    %c0_30 = arith.constant 0 : index
    %c7_31 = arith.constant 7 : index
    %c0_32 = arith.constant 0 : index
    %22 = vector.load %arg9[%c0_29, %c0_30, %c7_31, %c0_32] : memref<1x18x25x128xbf16, #tpu.memory_space<vmem>>, vector<1x16x16x128xbf16>
    %23 = vector.shape_cast %22 : vector<1x16x16x128xbf16> to vector<256x128xbf16>
    %c0_33 = arith.constant 0 : index
    %c0_34 = arith.constant 0 : index
    %c8_35 = arith.constant 8 : index
    %c0_36 = arith.constant 0 : index
    %24 = vector.load %arg9[%c0_33, %c0_34, %c8_35, %c0_36] : memref<1x18x25x128xbf16, #tpu.memory_space<vmem>>, vector<1x16x16x128xbf16>
    %25 = vector.shape_cast %24 : vector<1x16x16x128xbf16> to vector<256x128xbf16>
    %c0_37 = arith.constant 0 : index
    %c0_38 = arith.constant 0 : index
    %c9 = arith.constant 9 : index
    %c0_39 = arith.constant 0 : index
    %26 = vector.load %arg9[%c0_37, %c0_38, %c9, %c0_39] : memref<1x18x25x128xbf16, #tpu.memory_space<vmem>>, vector<1x16x16x128xbf16>
    %27 = vector.shape_cast %26 : vector<1x16x16x128xbf16> to vector<256x128xbf16>
    %c0_40 = arith.constant 0 : index
    %c1_41 = arith.constant 1 : index
    %c7_42 = arith.constant 7 : index
    %c0_43 = arith.constant 0 : index
    %28 = vector.load %arg9[%c0_40, %c1_41, %c7_42, %c0_43] : memref<1x18x25x128xbf16, #tpu.memory_space<vmem>>, vector<1x16x16x128xbf16>
    %29 = vector.shape_cast %28 : vector<1x16x16x128xbf16> to vector<256x128xbf16>
    %c0_44 = arith.constant 0 : index
    %c1_45 = arith.constant 1 : index
    %c8_46 = arith.constant 8 : index
    %c0_47 = arith.constant 0 : index
    %30 = vector.load %arg9[%c0_44, %c1_45, %c8_46, %c0_47] : memref<1x18x25x128xbf16, #tpu.memory_space<vmem>>, vector<1x16x16x128xbf16>
    %31 = vector.shape_cast %30 : vector<1x16x16x128xbf16> to vector<256x128xbf16>
    %c0_48 = arith.constant 0 : index
    %c1_49 = arith.constant 1 : index
    %c9_50 = arith.constant 9 : index
    %c0_51 = arith.constant 0 : index
    %32 = vector.load %arg9[%c0_48, %c1_49, %c9_50, %c0_51] : memref<1x18x25x128xbf16, #tpu.memory_space<vmem>>, vector<1x16x16x128xbf16>
    %33 = vector.shape_cast %32 : vector<1x16x16x128xbf16> to vector<256x128xbf16>
    %c0_52 = arith.constant 0 : index
    %c2 = arith.constant 2 : index
    %c7_53 = arith.constant 7 : index
    %c0_54 = arith.constant 0 : index
    %34 = vector.load %arg9[%c0_52, %c2, %c7_53, %c0_54] : memref<1x18x25x128xbf16, #tpu.memory_space<vmem>>, vector<1x16x16x128xbf16>
    %35 = vector.shape_cast %34 : vector<1x16x16x128xbf16> to vector<256x128xbf16>
    %c0_55 = arith.constant 0 : index
    %c2_56 = arith.constant 2 : index
    %c8_57 = arith.constant 8 : index
    %c0_58 = arith.constant 0 : index
    %36 = vector.load %arg9[%c0_55, %c2_56, %c8_57, %c0_58] : memref<1x18x25x128xbf16, #tpu.memory_space<vmem>>, vector<1x16x16x128xbf16>
    %37 = vector.shape_cast %36 : vector<1x16x16x128xbf16> to vector<256x128xbf16>
    %c0_59 = arith.constant 0 : index
    %c2_60 = arith.constant 2 : index
    %c9_61 = arith.constant 9 : index
    %c0_62 = arith.constant 0 : index
    %38 = vector.load %arg9[%c0_59, %c2_60, %c9_61, %c0_62] : memref<1x18x25x128xbf16, #tpu.memory_space<vmem>>, vector<1x16x16x128xbf16>
    %39 = vector.shape_cast %38 : vector<1x16x16x128xbf16> to vector<256x128xbf16>
    %40 = tpu.concatenate %23, %25, %27, %29, %31, %33, %35, %37, %39 in 1 : vector<256x128xbf16>, vector<256x128xbf16>, vector<256x128xbf16>, vector<256x128xbf16>, vector<256x128xbf16>, vector<256x128xbf16>, vector<256x128xbf16>, vector<256x128xbf16>, vector<256x128xbf16> -> vector<256x1152xbf16>
    %c0_63 = arith.constant 0 : index
    %c0_64 = arith.constant 0 : index
    %41 = vector.load %arg4[%c0_63, %c0_64] : memref<1152x128xbf16, #tpu.memory_space<vmem>>, vector<1152x128xbf16>
    %cst_65 = arith.constant dense<0.000000e+00> : vector<256x128xf32>
    %42 = tpu.matmul %40, %41, %cst_65 {dimension_numbers = #tpu.dot_dimension_numbers<[1], [0], [0], [1], [0, 0, 1, 1], [], []>} : vector<256x1152xbf16>, vector<1152x128xbf16>, vector<256x128xf32> -> vector<256x128xf32>
    %c0_66 = arith.constant 0 : index
    %c0_67 = arith.constant 0 : index
    %43 = vector.load %arg5[%c0_66, %c0_67] : memref<1x128xf32, #tpu.memory_space<vmem>>, vector<1x128xf32>
    %44 = vector.broadcast %43 : vector<1x128xf32> to vector<256x128xf32>
    %45 = arith.addf %42, %44 : vector<256x128xf32>
    %cst_68 = arith.constant 0.000000e+00 : f32
    %46 = vector.broadcast %cst_68 : f32 to vector<256x128xf32>
    %47 = arith.maximumf %45, %46 : vector<256x128xf32>
    %48 = arith.truncf %47 : vector<256x128xf32> to vector<256x128xbf16>
    %c0_69 = arith.constant 0 : index
    %c0_70 = arith.constant 0 : index
    %49 = vector.load %arg6[%c0_69, %c0_70] : memref<128x128xbf16, #tpu.memory_space<vmem>>, vector<128x128xbf16>
    %cst_71 = arith.constant dense<0.000000e+00> : vector<256x128xf32>
    %50 = tpu.matmul %48, %49, %cst_71 {dimension_numbers = #tpu.dot_dimension_numbers<[1], [0], [0], [1], [0, 0, 1, 1], [], []>} : vector<256x128xbf16>, vector<128x128xbf16>, vector<256x128xf32> -> vector<256x128xf32>
    %51 = vector.shape_cast %50 : vector<256x128xf32> to vector<1x16x16x128xf32>
    %c0_72 = arith.constant 0 : index
    %c0_73 = arith.constant 0 : index
    %c0_74 = arith.constant 0 : index
    %c0_75 = arith.constant 0 : index
    %52 = vector.load %arg10[%c0_72, %c0_73, %c0_74, %c0_75] : memref<1x16x16x128xf32, #tpu.memory_space<vmem>>, vector<1x16x16x128xf32>
    %53 = arith.addf %51, %52 : vector<1x16x16x128xf32>
    %c0_76 = arith.constant 0 : index
    %c0_77 = arith.constant 0 : index
    %54 = vector.load %arg7[%c0_76, %c0_77] : memref<1x128xf32, #tpu.memory_space<vmem>>, vector<1x128xf32>
    %55 = vector.shape_cast %54 : vector<1x128xf32> to vector<1x1x1x128xf32>
    %56 = vector.broadcast %55 : vector<1x1x1x128xf32> to vector<1x16x16x128xf32>
    %57 = arith.addf %53, %56 : vector<1x16x16x128xf32>
    %cst_78 = arith.constant 0.000000e+00 : f32
    %58 = vector.broadcast %cst_78 : f32 to vector<1x16x16x128xf32>
    %59 = arith.maximumf %57, %58 : vector<1x16x16x128xf32>
    %60 = arith.truncf %59 : vector<1x16x16x128xf32> to vector<1x16x16x128xbf16>
    %c0_79 = arith.constant 0 : index
    %c0_80 = arith.constant 0 : index
    %c0_81 = arith.constant 0 : index
    %c0_82 = arith.constant 0 : index
    %61 = vector.load %arg8[%c0_79, %c0_80, %c0_81, %c0_82] : memref<1x16x16x128xbf16, #tpu.memory_space<vmem>>, vector<1x16x16x128xbf16>
    tpu.vector_store %arg8[%c0_79, %c0_80, %c0_81, %c0_82], %60 {strides = array<i32>} : memref<1x16x16x128xbf16, #tpu.memory_space<vmem>>, vector<1x16x16x128xbf16>,
    return
  }
  func.func @transform_0(%arg0: i32) -> (i32, i32, i32, i32) {
    %c0_i32 = arith.constant 0 : i32
    %c0_i32_0 = arith.constant 0 : i32
    %c0_i32_1 = arith.constant 0 : i32
    %c0_i32_2 = arith.constant 0 : i32
    return %arg0, %c0_i32, %c0_i32_0, %c0_i32_1 : i32, i32, i32, i32
  }
  func.func @transform_1(%arg0: i32) -> (i32, i32) {
    %c0_i32 = arith.constant 0 : i32
    %c0_i32_0 = arith.constant 0 : i32
    %c0_i32_1 = arith.constant 0 : i32
    return %c0_i32, %c0_i32_0 : i32, i32
  }
  func.func @transform_2(%arg0: i32) -> (i32, i32) {
    %c0_i32 = arith.constant 0 : i32
    %c0_i32_0 = arith.constant 0 : i32
    %c0_i32_1 = arith.constant 0 : i32
    return %c0_i32, %c0_i32_0 : i32, i32
  }
  func.func @transform_3(%arg0: i32) -> (i32, i32) {
    %c0_i32 = arith.constant 0 : i32
    %c0_i32_0 = arith.constant 0 : i32
    %c0_i32_1 = arith.constant 0 : i32
    return %c0_i32, %c0_i32_0 : i32, i32
  }
  func.func @transform_4(%arg0: i32) -> (i32, i32) {
    %c0_i32 = arith.constant 0 : i32
    %c0_i32_0 = arith.constant 0 : i32
    %c0_i32_1 = arith.constant 0 : i32
    return %c0_i32, %c0_i32_0 : i32, i32
  }
  func.func @transform_5(%arg0: i32) -> (i32, i32) {
    %c0_i32 = arith.constant 0 : i32
    %c0_i32_0 = arith.constant 0 : i32
    %c0_i32_1 = arith.constant 0 : i32
    return %c0_i32, %c0_i32_0 : i32, i32
  }
  func.func @transform_6(%arg0: i32) -> (i32, i32) {
    %c0_i32 = arith.constant 0 : i32
    %c0_i32_0 = arith.constant 0 : i32
    %c0_i32_1 = arith.constant 0 : i32
    return %c0_i32, %c0_i32_0 : i32, i32
  }
  func.func @transform_7(%arg0: i32) -> (i32, i32, i32, i32) {
    %c0_i32 = arith.constant 0 : i32
    %c0_i32_0 = arith.constant 0 : i32
    %c0_i32_1 = arith.constant 0 : i32
    %c0_i32_2 = arith.constant 0 : i32
    return %arg0, %c0_i32, %c0_i32_0, %c0_i32_1 : i32, i32, i32, i32
  }
}

</mosaic_0001>

<bundles_post_ra>
// kernel: tpu_custom_call.1
= control target key start
LH: loop header
LB: loop body
LE: loop exit
PB: predicated region body
PF: predicated region fallthrough
CT: control target
= control target key end

     0   :  { %s10353_s0 = inlined_call_operand.hbm [shape: bf16[2,16,16,16], index: 0, kind: input, shape index: {}]   ;;  %s10354_s1 = inlined_call_operand.hbm [shape: bf16[16,256], index: 1, kind: input, shape index: {}]   ;;  %s10355_s2 = inlined_call_operand.vmem [shape: f32[1,128], index: 2, kind: input, shape index: {}]   ;;  %s10356_s3 = inlined_call_operand.hbm [shape: bf16[1152,128], index: 3, kind: input, shape index: {}]   ;;  %s10357_s4 = inlined_call_operand.vmem [shape: f32[1,128], index: 4, kind: input, shape index: {}]   ;;  %s10358_s5 = inlined_call_operand.hbm [shape: bf16[128,128], index: 5, kind: input, shape index: {}]   ;;  %s10359_s6 = inlined_call_operand.vmem [shape: f32[1,128], index: 6, kind: input, shape index: {}]   ;;  %s10360_s7 = inlined_call_operand.hbm [shape: bf16[2,16,16,128], index: 7, kind: output, shape index: {}]  }
   0x1   :  { %10498 = sst [smem:[#allocation116_spill]] %s10354_s1 }
   0x2   :  { %12 = vsyncpa [#allocation5], 0 }
   0x3   :  { %14 = vsyncpa [#allocation5 + $0x1], 0 }
   0x4   :  { %15 = vsyncpa [#allocation8], 0 }
   0x5   :  { %16 = vsyncpa [#allocation11], 0 }
   0x6   :  { %17 = vsyncpa [#allocation6], 0 }
   0x7   :  { %19 = vsyncpa [#allocation6 + $0x1], 0  ;;  %s7423_s24 = smov 0   ;;  %s7425_s25 = smov 0  }
   0x8   :  { %s7427_s26 = smov 0   ;;  %s7429_s27 = smov 0  }
   0x9 LB: > { %s7444_s28 = sadd.s32 4294967295, %s7369_s27   ;;  %s5769_s29 = sadd.s32 4294967294, %s7369_s27   ;;  %s7369_s27 = sphi %s7429_s27, %s10937_s27   ;;  %s7365_s26 = sphi %s7427_s26, %s10936_s26   ;;  %s7361_s25 = sphi %s7425_s25, %s10935_s25   ;;  %s7357_s24 = sphi %s7423_s24, %s10934_s24  }
   0xa   : > { %p45_p0 = scmp.ne.s32.totalorder %s7361_s25, %s7357_s24  ;;  %p10361_p1 = scmp.eq.s32.totalorder %s7444_s28, 0 }
   0xb   : > { %p201_p3 = scmp.eq.s32.totalorder %s5769_s29, 1  ;;  %p5770_p5 = scmp.ge.s32.totalorder %s7369_s27, 1 }
   0xc   : > { %p7453_p4 = por %p10361_p1, %p45_p0  ;;  %p208_p7 = scmp.lt.s32.totalorder %s7369_s27, 3 }
   0xd   : > { %p7458_p6 = por %p201_p3, %p45_p0  ;;  %s7371_s10 = smov [#allocation7]  }
   0xe   : > { %s10499_s30 = scalar_select %p7453_p4, 1, 0 }
   0xf   : > { %s10500_s8 = scalar_select %p7458_p6, 1, 0 }
  0x10   : > { %p7463_p8 = pnand %p5770_p5, %p208_p7  ;;  %s220_s11 = sshll.u32 %s7371_s10, 4  ;;  %s7467_s11 = int_to_ptr.vmem [resolvable:$true] %s220_s11 }
  0x11   : > { %10501 = sst [smem:[#allocation17_spill]] %s10500_s8  ;;  %s7372_s13 = smov [#allocation9]  }
  0x12   : > { %s10502_s9 = scalar_select %p7463_p8, 1, 0 }
  0x13   : > { %p6947_p9 = pneg %p7463_p8  ;;  %s236_s14 = sshll.u32 %s7372_s13, 4  ;;  %s7478_s14 = int_to_ptr.vmem [resolvable:$true] %s236_s14 }
  0x14   : > { %s10504_s1 = sld [smem:[#allocation116_spill]] }
  0x15   : > { %p7474_p11 = pnand %p6947_p9, %p10361_p1 }
  0x17   : > { %p7488_p13 = pneg %p7474_p11 }
  0x1a   : > { %s7181_s17 = scalar_lea.hbm %s10504_s1, 256 }
  0x1b   : > { %p7182_p12 = scmp.ne.s32.totalorder %s10504_s1, %s7181_s17  ;;  %p7188_p5 = scmp.lt.u32.totalorder %s7181_s17, %s10504_s1 }
  0x1d   : > { %p7184_p0 = pnand %p7488_p13, %p7182_p12 }
  0x1f   : > { %p7185_p3 = pneg %p7184_p0 }
  0x21   : > { %p7190_p7 = pnand %p7188_p5, %p7185_p3 }
  0x23   : > { %7193 = shalt.err (!%p7190_p7)
}
  0x24   : > { %s7194_s23 = scalar_lea.vmem %s7467_s11, 256  ;;  %p7202_p2 = scmp.lt.s32.totalorder %s7467_s11, %s7467_s11 }
  0x25   : > { %p7195_p9 = scmp.ne.s32.totalorder %s7467_s11, %s7194_s23  ;;  %p7203_p6 = scmp.lt.s32.totalorder %s7194_s23, %s7194_s23 }
  0x27   : > { %p7197_p10 = pnand %p7195_p9, %p7488_p13  ;;  %p7204_p12 = por %p7203_p6, %p7202_p2 }
  0x29   : > { %p7198_p1 = pneg %p7197_p10 }
  0x2b   : > { %p7205_p0 = pnand %p7204_p12, %p7198_p1 }
  0x2d   : > { %7208 = shalt.err (!%p7205_p0)
}
  0x2e   : > { %s7373_s29 = smov 128   ;;  %s7374_s10 = smov 8  }
  0x2f   : > { %6950 = dma.hbm_to_vmem [thread:$0]  (!%p7474_p11), %s10504_s1, 256, %s7467_s11, [#allocation8], %s7373_s29, %s7373_s29, %s7374_s10  }
  0x30   : > { %s7209_s18 = scalar_lea.hbm %s10356_s3, 9216 }
  0x31   : > { %p7210_p2 = scmp.ne.s32.totalorder %s10356_s3, %s7209_s18  ;;  %p7216_p10 = scmp.lt.u32.totalorder %s7209_s18, %s10356_s3 }
  0x33   : > { %p7212_p1 = pnand %p7210_p2, %p7488_p13 }
  0x35   : > { %p7213_p6 = pneg %p7212_p1 }
  0x37   : > { %p7218_p3 = pnand %p7216_p10, %p7213_p6 }
  0x39   : > { %7221 = shalt.err (!%p7218_p3)
}
  0x3a   : > { %s7222_s11 = scalar_lea.vmem %s7478_s14, 9216  ;;  %p7230_p12 = scmp.lt.s32.totalorder %s7478_s14, %s7478_s14 }
  0x3b   : > { %p7223_p5 = scmp.ne.s32.totalorder %s7478_s14, %s7222_s11  ;;  %p7231_p0 = scmp.lt.s32.totalorder %s7222_s11, %s7222_s11 }
  0x3d   : > { %p7225_p7 = pnand %p7223_p5, %p7488_p13  ;;  %p7232_p2 = por %p7231_p0, %p7230_p12 }
  0x3f   : > { %p7226_p9 = pneg %p7225_p7 }
  0x41   : > { %p7233_p1 = pnand %p7232_p2, %p7226_p9 }
  0x43   : > { %7236 = shalt.err (!%p7233_p1)
}
  0x44   : > { %s7375_s29 = smov 64   ;;  %s7376_s10 = smov 4  }
  0x45   : > { %6953 = dma.hbm_to_vmem [thread:$0]  (!%p7474_p11), %s10356_s3, 9216, %s7478_s14, [#allocation8], %s7375_s29, %s7375_s29, %s7376_s10  }
  0x46   : > { %s7377_s16 = smov [#allocation10]   ;;  %s7536_s18 = sadd.s32 1, %s7369_s27  }
  0x47   : > { %s252_s17 = sshll.u32 %s7377_s16, 4  ;;  %s7237_s22 = scalar_lea.hbm %s10358_s5, 1024  ;;  %s253_s17 = int_to_ptr.vmem [resolvable:$true] %s252_s17 }
  0x48   : > { %p7238_p6 = scmp.ne.s32.totalorder %s10358_s5, %s7237_s22  ;;  %p7244_p5 = scmp.lt.u32.totalorder %s7237_s22, %s10358_s5 }
  0x4a   : > { %p7240_p10 = pnand %p7238_p6, %p7488_p13 }
  0x4c   : > { %p7241_p3 = pneg %p7240_p10 }
  0x4e   : > { %p7246_p7 = pnand %p7244_p5, %p7241_p3 }
  0x50   : > { %7249 = shalt.err (!%p7246_p7)
}
  0x51   : > { %s7250_s14 = scalar_lea.vmem %s253_s17, 1024  ;;  %p7258_p2 = scmp.lt.s32.totalorder %s253_s17, %s253_s17 }
  0x52   : > { %p7251_p9 = scmp.ne.s32.totalorder %s253_s17, %s7250_s14  ;;  %p7259_p1 = scmp.lt.s32.totalorder %s7250_s14, %s7250_s14 }
  0x54   : > { %p7253_p12 = pnand %p7251_p9, %p7488_p13  ;;  %p7260_p4 = por %p7259_p1, %p7258_p2 }
  0x56   : > { %p7254_p0 = pneg %p7253_p12 }
  0x58   : > { %p7261_p8 = pnand %p7260_p4, %p7254_p0 }
  0x5a   : > { %7264 = shalt.err (!%p7261_p8)
}
  0x5b   : > { %6956 = dma.hbm_to_vmem [thread:$0]  (!%p7474_p11), %s10358_s5, 1024, %s253_s17, [#allocation11], %s7375_s29, %s7375_s29, %s7376_s10  }
  0x5c   : > { %s29_s20 = ssub.s32 %s7369_s27, %s7536_s18  ;;  %s32_s12 = sadd.s32 1, %s7365_s26 }
  0x5d   : > { %p30_p4 = scmp.eq.s32.totalorder %s29_s20, 0  ;;  %p39_p8 = scmp.ne.s32.totalorder %s7365_s26, %s7361_s25 }
  0x5e   : > { %p40_p13 = scmp.eq.s32.totalorder %s7369_s27, 0  ;;  %p6968_p6 = scmp.lt.s32.totalorder %s7369_s27, 2 }
  0x5f   : > { %s7567_s13 = scalar_select %p30_p4, %s7365_s26, %s32_s12  }
  0x60   : > { %p41_p10 = por %p40_p13, %p39_p8  ;;  %p10506_p3 = scmp.eq.s32.totalorder %s7444_s28, 1 }
  0x61   : > { %s269_s16 = sand.u32 1, %s7365_s26   ;;  %s6162_s19 = sshll.u32 %s7369_s27, 11 }
  0x62   : > { %p7571_p5 = por %p10506_p3, %p39_p8  ;;  %s5775_s21 = sshll.u32 %s269_s16, 7 }
  0x63   : > { %s7580_s17 = scalar_lea.hbm %s10353_s0, %s6162_s19  ;;  %s273_s11 = scalar_lea.vmem [#allocation4], %s5775_s21 }
  0x64   : > { %s280_s14 = sshll.u32 %s273_s11, 4  ;;  %p7582_p11 = pnand %p6968_p6, %p41_p10  ;;  %s7586_s14 = int_to_ptr.vmem [resolvable:$true] %s280_s14 }
  0x65   : > { %s7588_s8 = scalar_lea.sflag [#allocation5], %s269_s16  ;;  %s7265_s20 = scalar_lea.hbm %s7580_s17, 2048 }
  0x66   : > { %p7266_p7 = scmp.ne.s32.totalorder %s7580_s17, %s7265_s20  ;;  %p7267_p9 = pneg %p7582_p11 }
  0x67   : > { %s7270_s21 = scalar_lea.hbm %s10353_s0, 4096  ;;  %p7271_p2 = scmp.lt.u32.totalorder %s7580_s17, %s10353_s0 }
  0x68   : > { %p7268_p12 = pnand %p7267_p9, %p7266_p7  ;;  %p7272_p1 = scmp.lt.u32.totalorder %s7270_s21, %s7265_s20 }
  0x69   : > { %p7274_p8 = scmp.lt.u32.totalorder %s7265_s20, %s7580_s17 }
  0x6a   : > { %p7269_p0 = pneg %p7268_p12  ;;  %p7273_p4 = por %p7272_p1, %p7271_p2 }
  0x6c   : > { %p7275_p13 = por %p7274_p8, %p7273_p4 }
  0x6e   : > { %p7276_p6 = pnand %p7275_p13, %p7269_p0 }
  0x70   : > { %7279 = shalt.err (!%p7276_p6)
}
  0x71   : > { %s7280_s16 = scalar_lea.vmem %s7586_s14, 2048  ;;  %s7378_s11 = smov [#allocation4]  }
  0x72   : > { %p7281_p10 = scmp.ne.s32.totalorder %s7586_s14, %s7280_s16  ;;  %s7285_s12 = sshll.u32 %s7378_s11, 4  ;;  %s7286_s12 = int_to_ptr.vmem [resolvable:$false] %s7285_s12 }
  0x73   : > { %s7287_s19 = scalar_lea.vmem %s7286_s12, 4096  ;;  %p7288_p12 = scmp.lt.s32.totalorder %s7586_s14, %s7286_s12 }
  0x74   : > { %p7283_p3 = pnand %p7281_p10, %p7267_p9  ;;  %p7289_p2 = scmp.lt.s32.totalorder %s7287_s19, %s7280_s16 }
  0x76   : > { %p7284_p7 = pneg %p7283_p3  ;;  %p7290_p1 = por %p7289_p2, %p7288_p12 }
  0x78   : > { %p7291_p4 = pnand %p7290_p1, %p7284_p7 }
  0x7a   : > { %7294 = shalt.err (!%p7291_p4)
}
  0x7b   : > { %6960 = dma.hbm_to_vmem [thread:$0]  (!%p7582_p11), %s7580_s17, 2048, %s7586_s14, %s7588_s8, %s7375_s29, %s7375_s29, %s7376_s10  }
  0x7c   : > { %p10509_p9 = scmp.ne.s32.totalorder %s10502_s9, 0 }
  0x7e   : > { %292 = sbr.rel (%p10509_p9) target bundleno = 1257 (0x4e9), region = 48 }
  0x85   : > { %s7622_s20 = sand.u32 1, %s7361_s25   ;;  %p10510_p0 = scmp.ne.s32.totalorder %s10499_s30, 0 }
  0x86   : > { %s5779_s21 = sshll.u32 %s7622_s20, 7  ;;  %s295_s22 = scalar_lea.sflag [#allocation5], %s7622_s20 }
  0x87   : > { %s7628_s1 = scalar_lea.vmem [#allocation4], %s5779_s21 }
  0x88   : > { %7340 = dma.done.wait (%p10510_p0), %s295_s22, 2048  }
  0x89   : > { %7342 = vsyncadd (%p10510_p0), %s295_s22, 4294965248  ;;  %p10511_p11 = scmp.eq.s32.totalorder %s7444_s28, 0 }
  0x8b   : > { %7344 = dma.done.wait (%p10511_p11), [#allocation8], 9472   ;;  %p10512_p8 = pmov %p10511_p11 }
  0x8d   : > { %7346 = vsyncadd (%p10512_p8), [#allocation8], 4294957824  ;;  %p10513_p13 = pmov %p10512_p8 }
  0x8e   : > { %p10514_p6 = pmov %p10512_p8 }
  0x8f   : > { %7348 = dma.done.wait (%p10513_p13), [#allocation11], 1024  }
  0x90   : > { %7350 = vsyncadd (%p10514_p6), [#allocation11], 4294966272  ;;  %v7379_v0 = vmov 0   ;;  %v7015_v1 = vld [vmem:[#allocation7 + $0x4] ss:$8 sps:$4 sm:$0xff]   ;;  %vm466_vm0 = vcmask 130048  }
  0x91   : > { %547 = vmatprep.mubr.bf16.mxu0 %v7379_v0  ;;  %827 = vst [vmem:[#allocation2] sm:$0xf] %v7379_v0  ;;  %828 = vst [vmem:[#allocation2 + $0x4] sm:$0xf] %v7379_v0  ;;  %v7017_v2 = vld [vmem:[#allocation7] ss:$8 sps:$4 sm:$0xff]   ;;  %515 = vmatprep.subr.bf16.mxu0 %v7015_v1 }
  0x92   : > { %829 = vst [vmem:[#allocation2 + $0x8] sm:$0xf] %v7379_v0  ;;  %837 = vst [vmem:[#allocation2 + $0x110] sm:$0xf] %v7379_v0  ;;  %v7018_v3 = vld [vmem:[%s7628_s1] sm:$0xff]   ;;  %516 = vmatpush1.bf16.msra.mxu0 %v7017_v2  ;;  %v7019_v4 = vld [vmem:[%s7628_s1 + $0x8] sm:$0xff]  }
  0x93   : > { %838 = vst [vmem:[#allocation2 + $0x114] sm:$0xf] %v7379_v0  ;;  %839 = vst [vmem:[#allocation2 + $0x118] sm:$0xf] %v7379_v0  ;;  %v7032_v5 = vld [vmem:[#allocation9 + $0xc0] sm:$0xff]   ;;  %v7036_v8 = vld [vmem:[#allocation9 + $0xc8] sm:$0xff]  }
  0x94   : > { %v7033_v6 = vld [vmem:[#allocation9 + $0x80] sm:$0xff]   ;;  %6435 = vmatprep.subr.bf16.mxu0 %v7032_v5  ;;  %v7037_v9 = vld [vmem:[#allocation9 + $0x88] sm:$0xff]   ;;  %v7038_v10 = vld [vmem:[#allocation9 + $0xd0] sm:$0xff]   ;;  %vm843_vm1 = vcmask 1043459   ;;  %vm844_vm2 = vsmask.f32 7950 }
  0x95   : > { %5802 = vmatmul.mubr.msk.bf16.vlgmr.msra.gmra.mrb[0].mxu0 %vm466_vm0, %v7018_v3  ;;  %v7020_v7 = vld [vmem:[%s7628_s1 + $0x10] sm:$0xff]   ;;  %v7039_v11 = vld [vmem:[#allocation9 + $0x90] sm:$0xff]   ;;  %v7040_v12 = vld [vmem:[#allocation9 + $0xd8] sm:$0xff]   ;;  %v10515_v40 = vmov 0  ;;  %vm831_vm4 = vsmask.f32 256 }
  0x96   : > { %557 = vmatprep.mubr.bf16.mxu0 %v7379_v0  ;;  %6436 = vmatpush3.bf16.msra.mxu0 %v7033_v6  ;;  %v7021_v13 = vld [vmem:[%s7628_s1 + $0x18] sm:$0xff]   ;;  %v7041_v14 = vld [vmem:[#allocation9 + $0x98] sm:$0xff]   ;;  %v7042_v15 = vld [vmem:[#allocation9 + $0xe0] sm:$0xff]   ;;  %vm830_vm5 = vcmask 1040384   ;;  %v10518_v44 = vmov 0  ;;  %s10230_s12 = scalar_lea.vmem [#allocation12], %s5779_s21 }
  0x97   : > { %6437 = vmatprep.subr.bf16.mxu0 %v7036_v8  ;;  %v7043_v16 = vld [vmem:[#allocation9 + $0xa0] sm:$0xff]   ;;  %v7044_v17 = vld [vmem:[#allocation9 + $0xe8] sm:$0xff]   ;;  %v7022_v20 = vld [vmem:[%s7628_s1 + $0x20] sm:$0xff]   ;;  %vm1147_vm7 = vsmask.f32 4368  ;;  %s6227_s19 = sshll.u32 %s7444_s28, 11 }
  0x98   : > { %v7046_v18 = vld [vmem:[#allocation9 + $0x40] sm:$0xff]   ;;  %v7048_v21 = vld [vmem:[#allocation9 + $0x48] sm:$0xff]   ;;  %v7050_v24 = vld [vmem:[#allocation9 + $0x50] sm:$0xff]   ;;  %vm1517_vm9 = vsmask.f32 3328  ;;  %s5667_s21 = sshll.u32 %s10230_s12, 4  ;;  %s10305_s30 = scalar_lea.hbm %s10360_s7, %s6227_s19  ;;  %s10307_s21 = int_to_ptr.vmem [resolvable:$true] %s5667_s21 }
  0x99   : > { %v7047_v19 = vld [vmem:[#allocation9] sm:$0xff]   ;;  %6323 = vmatprep.subr.bf16.mxu1 %v7046_v18  ;;  %v7045_v22 = vld [vmem:[#allocation9 + $0xa8] sm:$0xff]   ;;  %v7051_v25 = vld [vmem:[#allocation9 + $0xf0] sm:$0xff]   ;;  %vm1518_vm10 = vsmask.f32 7440  ;;  %s5654_s28 = scalar_lea.sflag [#allocation6], %s7622_s20 }
  0x9a   : > { %6438 = vmatpush3.bf16.msra.mxu0 %v7037_v9  ;;  %6324 = vmatpush3.bf16.msra.mxu1 %v7047_v19  ;;  %v7049_v23 = vld [vmem:[#allocation9 + $0x8] sm:$0xff]   ;;  %v7052_v26 = vld [vmem:[#allocation9 + $0x10] sm:$0xff]   ;;  %v7054_v28 = vld [vmem:[#allocation9 + $0x58] sm:$0xff]   ;;  %s7295_s9 = scalar_lea.vmem %s10307_s21, 2048  ;;  %s7380_s29 = smov [#allocation12]  }
  0x9b   : > { %6439 = vmatprep.subr.bf16.mxu0 %v7038_v10  ;;  %6325 = vmatprep.subr.bf16.mxu1 %v7048_v21  ;;  %v7053_v27 = vld [vmem:[#allocation9 + $0xb0] sm:$0xff]   ;;  %v7023_v29 = vld [vmem:[%s7628_s1 + $0x28] sm:$0xff]   ;;  %v7024_v30 = vld [vmem:[%s7628_s1 + $0x30] sm:$0xff]   ;;  %p7296_p10 = scmp.ne.s32.totalorder %s10307_s21, %s7295_s9  ;;  %s7299_s10 = sshll.u32 %s7380_s29, 4  ;;  %s7300_s10 = int_to_ptr.vmem [resolvable:$false] %s7299_s10 }
  0x9c   : > { %v7025_v31 = vld [vmem:[%s7628_s1 + $0x38] sm:$0xff]   ;;  %v7026_v32 = vld [vmem:[%s7628_s1 + $0x40] sm:$0xff]   ;;  %v7027_v33 = vld [vmem:[%s7628_s1 + $0x48] sm:$0xff]   ;;  %s7301_s17 = scalar_lea.vmem %s7300_s10, 4096  ;;  %p7302_p12 = scmp.lt.s32.totalorder %s10307_s21, %s7300_s10 }
  0x9d   : > { %5803 = vmatmul.mubr.msk.bf16.gmra.mrb[4].mxu0 %vm466_vm0, %v7019_v4  ;;  %v7028_v34 = vld [vmem:[%s7628_s1 + $0x50] sm:$0xff]   ;;  %v7055_v35 = vld [vmem:[#allocation9 + $0x18] sm:$0xff]   ;;  %v7029_v36 = vld [vmem:[%s7628_s1 + $0x58] sm:$0xff]   ;;  %p7297_p3 = pnand %p7296_p10, %p7571_p5  ;;  %p7303_p2 = scmp.lt.s32.totalorder %s7301_s17, %s7295_s9 }
  0x9e   : > { %567 = vmatprep.mubr.bf16.mxu0 %v7379_v0  ;;  %6440 = vmatpush3.bf16.msra.mxu0 %v7039_v11  ;;  %v7056_v37 = vld [vmem:[#allocation9 + $0x60] sm:$0xff]   ;;  %v846_v39 = vld [vmem:[#allocation2] sm:$0x8]  ;;  %vm7683_vm3 = vmand %vm843_vm1, %vm844_vm2 }
  0x9f   : > { %6441 = vmatprep.subr.bf16.mxu0 %v7040_v12  ;;  %6326 = vmatpush3.bf16.msra.mxu1 %v7049_v23  ;;  %v7057_v38 = vld [vmem:[#allocation9 + $0x20] sm:$0xff]   ;;  %v10516_v40 = vsel %vm7683_vm3, 4294967295, %v10515_v40  ;;  %v847_v41 = vsel %vm7683_vm3, 0, %v846_v39  ;;  %v7058_v42 = vld [vmem:[#allocation9 + $0x68] sm:$0xff]   ;;  %vm7692_vm6 = vmand %vm830_vm5, %vm831_vm4  ;;  %p7298_p7 = pneg %p7297_p3  ;;  %p7304_p1 = por %p7303_p2, %p7302_p12 }
  0xa0   : > { %6327 = vmatprep.subr.bf16.mxu1 %v7050_v24  ;;  %10517 = vst [vmem:[#allocation18_spill] sm:$0xff] %v10516_v40  ;;  %848 = vst [vmem:[#allocation2] sm:$0x8] %v847_v41  ;;  %v7059_v43 = vld [vmem:[#allocation9 + $0x28] sm:$0xff]   ;;  %v10519_v44 = vsel %vm7692_vm6, 4294967295, %v10518_v44  ;;  %v7030_v46 = vld [vmem:[%s7628_s1 + $0x60] sm:$0xff]  }
  0xa1   : > { %10520 = vst [vmem:[#allocation19_spill] sm:$0xff] %v10519_v44  ;;  %v833_v45 = vld [vmem:[#allocation2 + $0xc] sm:$0x1]  ;;  %v7060_v48 = vld [vmem:[#allocation9 + $0x70] sm:$0xff]   ;;  %v1101_v50 = vld [vmem:[#allocation2 + $0x8] sm:$0xf]  ;;  %p7305_p4 = pnand %p7304_p1, %p7298_p7 }
  0xa2   : > { %6442 = vmatpush3.bf16.msra.mxu0 %v7041_v14  ;;  %v834_v47 = vsel %vm7692_vm6, 0, %v833_v45  ;;  %v1100_v49 = vld [vmem:[#allocation2 + $0x4] sm:$0xf]  ;;  %v1164_v53 = vshrl.u32 %v1101_v50, 16  ;;  %v849_v54 = vld [vmem:[#allocation2 + $0x10] sm:$0x8]  ;;  %vm7704_vm8 = vmor %vm831_vm4, %vm1147_vm7 }
  0xa3   : > { %6443 = vmatprep.subr.bf16.mxu0 %v7042_v15  ;;  %6328 = vmatpush3.bf16.msra.mxu1 %v7052_v26  ;;  %835 = vst [vmem:[#allocation2 + $0xc] sm:$0x1] %v834_v47  ;;  %v7062_v51 = vld [vmem:[#allocation9 + $0x30] sm:$0xff]   ;;  %v1155_v52 = vshrl.u32 %v1100_v49, 16  ;;  %v850_v55 = vsel %vm7683_vm3, 0, %v849_v54  ;;  %v1158_v57 = vshll.u32 %v1100_v49, 16  ;;  %v5915_v6 = vcombine.low %v1100_v49, %v1101_v50  ;;  %vm7721_vm11 = vmor %vm1517_vm9, %vm1518_vm10 }
  0xa4   : > { %6329 = vmatprep.subr.bf16.mxu1 %v7054_v28  ;;  %v1166_v58 = vrot.slane %v1164_v53, 7  ;;  %v1167_v59 = vshll.u32 %v1101_v50, 16  ;;  %851 = vst [vmem:[#allocation2 + $0x10] sm:$0x8] %v850_v55  ;;  %v7064_v61 = vld [vmem:[#allocation9 + $0x78] sm:$0xff]   ;;  %v1526_v18 = vrot.slane %v1164_v53, 4 }
  0xa5   : > { %5804 = vmatmul.mubr.msk.bf16.gmra.mrb[8].mxu0 %vm466_vm0, %v7020_v7  ;;  %v1157_v56 = vrot.slane %v1155_v52, 7  ;;  %v7065_v63 = vld [vmem:[#allocation9 + $0x38] sm:$0xff]   ;;  %4312 = vmatprep.mubr.bf16.mxu1 %v5915_v6  ;;  %v1520_v15 = vrot.slane %v1155_v52, 4  ;;  %v903_v19 = vld [vmem:[#allocation2 + $0x1c] sm:$0x1]  ;;  %v7071_v39 = vld [vmem:[#allocation9 + $0x140] sm:$0xff]  }
  0xa6   : > { %577 = vmatprep.mubr.bf16.mxu0 %v7379_v0  ;;  %6444 = vmatpush3.bf16.msra.mxu0 %v7043_v16  ;;  %v1169_v3 = vor.u32 %v1167_v59, %v1166_v58  ;;  %v7031_v9 = vld [vmem:[%s7628_s1 + $0x68] sm:$0xff]   ;;  %v1521_v16 = vrot.slane %v1158_v57, 5  ;;  %v904_v23 = vsel %vm7692_vm6, 0, %v903_v19  ;;  %v855_v41 = vld [vmem:[#allocation2 + $0x30] sm:$0x8]  ;;  %v7077_v50 = vld [vmem:[#allocation9 + $0x148] sm:$0xff]  }
  0xa7   : > { %6445 = vmatprep.subr.bf16.mxu0 %v7044_v17  ;;  %6330 = vmatpush3.bf16.msra.mxu1 %v7055_v35  ;;  %v1099_v60 = vld [vmem:[#allocation2] sm:$0x8]  ;;  %v1160_v1 = vor.u32 %v1158_v57, %v1157_v56  ;;  %v1162_v2 = vrot.slane %v1157_v56, 4  ;;  %v7061_v12 = vld [vmem:[#allocation9 + $0xf8] sm:$0xff]   ;;  %v1524_v17 = vrot.slane %v1167_v59, 5  ;;  %v7035_v35 = vld [vmem:[%s7628_s1 + $0x78] sm:$0xff]  }
  0xa8   : > { %6331 = vmatprep.subr.bf16.mxu1 %v7056_v37  ;;  %v1150_v62 = vshrl.u32 %v1099_v60, 16  ;;  %905 = vst [vmem:[#allocation2 + $0x1c] sm:$0x1] %v904_v23  ;;  %v906_v37 = vld [vmem:[#allocation2 + $0x2c] sm:$0x1]  ;;  %v7079_v53 = vld [vmem:[#allocation9 + $0x108] sm:$0xff]  }
  0xa9   : > { %v1170_v7 = vsel %vm7704_vm8, %v1162_v2, %v1169_v3  ;;  %v1527_v21 = vor.u32 %v1526_v18, %v1524_v17  ;;  %v915_v54 = vld [vmem:[#allocation2 + $0x5c] sm:$0x1]  ;;  %v864_v56 = vld [vmem:[#allocation2 + $0x60] sm:$0x8]  ;;  %v918_v58 = vld [vmem:[#allocation2 + $0x6c] sm:$0x1] }
  0xaa   : > { %6446 = vmatpush3.bf16.msra.mxu0 %v7045_v22  ;;  %v5851_v5 = vrot.slane %v1150_v62, 11  ;;  %v900_v8 = vld [vmem:[#allocation2 + $0xc] sm:$0x1]  ;;  %v852_v22 = vld [vmem:[#allocation2 + $0x20] sm:$0x8]  ;;  %v916_v55 = vsel %vm7692_vm6, 0, %v915_v54 }
  0xab   : > { %6447 = vmatprep.subr.bf16.mxu0 %v7051_v25  ;;  %6332 = vmatpush3.bf16.msra.mxu1 %v7057_v38  ;;  %v901_v11 = vsel %vm7692_vm6, 0, %v900_v8  ;;  %v853_v24 = vsel %vm7683_vm3, 0, %v852_v22  ;;  %v907_v38 = vsel %vm7692_vm6, 0, %v906_v37  ;;  %917 = vst [vmem:[#allocation2 + $0x5c] sm:$0x1] %v916_v55  ;;  %v865_v57 = vsel %vm7683_vm3, 0, %v864_v56 }
  0xac   : > { %6333 = vmatprep.subr.bf16.mxu1 %v7058_v42  ;;  %v1161_v10 = vsel %vm7704_vm8, %v5851_v5, %v1160_v1  ;;  %902 = vst [vmem:[#allocation2 + $0xc] sm:$0x1] %v901_v11  ;;  %854 = vst [vmem:[#allocation2 + $0x20] sm:$0x8] %v853_v24  ;;  %v7073_v42 = vld [vmem:[#allocation9 + $0x100] sm:$0xff]   ;;  %v919_v59 = vsel %vm7692_vm6, 0, %v918_v58 }
  0xad   : > { %5805 = vmatmul.mubr.msk.bf16.gmra.mrb[12].mxu0 %vm466_vm0, %v7021_v13  ;;  %v7063_v13 = vld [vmem:[#allocation9 + $0xb8] sm:$0xff]   ;;  %v5899_v14 = vcombine.low %v1161_v10, %v1170_v7  ;;  %908 = vst [vmem:[#allocation2 + $0x2c] sm:$0x1] %v907_v38  ;;  %866 = vst [vmem:[#allocation2 + $0x60] sm:$0x8] %v865_v57  ;;  %v7083_v60 = vld [vmem:[#allocation9 + $0x150] sm:$0xff]  }
  0xae   : > { %587 = vmatprep.mubr.bf16.mxu0 %v7379_v0  ;;  %6448 = vmatpush3.bf16.msra.mxu0 %v7053_v27  ;;  %v7034_v27 = vld [vmem:[%s7628_s1 + $0x70] sm:$0xff]   ;;  %920 = vst [vmem:[#allocation2 + $0x6c] sm:$0x1] %v919_v59  ;;  %v921_v1 = vld [vmem:[#allocation2 + $0x7c] sm:$0x1]  ;;  %v7089_v8 = vld [vmem:[#allocation9 + $0x158] sm:$0xff]  }
  0xaf   : > { %6334 = vmatpush3.bf16.msra.mxu1 %v7059_v43  ;;  %6449 = vmatprep.subr.bf16.mxu0 %v7061_v12  ;;  %v909_v43 = vld [vmem:[#allocation2 + $0x3c] sm:$0x1]  ;;  %v922_v2 = vsel %vm7692_vm6, 0, %v921_v1  ;;  %v870_v3 = vld [vmem:[#allocation2 + $0x80] sm:$0x8]  ;;  %v7091_v11 = vld [vmem:[#allocation9 + $0x118] sm:$0xff]  }
  0xb0   : > { %6335 = vmatprep.subr.bf16.mxu1 %v7060_v48  ;;  %v910_v45 = vsel %vm7692_vm6, 0, %v909_v43  ;;  %v912_v48 = vld [vmem:[#allocation2 + $0x4c] sm:$0x1]  ;;  %923 = vst [vmem:[#allocation2 + $0x7c] sm:$0x1] %v922_v2  ;;  %v871_v5 = vsel %vm7683_vm3, 0, %v870_v3 }
  0xb1   : > { %911 = vst [vmem:[#allocation2 + $0x3c] sm:$0x1] %v910_v45  ;;  %v913_v49 = vsel %vm7692_vm6, 0, %v912_v48  ;;  %872 = vst [vmem:[#allocation2 + $0x80] sm:$0x8] %v871_v5  ;;  %v7095_v59 = vld [vmem:[#allocation9 + $0x160] sm:$0xff]  }
  0xb2   : > { %6450 = vmatpush3.bf16.msra.mxu0 %v7063_v13  ;;  %914 = vst [vmem:[#allocation2 + $0x4c] sm:$0x1] %v913_v49  ;;  %v924_v6 = vld [vmem:[#allocation2 + $0x8c] sm:$0x1]  ;;  %v1102_v12 = vld [vmem:[#allocation2 + $0x10] sm:$0x8] }
  0xb3   : > { %6336 = vmatpush3.bf16.msra.mxu1 %v7062_v51  ;;  %v861_v51 = vld [vmem:[#allocation2 + $0x50] sm:$0x8]  ;;  %v925_v7 = vsel %vm7692_vm6, 0, %v924_v6  ;;  %v1747_v19 = vld [vmem:[#allocation2 + $0x20] sm:$0x8] }
  0xb4   : > { %6337 = vmatprep.subr.bf16.mxu1 %v7064_v61  ;;  %v862_v52 = vsel %vm7683_vm3, 0, %v861_v51  ;;  %v867_v61 = vld [vmem:[#allocation2 + $0x70] sm:$0x8]  ;;  %926 = vst [vmem:[#allocation2 + $0x8c] sm:$0x1] %v925_v7 }
  0xb5   : > { %5806 = vmatmul.mubr.msk.bf16.gmra.mrb[16].mxu0 %vm466_vm0, %v7022_v20  ;;  %v1522_v20 = vor.u32 %v1521_v16, %v1520_v15  ;;  %863 = vst [vmem:[#allocation2 + $0x50] sm:$0x8] %v862_v52  ;;  %v868_v62 = vsel %vm7683_vm3, 0, %v867_v61  ;;  %v1744_v13 = vld [vmem:[#allocation2 + $0x10] sm:$0x8] }
  0xb6   : > { %597 = vmatprep.mubr.bf16.mxu0 %v7379_v0  ;;  %869 = vst [vmem:[#allocation2 + $0x70] sm:$0x8] %v868_v62  ;;  %v1105_v16 = vld [vmem:[#allocation2 + $0x20] sm:$0x8]  ;;  %v1793_v18 = vshrl.u32 %v1744_v13, 16 }
  0xb7   : > { %6338 = vmatpush3.bf16.msra.mxu1 %v7065_v63  ;;  %v1523_v26 = vrot.slane %v1522_v20, 4  ;;  %v7085_v63 = vld [vmem:[#allocation9 + $0x110] sm:$0xff]   ;;  %v1502_v20 = vld [vmem:[#allocation2 + $0x1c] sm:$0x1]  ;;  %v1194_v22 = vshrl.u32 %v1105_v16, 16 }
  0xb8   : > { %6547 = vmatprep.subr.bf16.mxu1 %v7071_v39  ;;  %v1503_v24 = vld [vmem:[#allocation2 + $0x2c] sm:$0x1]  ;;  %v1504_v37 = vld [vmem:[#allocation2 + $0x3c] sm:$0x1]  ;;  %v7789_v55 = vld [vmem:[%s10355_s2] ss:$0 sm:$0xff] }
  0xb9   : > { %v1525_v28 = vsel %vm7721_vm11, %v1523_v26, %v1524_v17  ;;  %v1172_v17 = vshrl.u32 %v1102_v12, 16  ;;  %v930_v45 = vld [vmem:[#allocation2 + $0xac] sm:$0x1]  ;;  %v1572_v48 = vshll.u32 %v1504_v37, 16  ;;  %v1117_v57 = vld [vmem:[#allocation2 + $0x60] sm:$0x8] }
  0xba   : > { %4313 = vmatmul.mubr.bf16.vlgmr.msra.gmra.mrb[0].mxu1 %v5899_v14  ;;  %v927_v14 = vld [vmem:[#allocation2 + $0x9c] sm:$0x1]  ;;  %v931_v49 = vsel %vm7692_vm6, 0, %v930_v45  ;;  %v1507_v61 = vld [vmem:[#allocation2 + $0x6c] sm:$0x1]  ;;  %v1282_v12 = vshrl.u32 %v1117_v57, 16 }
  0xbb   : > { %6548 = vmatpush3.bf16.msra.mxu1 %v7073_v42  ;;  %v928_v15 = vsel %vm7692_vm6, 0, %v927_v14  ;;  %932 = vst [vmem:[#allocation2 + $0xac] sm:$0x1] %v931_v49  ;;  %v1506_v58 = vld [vmem:[#allocation2 + $0x5c] sm:$0x1] }
  0xbc   : > { %6549 = vmatprep.subr.bf16.mxu1 %v7077_v50  ;;  %929 = vst [vmem:[#allocation2 + $0x9c] sm:$0x1] %v928_v15  ;;  %v1114_v43 = vld [vmem:[#allocation2 + $0x50] sm:$0x8]  ;;  %v1600_v14 = vshll.u32 %v1506_v58, 16 }
  0xbd   : > { %5807 = vmatmul.mubr.msk.bf16.gmra.mrb[20].mxu0 %vm466_vm0, %v7023_v29  ;;  %v1501_v29 = vld [vmem:[#allocation2 + $0xc] sm:$0x1]  ;;  %v1260_v56 = vshrl.u32 %v1114_v43, 16  ;;  %v879_v62 = vld [vmem:[#allocation2 + $0xb0] sm:$0x8] }
  0xbe   : > { %607 = vmatprep.mubr.bf16.mxu0 %v7379_v0  ;;  %v1120_v1 = vld [vmem:[#allocation2 + $0x70] sm:$0x8]  ;;  %v880_v3 = vsel %vm7683_vm3, 0, %v879_v62  ;;  %v1509_v37 = vld [vmem:[#allocation2 + $0x8c] sm:$0x1] }
  0xbf   : > { %6550 = vmatpush3.bf16.msra.mxu1 %v7079_v53  ;;  %v1756_v53 = vld [vmem:[#allocation2 + $0x50] sm:$0x8]  ;;  %881 = vst [vmem:[#allocation2 + $0xb0] sm:$0x8] %v880_v3  ;;  %v1642_v58 = vshll.u32 %v1509_v37, 16 }
  0xc0   : > { %6551 = vmatprep.subr.bf16.mxu1 %v7083_v60  ;;  %v1759_v60 = vld [vmem:[#allocation2 + $0x60] sm:$0x8]  ;;  %v1762_v2 = vld [vmem:[#allocation2 + $0x70] sm:$0x8] }
  0xc1   : > { %v1903_v13 = vshrl.u32 %v1759_v60, 16 }
  0xc3   : > { %6552 = vmatpush3.bf16.msra.mxu1 %v7085_v63  ;;  %v7791_v63 = vrot.slane %v1572_v48, 5 }
  0xc4   : > { %6553 = vmatprep.subr.bf16.mxu1 %v7089_v8  ;;  %v1881_v8 = vshrl.u32 %v1756_v53, 16 }
  0xc5   : > { %5808 = vmatmul.mubr.msk.bf16.gmra.mrb[24].mxu0 %vm466_vm0, %v7024_v30  ;;  %v1528_v30 = vrot.slane %v1527_v21, 4  ;;  %v876_v21 = vld [vmem:[#allocation2 + $0xa0] sm:$0x8] }
  0xc6   : > { %617 = vmatprep.mubr.bf16.mxu0 %v7379_v0  ;;  %v877_v26 = vsel %vm7683_vm3, 0, %v876_v21  ;;  %v1123_v21 = vld [vmem:[#allocation2 + $0x80] sm:$0x8] }
  0xc7   : > { %6554 = vmatpush3.bf16.msra.mxu1 %v7091_v11  ;;  %878 = vst [vmem:[#allocation2 + $0xa0] sm:$0x8] %v877_v26  ;;  %v7803_v11 = vrot.slane %v1260_v56, 11 }
  0xc8   : > { %6555 = vmatprep.subr.bf16.mxu1 %v7095_v59  ;;  %v1510_v59 = vld [vmem:[#allocation2 + $0x9c] sm:$0x1] }
  0xcd   : > { %5809 = vmatmul.mubr.msk.bf16.gmra.mrb[28].mxu0 %vm466_vm0, %v7025_v31  ;;  %v1530_v31 = vshll.u32 %v1501_v29, 16  ;;  %v1544_v29 = vshll.u32 %v1502_v20, 16 }
  0xce   : > { %627 = vmatprep.mubr.bf16.mxu0 %v7379_v0  ;;  %v1129_v62 = vld [vmem:[#allocation2 + $0xa0] sm:$0x8] }
  0xcf   : > { %v7776_v42 = vrot.slane %v1544_v29, 5  ;;  %v933_v29 = vld [vmem:[#allocation2 + $0xbc] sm:$0x1] }
  0xd5   : > { %5810 = vmatmul.mubr.msk.bf16.gmra.mrb[32].mxu0 %vm466_vm0, %v7026_v32  ;;  %v1532_v32 = vrot.slane %v1530_v31, 5  ;;  %v1558_v31 = vshll.u32 %v1503_v24, 16 }
  0xd6   : > { %637 = vmatprep.mubr.bf16.mxu0 %v7379_v0 }
  0xdd   : > { %5811 = vmatmul.mubr.msk.bf16.gmra.mrb[36].mxu0 %vm466_vm0, %v7027_v33  ;;  %v1533_v33 = vsel %vm7721_vm11, %v1528_v30, %v1532_v32  ;;  %v7768_v32 = vrot.slane %v1172_v17, 11  ;;  %v1304_v17 = vshrl.u32 %v1120_v1, 16  ;;  %v882_v1 = vld [vmem:[#allocation2 + $0xc0] sm:$0x8] }
  0xde   : > { %647 = vmatprep.mubr.bf16.mxu0 %v7379_v0 }
  0xdf   : > { %v7819_v43 = vrot.slane %v1304_v17, 11  ;;  %v1656_v17 = vshll.u32 %v1510_v59, 16 }
  0xe5   : > { %5812 = vmatmul.mubr.msk.bf16.gmra.mrb[40].mxu0 %vm466_vm0, %v7028_v34  ;;  %v7732_v34 = vcombine.low %v1525_v28, %v1533_v33  ;;  %v1815_v28 = vshrl.u32 %v1747_v19, 16  ;;  %v7770_v33 = vrot.slane %v1793_v18, 11  ;;  %v1925_v18 = vshrl.u32 %v1762_v2, 16 }
  0xe6   : > { %657 = vmatprep.mubr.bf16.mxu0 %v7379_v0  ;;  %v1614_v19 = vshll.u32 %v1507_v61, 16 }
  0xe7   : > { %v7823_v49 = vrot.slane %v1925_v18, 11  ;;  %v1132_v18 = vld [vmem:[#allocation2 + $0xb0] sm:$0x8] }
  0xe8   : > { %v7821_v45 = vrot.slane %v1614_v19, 5 }
  0xed   : > { %5813 = vmatmul.mubr.msk.bf16.gmra.mrb[44].mxu0 %vm466_vm0, %v7029_v36  ;;  %v7068_v36 = vld [vmem:[#allocation9 + $0x1c0] sm:$0xff]  }
  0xee   : > { %667 = vmatprep.mubr.bf16.mxu0 %v7379_v0  ;;  %6659 = vmatprep.subr.bf16.mxu0 %v7068_v36 }
  0xf5   : > { %5814 = vmatmul.mubr.msk.bf16.gmra.mrb[48].mxu0 %vm466_vm0, %v7030_v46  ;;  %v858_v46 = vld [vmem:[#allocation2 + $0x40] sm:$0x8] }
  0xf6   : > { %677 = vmatprep.mubr.bf16.mxu0 %v7379_v0  ;;  %v859_v47 = vsel %vm7683_vm3, 0, %v858_v46 }
  0xf7   : > { %860 = vst [vmem:[#allocation2 + $0x40] sm:$0x8] %v859_v47  ;;  %v7780_v47 = vrot.slane %v1558_v31, 5  ;;  %v7813_v31 = vrot.slane %v1903_v13, 11 }
  0xfd   : > { %5815 = vmatmul.mubr.msk.bf16.gmra.mrb[52].mxu0 %vm466_vm0, %v7031_v9  ;;  %v873_v9 = vld [vmem:[#allocation2 + $0x90] sm:$0x8] }
  0xfe   : > { %687 = vmatprep.mubr.bf16.mxu0 %v7379_v0  ;;  %v874_v10 = vsel %vm7683_vm3, 0, %v873_v9  ;;  %v1111_v38 = vld [vmem:[#allocation2 + $0x40] sm:$0x8] }
  0xff   : > { %875 = vst [vmem:[#allocation2 + $0x90] sm:$0x8] %v874_v10  ;;  %v1753_v39 = vld [vmem:[#allocation2 + $0x40] sm:$0x8]  ;;  %v1238_v51 = vshrl.u32 %v1111_v38, 16  ;;  %v934_v38 = vsel %vm7692_vm6, 0, %v933_v29 }
 0x100   : > { %v1859_v52 = vshrl.u32 %v1753_v39, 16  ;;  %935 = vst [vmem:[#allocation2 + $0xbc] sm:$0x1] %v934_v38 }
 0x101   : > { %v7797_v6 = vrot.slane %v1238_v51, 11  ;;  %v1326_v51 = vshrl.u32 %v1123_v21, 16 }
 0x102   : > { %v7799_v7 = vrot.slane %v1859_v52, 11 }
 0x103   : > { %v7835_v21 = vrot.slane %v1326_v51, 11  ;;  %v7847_v51 = vrot.slane %v1656_v17, 5 }
 0x105   : > { %5816 = vmatmul.mubr.msk.bf16.gmra.mrb[56].mxu0 %vm466_vm0, %v7034_v27 }
 0x106   : > { %697 = vmatprep.mubr.bf16.mxu0 %v7379_v0  ;;  %v856_v0 = vsel %vm7683_vm3, 0, %v855_v41  ;;  %v1505_v41 = vld [vmem:[#allocation2 + $0x4c] sm:$0x1]  ;;  %v1126_v48 = vld [vmem:[#allocation2 + $0x90] sm:$0x8] }
 0x107   : > { %857 = vst [vmem:[#allocation2 + $0x30] sm:$0x8] %v856_v0  ;;  %v7774_v0 = vrot.slane %v1815_v28, 11  ;;  %v1586_v54 = vshll.u32 %v1505_v41, 16  ;;  %v1765_v28 = vld [vmem:[#allocation2 + $0x80] sm:$0x8] }
 0x108   : > { %v1947_v52 = vshrl.u32 %v1765_v28, 16  ;;  %v1768_v57 = vld [vmem:[#allocation2 + $0x90] sm:$0x8]  ;;  %v1348_v61 = vshrl.u32 %v1126_v48, 16 }
 0x109   : > { %v7801_v9 = vrot.slane %v1586_v54, 5 }
 0x10a   : > { %v7841_v38 = vrot.slane %v1348_v61, 11 }
 0x10d   : > { %5817 = vmatmul.mubr.msk.bf16.gmra.mrb[60].mxu0 %vm466_vm0, %v7035_v35  ;;  %v7772_v35 = vrot.slane %v1194_v22, 11  ;;  %v1508_v22 = vld [vmem:[#allocation2 + $0x7c] sm:$0x1] }
 0x10e   : > { %v1108_v23 = vld [vmem:[#allocation2 + $0x30] sm:$0x8]  ;;  %v1628_v53 = vshll.u32 %v1508_v22, 16  ;;  %v1370_v22 = vshrl.u32 %v1129_v62, 16 }
 0x10f   : > { %v1750_v27 = vld [vmem:[#allocation2 + $0x30] sm:$0x8]  ;;  %v1216_v30 = vshrl.u32 %v1108_v23, 16 }
 0x110   : > { %v1837_v36 = vshrl.u32 %v1750_v27, 16  ;;  %v7097_v23 = vld [vmem:[#allocation9 + $0x120] sm:$0xff]   ;;  %v7809_v27 = vrot.slane %v1881_v8, 11  ;;  %v1771_v8 = vld [vmem:[#allocation2 + $0xa0] sm:$0x8] }
 0x111   : > { %v7778_v46 = vrot.slane %v1216_v30, 11  ;;  %v7811_v30 = vrot.slane %v1282_v12, 11  ;;  %6556 = vmatpush3.bf16.msra.mxu1 %v7097_v23  ;;  %v883_v12 = vsel %vm7683_vm3, 0, %v882_v1  ;;  %v7837_v23 = vrot.slane %v1947_v52, 11 }
 0x112   : > { %v7784_v50 = vrot.slane %v1837_v36, 11  ;;  %v7815_v36 = vrot.slane %v1600_v14, 5  ;;  %v7832_v14 = vrot.slane %v1628_v53, 5  ;;  %884 = vst [vmem:[#allocation2 + $0xc0] sm:$0x8] %v883_v12 }
 0x168   : > { %v7795_v5 = vpop.f32.mrb[0].mxu0 }
 0x169   : > { %10525 = vst [vmem:[#allocation20_spill] sm:$0xff] %v7795_v5  ;;  %v551_v10 = vpop.f32.mrb[1].mxu0 }
 0x16a   : > { %v747_v15 = vadd.f32 %v7789_v55, %v551_v10  ;;  %v7806_v16 = vpop.f32.mrb[2].mxu0  ;;  %v1511_v10 = vld [vmem:[#allocation2 + $0xac] sm:$0x1] }
 0x16b   : > { %10526 = vst [vmem:[#allocation21_spill] sm:$0xff] %v7806_v16  ;;  %v555_v20 = vpop.f32.mrb[3].mxu0  ;;  %v1670_v28 = vshll.u32 %v1511_v10, 16 }
 0x16c   : > { %v779_v24 = vmax.f32 %v747_v15, 0.0  ;;  %v748_v26 = vadd.f32 %v7789_v55, %v555_v20  ;;  %v1969_v15 = vshrl.u32 %v1768_v57, 16 }
 0x16e   : > { %v6163_v39 = vpack.c.bf16 %v779_v24, %v779_v24  ;;  %v780_v41 = vmax.f32 %v748_v26, 0.0  ;;  %v7839_v24 = vrot.slane %v1642_v58, 5  ;;  %v1991_v26 = vshrl.u32 %v1771_v8, 16 }
 0x16f   : > { %v7858_v8 = vrot.slane %v1670_v28, 5 }
 0x170   : > { %1067 = vst [vmem:[#allocation2 + $0x14] sm:$0xf] %v6163_v39  ;;  %v6164_v54 = vpack.c.bf16 %v780_v41, %v780_v41  ;;  %v7825_v56 = vpop.f32.mrb[4].mxu0  ;;  %v1392_v39 = vshrl.u32 %v1132_v18, 16  ;;  %v1774_v41 = vld [vmem:[#allocation2 + $0xb0] sm:$0x8] }
 0x171   : > { %10527 = vst [vmem:[#allocation22_spill] sm:$0xff] %v7825_v56  ;;  %v561_v60 = vpop.f32.mrb[5].mxu0  ;;  %v7856_v1 = vrot.slane %v1991_v26, 11  ;;  %10531 = vst [vmem:[#allocation26_spill] sm:$0xff] %v7858_v8  ;;  %v7086_v8 = vld [vmem:[#allocation9 + $0x1d8] sm:$0xff]  }
 0x172   : > { %1068 = vst [vmem:[#allocation2 + $0x18] sm:$0xf] %v6164_v54  ;;  %v749_v2 = vadd.f32 %v7789_v55, %v561_v60  ;;  %v7828_v3 = vpop.f32.mrb[6].mxu0  ;;  %v7845_v54 = vrot.slane %v1969_v15, 11  ;;  %v7852_v60 = vrot.slane %v1370_v22, 11  ;;  %v7864_v17 = vrot.slane %v1392_v39, 11 }
 0x173   : > { %10528 = vst [vmem:[#allocation23_spill] sm:$0xff] %v7828_v3  ;;  %v565_v13 = vpop.f32.mrb[7].mxu0 }
 0x174   : > { %v781_v19 = vmax.f32 %v749_v2, 0.0  ;;  %v750_v20 = vadd.f32 %v7789_v55, %v565_v13  ;;  %v2013_v2 = vshrl.u32 %v1774_v41, 16 }
 0x176   : > { %v6165_v29 = vpack.c.bf16 %v781_v19, %v781_v19  ;;  %v782_v37 = vmax.f32 %v750_v20, 0.0 }
 0x177   : > { %v1103_v48 = vld [vmem:[#allocation2 + $0x14] sm:$0xf] }
 0x178   : > { %v7843_v53 = vld [vmem:[#allocation2 + $0x14] sm:$0xf]  ;;  %1069 = vst [vmem:[#allocation2 + $0x24] sm:$0xf] %v6165_v29  ;;  %v6166_v52 = vpack.c.bf16 %v782_v37, %v782_v37  ;;  %v7849_v57 = vpop.f32.mrb[8].mxu0  ;;  %v1177_v58 = vshrl.u32 %v1103_v48, 16 }
 0x179   : > { %10529 = vst [vmem:[#allocation24_spill] sm:$0xff] %v7843_v53  ;;  %10530 = vst [vmem:[#allocation25_spill] sm:$0xff] %v7849_v57  ;;  %v10365_v59 = vshrl.u32 %v7843_v53, 16  ;;  %v571_v61 = vpop.f32.mrb[9].mxu0  ;;  %v7854_v62 = vld [vmem:[#allocation2 + $0x18] sm:$0xf] }
 0x17a   : > { %1070 = vst [vmem:[#allocation2 + $0x28] sm:$0xf] %v6166_v52  ;;  %v751_v10 = vadd.f32 %v7789_v55, %v571_v61  ;;  %v7861_v12 = vpop.f32.mrb[10].mxu0  ;;  %v1179_v13 = vrot.slane %v1177_v58, 7  ;;  %v1186_v15 = vshrl.u32 %v7854_v62, 16  ;;  %v1180_v19 = vshll.u32 %v1103_v48, 16 }
 0x17b   : > { %10532 = vst [vmem:[#allocation27_spill] sm:$0xff] %v7861_v12  ;;  %v575_v18 = vpop.f32.mrb[11].mxu0  ;;  %v5916_v20 = vcombine.low %v1103_v48, %v7854_v62  ;;  %v7867_v22 = vld [vmem:[#allocation2 + $0x18] sm:$0xf]  ;;  %v1800_v26 = vrot.slane %v10365_v59, 7  ;;  %v10366_v28 = vshll.u32 %v7843_v53, 16 }
 0x17c   : > { %10533 = vst [vmem:[#allocation28_spill] sm:$0xff] %v7867_v22  ;;  %v783_v29 = vmax.f32 %v751_v10, 0.0  ;;  %v752_v37 = vadd.f32 %v7789_v55, %v575_v18  ;;  %v1188_v41 = vrot.slane %v1186_v15, 7  ;;  %v10367_v52 = vshll.u32 %v7854_v62, 16  ;;  %v7101_v61 = vld [vmem:[#allocation9 + $0x168] sm:$0xff]  }
 0x17d   : > { %4320 = vmatprep.mubr.bf16.mxu1 %v5916_v20  ;;  %v1182_v39 = vor.u32 %v1180_v19, %v1179_v13  ;;  %v1184_v12 = vrot.slane %v1179_v13, 4  ;;  %v1803_v48 = vor.u32 %v10366_v28, %v1800_v26  ;;  %v7876_v57 = vrot.slane %v2013_v2, 11  ;;  %6557 = vmatprep.subr.bf16.mxu1 %v7101_v61 }
 0x17e   : > { %v6167_v16 = vpack.c.bf16 %v783_v29, %v783_v29  ;;  %v784_v3 = vmax.f32 %v752_v37, 0.0  ;;  %v1191_v59 = vor.u32 %v10367_v52, %v1188_v41  ;;  %v10368_v10 = vshrl.u32 %v7867_v22, 16 }
 0x17f   : > { %10534 = vst [vmem:[#allocation29_spill] sm:$0xff] %v7876_v57  ;;  %v7881_v18 = vrot.slane %v1177_v58, 4  ;;  %v7883_v5 = vrot.slane %v1180_v19, 5  ;;  %v1183_v13 = vsel %vm7704_vm8, %v7768_v32, %v1182_v39  ;;  %v1106_v2 = vld [vmem:[#allocation2 + $0x24] sm:$0xf]  ;;  %v7895_v19 = vrot.slane %v1186_v15, 4 }
 0x180   : > { %1071 = vst [vmem:[#allocation2 + $0x34] sm:$0xf] %v6167_v16  ;;  %v6168_v29 = vpack.c.bf16 %v784_v3, %v784_v3  ;;  %v7889_v37 = vpop.f32.mrb[12].mxu0  ;;  %v1192_v41 = vsel %vm7704_vm8, %v1184_v12, %v1191_v59  ;;  %v1809_v58 = vrot.slane %v10368_v10, 7  ;;  %v1199_v61 = vshrl.u32 %v1106_v2, 16 }
 0x181   : > { %10535 = vst [vmem:[#allocation30_spill] sm:$0xff] %v7889_v37  ;;  %v581_v28 = vpop.f32.mrb[13].mxu0  ;;  %v5900_v52 = vcombine.low %v1183_v13, %v1192_v41  ;;  %v1804_v32 = vsel %vm7704_vm8, %v7770_v33, %v1803_v48  ;;  %v1805_v39 = vrot.slane %v1800_v26, 4  ;;  %v7900_v16 = vld [vmem:[#allocation2 + $0x28] sm:$0xf]  ;;  %v10537_v59 = vshll.u32 %v7867_v22, 16 }
 0x182   : > { %1072 = vst [vmem:[#allocation2 + $0x38] sm:$0xf] %v6168_v29  ;;  %v753_v3 = vadd.f32 %v7789_v55, %v581_v28  ;;  %v7903_v20 = vpop.f32.mrb[14].mxu0  ;;  %v1201_v10 = vrot.slane %v1199_v61, 7  ;;  %v1208_v15 = vshrl.u32 %v7900_v16, 16  ;;  %v7103_v37 = vld [vmem:[#allocation9 + $0x128] sm:$0xff]   ;;  %v5917_v26 = vcombine.low %v1106_v2, %v7900_v16 }
 0x183   : > { %10536 = vst [vmem:[#allocation31_spill] sm:$0xff] %v7903_v20  ;;  %v1812_v12 = vor.u32 %v10537_v59, %v1809_v58  ;;  %v585_v13 = vpop.f32.mrb[15].mxu0  ;;  %4321 = vmatmul.mubr.bf16.gmra.mrb[4].mxu1 %v5900_v52  ;;  %v1202_v41 = vshll.u32 %v1106_v2, 16  ;;  %v7910_v48 = vld [vmem:[#allocation2 + $0x24] sm:$0xf]  ;;  %v1536_v28 = vor.u32 %v7883_v5, %v7881_v18  ;;  %v7919_v22 = vrot.slane %v1199_v61, 4 }
 0x184   : > { %10538 = vst [vmem:[#allocation32_spill] sm:$0xff] %v7910_v48  ;;  %v785_v29 = vmax.f32 %v753_v3, 0.0  ;;  %v754_v20 = vadd.f32 %v7789_v55, %v585_v13  ;;  %v1210_v59 = vrot.slane %v1208_v15, 7  ;;  %v7917_v56 = vld [vmem:[#allocation2 + $0x28] sm:$0xf]  ;;  %6558 = vmatpush3.bf16.msra.mxu1 %v7103_v37  ;;  %4328 = vmatprep.mubr.bf16.mxu1 %v5917_v26  ;;  %v7070_v2 = vld [vmem:[#allocation9 + $0x180] sm:$0xff]  }
 0x185   : > { %v1813_v58 = vsel %vm7704_vm8, %v1805_v39, %v1812_v12  ;;  %10539 = vst [vmem:[#allocation33_spill] sm:$0xff] %v7917_v56  ;;  %v1204_v33 = vor.u32 %v1202_v41, %v1201_v10  ;;  %v1206_v53 = vrot.slane %v1201_v10, 4  ;;  %v10540_v5 = vshll.u32 %v7900_v16, 16  ;;  %v7074_v13 = vld [vmem:[#allocation9 + $0x1c8] sm:$0xff]  }
 0x186   : > { %v5947_v52 = vcombine.low %v1804_v32, %v1813_v58  ;;  %v6169_v44 = vpack.c.bf16 %v785_v29, %v785_v29  ;;  %v786_v40 = vmax.f32 %v754_v20, 0.0  ;;  %v10378_v3 = vshrl.u32 %v7910_v48, 16  ;;  %v7076_v58 = vld [vmem:[#allocation9 + $0x188] sm:$0xff]  }
 0x187   : > { %v1213_v18 = vor.u32 %v10540_v5, %v1210_v59  ;;  %v7924_v39 = vrot.slane %v1202_v41, 5  ;;  %v1205_v37 = vsel %vm7704_vm8, %v7772_v35, %v1204_v33  ;;  %v10379_v61 = vshll.u32 %v7910_v48, 16  ;;  %v1109_v10 = vld [vmem:[#allocation2 + $0x34] sm:$0xf] }
 0x188   : > { %4473 = vmatprep.mubr.bf16.mxu0 %v5947_v52  ;;  %v10377_v32 = vshrl.u32 %v7917_v56, 16  ;;  %1073 = vst [vmem:[#allocation2 + $0x44] sm:$0xf] %v6169_v44  ;;  %v6170_v20 = vpack.c.bf16 %v786_v40, %v786_v40  ;;  %v7932_v12 = vpop.f32.mrb[16].mxu0  ;;  %v1822_v41 = vrot.slane %v10378_v3, 7  ;;  %v1221_v29 = vshrl.u32 %v1109_v10, 16 }
 0x189   : > { %4474 = vmatmul.mubr.bf16.vlgmr.msra.gmra.mrb[64].mxu0 %v7732_v34  ;;  %10541 = vst [vmem:[#allocation34_spill] sm:$0xff] %v7932_v12  ;;  %v1214_v26 = vsel %vm7704_vm8, %v1206_v53, %v1213_v18  ;;  %v7938_v35 = vrot.slane %v1208_v15, 4  ;;  %v591_v33 = vpop.f32.mrb[17].mxu0  ;;  %v10380_v44 = vshll.u32 %v7917_v56, 16  ;;  %v7943_v34 = vld [vmem:[#allocation2 + $0x38] sm:$0xf] }
 0x18a   : > { %6660 = vmatpush3.bf16.msra.mxu0 %v7070_v2  ;;  %v5901_v59 = vcombine.low %v1205_v37, %v1214_v26  ;;  %v1831_v40 = vrot.slane %v10377_v32, 7  ;;  %1074 = vst [vmem:[#allocation2 + $0x48] sm:$0xf] %v6170_v20  ;;  %v755_v53 = vadd.f32 %v7789_v55, %v591_v33  ;;  %v7946_v52 = vpop.f32.mrb[18].mxu0  ;;  %v1825_v5 = vor.u32 %v10379_v61, %v1822_v41  ;;  %v7080_v2 = vld [vmem:[#allocation9 + $0x1d0] sm:$0xff]  }
 0x18b   : > { %10542 = vst [vmem:[#allocation35_spill] sm:$0xff] %v7946_v52  ;;  %v1224_v15 = vshll.u32 %v1109_v10, 16  ;;  %v7950_v18 = vrot.slane %v1536_v28, 4  ;;  %6661 = vmatprep.subr.bf16.mxu0 %v7074_v13  ;;  %v595_v37 = vpop.f32.mrb[19].mxu0  ;;  %v1827_v26 = vrot.slane %v1822_v41, 4  ;;  %v1223_v3 = vrot.slane %v1221_v29, 7 }
 0x18c   : > { %4329 = vmatmul.mubr.bf16.gmra.mrb[8].mxu1 %v5901_v59  ;;  %v1834_v32 = vor.u32 %v10380_v44, %v1831_v40  ;;  %v1230_v20 = vshrl.u32 %v7943_v34, 16  ;;  %v787_v33 = vmax.f32 %v755_v53, 0.0  ;;  %v756_v52 = vadd.f32 %v7789_v55, %v595_v37  ;;  %v7959_v28 = vld [vmem:[#allocation2 + $0x34] sm:$0xf]  ;;  %v7082_v53 = vld [vmem:[#allocation9 + $0x190] sm:$0xff]  }
 0x18d   : > { %v7957_v61 = vrot.slane %v1221_v29, 4  ;;  %10543 = vst [vmem:[#allocation36_spill] sm:$0xff] %v7959_v28  ;;  %v1826_v13 = vsel %vm7704_vm8, %v7774_v0, %v1825_v5  ;;  %v5918_v40 = vcombine.low %v1109_v10, %v7943_v34  ;;  %v10544_v29 = vshll.u32 %v7854_v62, 16  ;;  %v7969_v48 = vld [vmem:[#allocation2 + $0x38] sm:$0xf] }
 0x18e   : > { %v1835_v41 = vsel %vm7704_vm8, %v1827_v26, %v1834_v32  ;;  %v1232_v59 = vrot.slane %v1230_v20, 7  ;;  %6662 = vmatpush3.bf16.msra.mxu0 %v7076_v58  ;;  %v6171_v44 = vpack.c.bf16 %v787_v33, %v787_v33  ;;  %v788_v37 = vmax.f32 %v756_v52, 0.0 }
 0x18f   : > { %v5948_v56 = vcombine.low %v1826_v13, %v1835_v41  ;;  %v1538_v12 = vrot.slane %v10544_v29, 5  ;;  %6663 = vmatprep.subr.bf16.mxu0 %v7080_v2  ;;  %4336 = vmatprep.mubr.bf16.mxu1 %v5918_v40  ;;  %v1226_v0 = vor.u32 %v1224_v15, %v1223_v3  ;;  %v1228_v5 = vrot.slane %v1223_v3, 4  ;;  %v7980_v13 = vld [vmem:[#allocation2 + $0x44] sm:$0xf] }
 0x190   : > { %v10545_v32 = vshll.u32 %v7943_v34, 16  ;;  %v10387_v10 = vshrl.u32 %v7959_v28, 16  ;;  %1075 = vst [vmem:[#allocation2 + $0x54] sm:$0xf] %v6171_v44  ;;  %v6172_v58 = vpack.c.bf16 %v788_v37, %v788_v37  ;;  %v7974_v52 = vrot.slane %v1224_v15, 5  ;;  %v7977_v33 = vpop.f32.mrb[20].mxu0 }
 0x191   : > { %4481 = vmatprep.mubr.bf16.mxu0 %v5948_v56  ;;  %v1541_v62 = vor.u32 %v7895_v19, %v1538_v12  ;;  %10546 = vst [vmem:[#allocation37_spill] sm:$0xff] %v7977_v33  ;;  %v10386_v2 = vshll.u32 %v7959_v28, 16  ;;  %v601_v41 = vpop.f32.mrb[21].mxu0  ;;  %v1227_v3 = vsel %vm7704_vm8, %v7778_v46, %v1226_v0  ;;  %v10385_v15 = vshrl.u32 %v7969_v48, 16  ;;  %v7088_v19 = vld [vmem:[#allocation9 + $0x198] sm:$0xff]   ;;  %v7092_v46 = vld [vmem:[#allocation9 + $0x1e0] sm:$0xff]  }
 0x192   : > { %v1235_v26 = vor.u32 %v10545_v32, %v1232_v59  ;;  %v1844_v56 = vrot.slane %v10387_v10, 7  ;;  %6664 = vmatpush3.bf16.msra.mxu0 %v7082_v53  ;;  %1076 = vst [vmem:[#allocation2 + $0x58] sm:$0xf] %v6172_v58  ;;  %v7990_v59 = vrot.slane %v1230_v20, 4  ;;  %v757_v37 = vadd.f32 %v7789_v55, %v601_v41  ;;  %v7993_v29 = vpop.f32.mrb[22].mxu0  ;;  %v7094_v33 = vld [vmem:[#allocation9 + $0x1a0] sm:$0xff]  }
 0x193   : > { %v1542_v40 = vrot.slane %v1541_v62, 4  ;;  %10547 = vst [vmem:[#allocation38_spill] sm:$0xff] %v7993_v29  ;;  %6665 = vmatprep.subr.bf16.mxu0 %v7086_v8  ;;  %v605_v0 = vpop.f32.mrb[23].mxu0  ;;  %v10390_v53 = vshll.u32 %v7969_v48, 16  ;;  %v8000_v58 = vld [vmem:[#allocation2 + $0x48] sm:$0xf]  ;;  %v1539_v62 = vsel %vm7721_vm11, %v7950_v18, %v1538_v12 }
 0x194   : > { %v1236_v44 = vsel %vm7704_vm8, %v1228_v5, %v1235_v26  ;;  %v1847_v5 = vor.u32 %v10386_v2, %v1844_v56  ;;  %v1853_v26 = vrot.slane %v10385_v15, 7  ;;  %v1243_v20 = vshrl.u32 %v7980_v13, 16 }
 0x195   : > { %v5902_v32 = vcombine.low %v1227_v3, %v1236_v44  ;;  %v1547_v8 = vsel %vm7721_vm11, %v1542_v40, %v7776_v42  ;;  %v789_v41 = vmax.f32 %v757_v37, 0.0  ;;  %v758_v3 = vadd.f32 %v7789_v55, %v605_v0  ;;  %v7107_v44 = vld [vmem:[#allocation9 + $0x170] sm:$0xff]   ;;  %v7098_v42 = vld [vmem:[#allocation9 + $0x1e8] sm:$0xff]  }
 0x196   : > { %v5932_v15 = vcombine.low %v1539_v62, %v1547_v8  ;;  %v1849_v2 = vrot.slane %v1844_v56, 4  ;;  %v1856_v10 = vor.u32 %v10390_v53, %v1853_v26  ;;  %v1245_v29 = vrot.slane %v1243_v20, 7  ;;  %6666 = vmatpush3.bf16.msra.mxu0 %v7088_v19  ;;  %6559 = vmatprep.subr.bf16.mxu1 %v7107_v44  ;;  %v8028_v8 = vld [vmem:[#allocation2 + $0x48] sm:$0xf] }
 0x197   : > { %4337 = vmatmul.mubr.bf16.gmra.mrb[12].mxu1 %v5902_v32  ;;  %v6173_v28 = vpack.c.bf16 %v789_v41, %v789_v41  ;;  %v790_v57 = vmax.f32 %v758_v3, 0.0  ;;  %v1246_v12 = vshll.u32 %v7980_v13, 16  ;;  %v1252_v18 = vshrl.u32 %v8000_v58, 16  ;;  %6667 = vmatprep.subr.bf16.mxu0 %v7092_v46  ;;  %v8022_v32 = vld [vmem:[#allocation2 + $0x44] sm:$0xf] }
 0x198   : > { %4482 = vmatmul.mubr.bf16.gmra.mrb[68].mxu0 %v5932_v15  ;;  %v1848_v56 = vsel %vm7704_vm8, %v7784_v50, %v1847_v5  ;;  %v1857_v40 = vsel %vm7704_vm8, %v1849_v2, %v1856_v10  ;;  %v1255_v19 = vshll.u32 %v8000_v58, 16  ;;  %v5919_v37 = vcombine.low %v7980_v13, %v8000_v58  ;;  %v8026_v15 = vpop.f32.mrb[24].mxu0  ;;  %v7115_v58 = vld [vmem:[#allocation9 + $0x200] sm:$0xff]  }
 0x199   : > { %1077 = vst [vmem:[#allocation2 + $0x64] sm:$0xf] %v6173_v28  ;;  %v6174_v0 = vpack.c.bf16 %v790_v57, %v790_v57  ;;  %v5949_v46 = vcombine.low %v1848_v56, %v1857_v40  ;;  %v1254_v26 = vrot.slane %v1252_v18, 7  ;;  %v8024_v62 = vrot.slane %v1243_v20, 4  ;;  %10548 = vst [vmem:[#allocation39_spill] sm:$0xff] %v8026_v15  ;;  %v611_v13 = vpop.f32.mrb[25].mxu0 }
 0x19a   : > { %4344 = vmatprep.mubr.bf16.mxu1 %v5919_v37  ;;  %v1550_v50 = vor.u32 %v7924_v39, %v7919_v22  ;;  %v10549_v10 = vshll.u32 %v7900_v16, 16  ;;  %v1248_v5 = vor.u32 %v1246_v12, %v1245_v29  ;;  %v1250_v41 = vrot.slane %v1245_v29, 4  ;;  %6668 = vmatpush3.bf16.msra.mxu0 %v7094_v33  ;;  %v7100_v57 = vld [vmem:[#allocation9 + $0x1a8] sm:$0xff]   ;;  %v8035_v20 = vpop.f32.mrb[26].mxu0  ;;  %v7104_v16 = vld [vmem:[#allocation9 + $0x1f0] sm:$0xff]  }
 0x19b   : > { %1078 = vst [vmem:[#allocation2 + $0x68] sm:$0xf] %v6174_v0  ;;  %4489 = vmatprep.mubr.bf16.mxu0 %v5949_v46  ;;  %v759_v28 = vadd.f32 %v7789_v55, %v611_v13  ;;  %10550 = vst [vmem:[#allocation40_spill] sm:$0xff] %v8035_v20  ;;  %v1257_v3 = vor.u32 %v1255_v19, %v1254_v26  ;;  %v10391_v44 = vshrl.u32 %v8022_v32, 16  ;;  %v10394_v22 = vshll.u32 %v8022_v32, 16  ;;  %v615_v33 = vpop.f32.mrb[27].mxu0 }
 0x19c   : > { %v1552_v2 = vrot.slane %v10549_v10, 5  ;;  %6669 = vmatprep.subr.bf16.mxu0 %v7098_v42  ;;  %v1551_v39 = vrot.slane %v1550_v50, 4  ;;  %v1249_v56 = vsel %vm7704_vm8, %v7797_v6, %v1248_v5  ;;  %v10392_v40 = vshrl.u32 %v8028_v8, 16  ;;  %v1115_v26 = vld [vmem:[#allocation2 + $0x54] sm:$0xf]  ;;  %v7106_v50 = vld [vmem:[#allocation9 + $0x1b0] sm:$0xff]  }
 0x19d   : > { %v791_v37 = vmax.f32 %v759_v28, 0.0  ;;  %v760_v0 = vadd.f32 %v7789_v55, %v615_v33  ;;  %v1258_v46 = vsel %vm7704_vm8, %v1250_v41, %v1257_v3  ;;  %v1866_v42 = vrot.slane %v10391_v44, 7  ;;  %v8055_v5 = vld [vmem:[#allocation2 + $0x58] sm:$0xf]  ;;  %v7109_v28 = vld [vmem:[#allocation9 + $0x130] sm:$0xff]   ;;  %v7110_v44 = vld [vmem:[#allocation9 + $0x1f8] sm:$0xff]  }
 0x19e   : > { %v1555_v29 = vor.u32 %v7938_v35, %v1552_v2  ;;  %v8051_v10 = vrot.slane %v1246_v12, 5  ;;  %v5903_v13 = vcombine.low %v1249_v56, %v1258_v46  ;;  %v1875_v6 = vrot.slane %v10392_v40, 7  ;;  %6670 = vmatpush3.bf16.msra.mxu0 %v7100_v57  ;;  %6560 = vmatpush3.bf16.msra.mxu1 %v7109_v28 }
 0x19f   : > { %v8057_v33 = vrot.slane %v1252_v18, 4  ;;  %v6175_v53 = vpack.c.bf16 %v791_v37, %v791_v37  ;;  %v792_v41 = vmax.f32 %v760_v0, 0.0  ;;  %v1869_v3 = vor.u32 %v10394_v22, %v1866_v42  ;;  %6671 = vmatprep.subr.bf16.mxu0 %v7104_v16 }
 0x1a0   : > { %v1556_v35 = vrot.slane %v1555_v29, 4  ;;  %v1553_v12 = vsel %vm7721_vm11, %v1551_v39, %v1552_v2  ;;  %4345 = vmatmul.mubr.bf16.gmra.mrb[16].mxu1 %v5903_v13  ;;  %v10393_v57 = vshll.u32 %v8028_v8, 16  ;;  %v1265_v56 = vshrl.u32 %v1115_v26, 16  ;;  %v8068_v40 = vpop.f32.mrb[28].mxu0 }
 0x1a1   : > { %1079 = vst [vmem:[#allocation2 + $0x74] sm:$0xf] %v6175_v53  ;;  %v6176_v37 = vpack.c.bf16 %v792_v41, %v792_v41  ;;  %v1871_v0 = vrot.slane %v1866_v42, 4  ;;  %v1274_v46 = vshrl.u32 %v8055_v5, 16  ;;  %10551 = vst [vmem:[#allocation41_spill] sm:$0xff] %v8068_v40  ;;  %v1870_v2 = vsel %vm7704_vm8, %v7799_v7, %v1869_v3 }
 0x1a2   : > { %v1561_v29 = vsel %vm7721_vm11, %v1556_v35, %v7780_v47  ;;  %v1878_v47 = vor.u32 %v10393_v57, %v1875_v6  ;;  %v1267_v16 = vrot.slane %v1265_v56, 7  ;;  %v1268_v39 = vshll.u32 %v1115_v26, 16  ;;  %v621_v35 = vpop.f32.mrb[29].mxu0  ;;  %6672 = vmatpush3.bf16.msra.mxu0 %v7106_v50  ;;  %v8091_v57 = vld [vmem:[#allocation2 + $0x58] sm:$0xf] }
 0x1a3   : > { %v5933_v18 = vcombine.low %v1553_v12, %v1561_v29  ;;  %1080 = vst [vmem:[#allocation2 + $0x78] sm:$0xf] %v6176_v37  ;;  %v1276_v53 = vrot.slane %v1274_v46, 7  ;;  %v10399_v42 = vshll.u32 %v8055_v5, 16  ;;  %v8076_v13 = vrot.slane %v1265_v56, 4  ;;  %v8079_v41 = vpop.f32.mrb[30].mxu0  ;;  %6673 = vmatprep.subr.bf16.mxu0 %v7110_v44 }
 0x1a4   : > { %v5920_v28 = vcombine.low %v1115_v26, %v8055_v5  ;;  %10552 = vst [vmem:[#allocation42_spill] sm:$0xff] %v8079_v41  ;;  %v1879_v7 = vsel %vm7704_vm8, %v1871_v0, %v1878_v47  ;;  %v1564_v6 = vor.u32 %v7974_v52, %v7957_v61  ;;  %v10553_v50 = vshll.u32 %v7943_v34, 16  ;;  %v625_v29 = vpop.f32.mrb[31].mxu0  ;;  %v7111_v52 = vld [vmem:[#allocation9 + $0x1b8] sm:$0xff]  }
 0x1a5   : > { %4490 = vmatmul.mubr.bf16.gmra.mrb[72].mxu0 %v5933_v18  ;;  %v761_v12 = vadd.f32 %v7789_v55, %v621_v35  ;;  %v8088_v18 = vld [vmem:[#allocation2 + $0x54] sm:$0xf]  ;;  %v5950_v56 = vcombine.low %v1870_v2, %v1879_v7  ;;  %v762_v26 = vadd.f32 %v7789_v55, %v625_v29  ;;  %v1270_v37 = vor.u32 %v1268_v39, %v1267_v16  ;;  %v7112_v35 = vld [vmem:[#allocation9 + $0x178] sm:$0xff]   ;;  %v1118_v7 = vld [vmem:[#allocation2 + $0x64] sm:$0xf] }
 0x1a6   : > { %v1566_v3 = vrot.slane %v10553_v50, 5  ;;  %4352 = vmatprep.mubr.bf16.mxu1 %v5920_v28  ;;  %v1272_v44 = vrot.slane %v1267_v16, 4  ;;  %v1565_v0 = vrot.slane %v1564_v6, 4  ;;  %v1279_v34 = vor.u32 %v10399_v42, %v1276_v53  ;;  %v7113_v50 = vld [vmem:[#allocation9 + $0x138] sm:$0xff]   ;;  %6674 = vmatpush3.bf16.msra.mxu0 %v7111_v52 }
 0x1a7   : > { %v793_v61 = vmax.f32 %v761_v12, 0.0  ;;  %4497 = vmatprep.mubr.bf16.mxu0 %v5950_v56  ;;  %v8096_v22 = vrot.slane %v1268_v39, 5  ;;  %v794_v2 = vmax.f32 %v762_v26, 0.0  ;;  %v1271_v16 = vsel %vm7704_vm8, %v7803_v11, %v1270_v37  ;;  %6561 = vmatprep.subr.bf16.mxu1 %v7112_v35  ;;  %v8108_v11 = vld [vmem:[#allocation2 + $0x68] sm:$0xf] }
 0x1a8   : > { %v1569_v47 = vor.u32 %v7990_v59, %v1566_v3  ;;  %v10398_v28 = vshrl.u32 %v8088_v18, 16  ;;  %v1280_v12 = vsel %vm7704_vm8, %v1272_v44, %v1279_v34  ;;  %v10397_v53 = vshll.u32 %v8088_v18, 16  ;;  %v8110_v37 = vpop.f32.mrb[32].mxu0  ;;  %6562 = vmatpush3.bf16.msra.mxu1 %v7113_v50  ;;  %6819 = vmatprep.subr.bf16.mxu0 %v7115_v58 }
 0x1a9   : > { %v6177_v59 = vpack.c.bf16 %v793_v61, %v793_v61  ;;  %v6178_v29 = vpack.c.bf16 %v794_v2, %v794_v2  ;;  %v5904_v39 = vcombine.low %v1271_v16, %v1280_v12  ;;  %v10395_v26 = vshrl.u32 %v8091_v57, 16  ;;  %10554 = vst [vmem:[#allocation43_spill] sm:$0xff] %v8110_v37  ;;  %v631_v52 = vpop.f32.mrb[33].mxu0  ;;  %6915 = vmatprep.subr.bf16.mxu1 %v7115_v58 }
 0x1aa   : > { %v1570_v6 = vrot.slane %v1569_v47, 4  ;;  %v1888_v56 = vrot.slane %v10398_v28, 7  ;;  %v8112_v47 = vrot.slane %v1274_v46, 4  ;;  %v1567_v44 = vsel %vm7721_vm11, %v1565_v0, %v1566_v3  ;;  %v8124_v16 = vpop.f32.mrb[34].mxu0 }
 0x1ab   : > { %1081 = vst [vmem:[#allocation2 + $0x84] sm:$0xf] %v6177_v59  ;;  %v1287_v34 = vshrl.u32 %v1118_v7, 16  ;;  %1082 = vst [vmem:[#allocation2 + $0x88] sm:$0xf] %v6178_v29  ;;  %4353 = vmatmul.mubr.bf16.gmra.mrb[20].mxu1 %v5904_v39  ;;  %v1897_v46 = vrot.slane %v10395_v26, 7  ;;  %v1578_v26 = vor.u32 %v8051_v10, %v8024_v62 }
 0x1ac   : > { %v1575_v61 = vsel %vm7721_vm11, %v1570_v6, %v7791_v63  ;;  %v1891_v2 = vor.u32 %v10397_v53, %v1888_v56  ;;  %v10396_v50 = vshll.u32 %v8091_v57, 16  ;;  %10555 = vst [vmem:[#allocation44_spill] sm:$0xff] %v8124_v16  ;;  %v1893_v3 = vrot.slane %v1888_v56, 4  ;;  %v635_v6 = vpop.f32.mrb[35].mxu0  ;;  %v8144_v53 = vld [vmem:[#allocation2 + $0x64] sm:$0xf] }
 0x1ad   : > { %v5934_v35 = vcombine.low %v1567_v44, %v1575_v61  ;;  %v1289_v0 = vrot.slane %v1287_v34, 7  ;;  %v1290_v12 = vshll.u32 %v1118_v7, 16  ;;  %v1296_v63 = vshrl.u32 %v8108_v11, 16  ;;  %v8149_v10 = vld [vmem:[#allocation2 + $0x68] sm:$0xf] }
 0x1ae   : > { %v1900_v59 = vor.u32 %v10396_v50, %v1897_v46  ;;  %v10404_v29 = vshll.u32 %v8108_v11, 16  ;;  %v8130_v39 = vrot.slane %v1287_v34, 4  ;;  %v5921_v44 = vcombine.low %v1118_v7, %v8108_v11 }
 0x1af   : > { %4498 = vmatmul.mubr.bf16.gmra.mrb[76].mxu0 %v5934_v35  ;;  %v1892_v61 = vsel %vm7704_vm8, %v7809_v27, %v1891_v2  ;;  %v1298_v56 = vrot.slane %v1296_v63, 7  ;;  %v1580_v35 = vrot.slane %v1255_v19, 5  ;;  %v763_v34 = vadd.f32 %v7789_v55, %v631_v52 }
 0x1b0   : > { %v1901_v46 = vsel %vm7704_vm8, %v1893_v3, %v1900_v59  ;;  %4360 = vmatprep.mubr.bf16.mxu1 %v5921_v44  ;;  %v764_v50 = vadd.f32 %v7789_v55, %v635_v6  ;;  %v1292_v7 = vor.u32 %v1290_v12, %v1289_v0  ;;  %v8146_v27 = vrot.slane %v1290_v12, 5  ;;  %v8153_v59 = vpop.f32.mrb[36].mxu0  ;;  %v1121_v44 = vld [vmem:[#allocation2 + $0x74] sm:$0xf] }
 0x1b1   : > { %v5951_v28 = vcombine.low %v1892_v61, %v1901_v46  ;;  %v1579_v2 = vrot.slane %v1578_v26, 4  ;;  %v1583_v62 = vor.u32 %v8057_v33, %v1580_v35  ;;  %v795_v19 = vmax.f32 %v763_v34, 0.0  ;;  %10556 = vst [vmem:[#allocation45_spill] sm:$0xff] %v8153_v59  ;;  %v641_v61 = vpop.f32.mrb[37].mxu0  ;;  %v8164_v46 = vld [vmem:[#allocation2 + $0x78] sm:$0xf] }
 0x1b2   : > { %v796_v42 = vmax.f32 %v764_v50, 0.0  ;;  %v1294_v3 = vrot.slane %v1289_v0, 4  ;;  %v1301_v52 = vor.u32 %v10404_v29, %v1298_v56  ;;  %v1293_v33 = vsel %vm7704_vm8, %v7811_v30, %v1292_v7 }
 0x1b3   : > { %4505 = vmatprep.mubr.bf16.mxu0 %v5951_v28  ;;  %v1581_v6 = vsel %vm7721_vm11, %v1579_v2, %v1580_v35  ;;  %v1584_v12 = vrot.slane %v1583_v62, 4  ;;  %v10403_v26 = vshrl.u32 %v8144_v53, 16  ;;  %v6179_v50 = vpack.c.bf16 %v795_v19, %v795_v19  ;;  %v8166_v35 = vpop.f32.mrb[38].mxu0 }
 0x1b4   : > { %v6180_v0 = vpack.c.bf16 %v796_v42, %v796_v42  ;;  %v1302_v56 = vsel %vm7704_vm8, %v1294_v3, %v1301_v52  ;;  %v10400_v28 = vshrl.u32 %v8149_v10, 16  ;;  %10557 = vst [vmem:[#allocation46_spill] sm:$0xff] %v8166_v35  ;;  %v10401_v42 = vshll.u32 %v8144_v53, 16  ;;  %v645_v2 = vpop.f32.mrb[39].mxu0 }
 0x1b5   : > { %v1589_v30 = vsel %vm7721_vm11, %v1584_v12, %v7801_v9  ;;  %v5905_v34 = vcombine.low %v1293_v33, %v1302_v56  ;;  %v1910_v7 = vrot.slane %v10403_v26, 7  ;;  %1083 = vst [vmem:[#allocation2 + $0x94] sm:$0xf] %v6179_v50  ;;  %v10402_v3 = vshll.u32 %v8149_v10, 16  ;;  %v8198_v26 = vld [vmem:[#allocation2 + $0x74] sm:$0xf] }
 0x1b6   : > { %v5935_v62 = vcombine.low %v1581_v6, %v1589_v30  ;;  %1084 = vst [vmem:[#allocation2 + $0x98] sm:$0xf] %v6180_v0  ;;  %v1919_v19 = vrot.slane %v10400_v28, 7  ;;  %v1309_v58 = vshrl.u32 %v1121_v44, 16  ;;  %v8177_v52 = vrot.slane %v1296_v63, 4 }
 0x1b7   : > { %4361 = vmatmul.mubr.bf16.gmra.mrb[24].mxu1 %v5905_v34  ;;  %v1913_v9 = vor.u32 %v10401_v42, %v1910_v7  ;;  %v1312_v12 = vshll.u32 %v1121_v44, 16  ;;  %v1318_v33 = vshrl.u32 %v8164_v46, 16  ;;  %v1915_v56 = vrot.slane %v1910_v7, 4 }
 0x1b8   : > { %4506 = vmatmul.mubr.bf16.gmra.mrb[80].mxu0 %v5935_v62  ;;  %v1922_v6 = vor.u32 %v10402_v3, %v1919_v19  ;;  %v1311_v50 = vrot.slane %v1309_v58, 7  ;;  %v8188_v34 = vrot.slane %v1309_v58, 4  ;;  %v5922_v28 = vcombine.low %v1121_v44, %v8164_v46  ;;  %v8200_v29 = vpop.f32.mrb[40].mxu0 }
 0x1b9   : > { %v1914_v63 = vsel %vm7704_vm8, %v7813_v31, %v1913_v9  ;;  %v1320_v30 = vrot.slane %v1318_v33, 7  ;;  %v1592_v7 = vor.u32 %v8096_v22, %v8076_v13  ;;  %v10558_v62 = vshll.u32 %v8055_v5, 16  ;;  %10559 = vst [vmem:[#allocation47_spill] sm:$0xff] %v8200_v29  ;;  %v651_v0 = vpop.f32.mrb[41].mxu0 }
 0x1ba   : > { %v1923_v42 = vsel %vm7704_vm8, %v1915_v56, %v1922_v6  ;;  %v765_v3 = vadd.f32 %v7789_v55, %v641_v61  ;;  %4368 = vmatprep.mubr.bf16.mxu1 %v5922_v28  ;;  %v766_v58 = vadd.f32 %v7789_v55, %v645_v2  ;;  %v1314_v44 = vor.u32 %v1312_v12, %v1311_v50  ;;  %v8208_v61 = vpop.f32.mrb[42].mxu0  ;;  %v1124_v2 = vld [vmem:[#allocation2 + $0x84] sm:$0xf] }
 0x1bb   : > { %v1594_v19 = vrot.slane %v10558_v62, 5  ;;  %v5952_v31 = vcombine.low %v1914_v63, %v1923_v42  ;;  %v1316_v9 = vrot.slane %v1311_v50, 4  ;;  %v1593_v56 = vrot.slane %v1592_v7, 4  ;;  %v8206_v62 = vld [vmem:[#allocation2 + $0x78] sm:$0xf]  ;;  %10561 = vst [vmem:[#allocation48_spill] sm:$0xff] %v8208_v61 }
 0x1bc   : > { %v797_v22 = vmax.f32 %v765_v3, 0.0  ;;  %v10560_v5 = vshll.u32 %v8164_v46, 16  ;;  %v8210_v29 = vrot.slane %v1312_v12, 5  ;;  %v798_v28 = vmax.f32 %v766_v58, 0.0 }
 0x1bd   : > { %v1597_v6 = vor.u32 %v8112_v47, %v1594_v19  ;;  %4513 = vmatprep.mubr.bf16.mxu0 %v5952_v31  ;;  %v1315_v55 = vsel %vm7704_vm8, %v7819_v43, %v1314_v44  ;;  %v10405_v42 = vshrl.u32 %v8198_v26, 16  ;;  %v655_v47 = vpop.f32.mrb[43].mxu0  ;;  %v10406_v58 = vshrl.u32 %v8206_v62, 16 }
 0x1be   : > { %v1323_v13 = vor.u32 %v10560_v5, %v1320_v30  ;;  %v6181_v50 = vpack.c.bf16 %v797_v22, %v797_v22  ;;  %v10408_v30 = vshll.u32 %v8198_v26, 16  ;;  %v6182_v7 = vpack.c.bf16 %v798_v28, %v798_v28  ;;  %v8222_v5 = vld [vmem:[#allocation2 + $0x88] sm:$0xf] }
 0x1bf   : > { %v1598_v3 = vrot.slane %v1597_v6, 4  ;;  %v1932_v12 = vrot.slane %v10405_v42, 7  ;;  %v8224_v43 = vrot.slane %v1318_v33, 4  ;;  %v1595_v44 = vsel %vm7721_vm11, %v1593_v56, %v1594_v19 }
 0x1c0   : > { %v1324_v63 = vsel %vm7704_vm8, %v1316_v9, %v1323_v13  ;;  %1085 = vst [vmem:[#allocation2 + $0xa4] sm:$0xf] %v6181_v50  ;;  %v1331_v6 = vshrl.u32 %v1124_v2, 16  ;;  %1086 = vst [vmem:[#allocation2 + $0xa8] sm:$0xf] %v6182_v7  ;;  %v1941_v28 = vrot.slane %v10406_v58, 7  ;;  %v5923_v7 = vcombine.low %v1124_v2, %v8222_v5 }
 0x1c1   : > { %v5906_v31 = vcombine.low %v1315_v55, %v1324_v63  ;;  %v1603_v9 = vsel %vm7721_vm11, %v1598_v3, %v7815_v36  ;;  %v1935_v13 = vor.u32 %v10408_v30, %v1932_v12  ;;  %v10407_v33 = vshll.u32 %v8206_v62, 16  ;;  %v8237_v42 = vpop.f32.mrb[44].mxu0 }
 0x1c2   : > { %v5936_v22 = vcombine.low %v1595_v44, %v1603_v9  ;;  %v1937_v55 = vrot.slane %v1932_v12, 4  ;;  %v1333_v63 = vrot.slane %v1331_v6, 7  ;;  %v1334_v19 = vshll.u32 %v1124_v2, 16  ;;  %10562 = vst [vmem:[#allocation49_spill] sm:$0xff] %v8237_v42  ;;  %v8261_v2 = vld [vmem:[%s10355_s2] ss:$0 sm:$0xff] }
 0x1c3   : > { %4369 = vmatmul.mubr.bf16.gmra.mrb[28].mxu1 %v5906_v31  ;;  %v1340_v56 = vshrl.u32 %v8222_v5, 16  ;;  %v1944_v36 = vor.u32 %v10407_v33, %v1941_v28  ;;  %v8242_v50 = vrot.slane %v1331_v6, 4  ;;  %v8245_v31 = vpop.f32.mrb[45].mxu0  ;;  %v1936_v12 = vsel %vm7704_vm8, %v7823_v49, %v1935_v13 }
 0x1c4   : > { %4514 = vmatmul.mubr.bf16.gmra.mrb[84].mxu0 %v5936_v22  ;;  %v1606_v9 = vor.u32 %v8146_v27, %v8130_v39  ;;  %v10563_v22 = vshll.u32 %v8108_v11, 16  ;;  %v8254_v28 = vpop.f32.mrb[46].mxu0  ;;  %4376 = vmatprep.mubr.bf16.mxu1 %v5923_v7  ;;  %v767_v49 = vadd.f32 %v8261_v2, %v651_v0  ;;  %v768_v13 = vadd.f32 %v8261_v2, %v655_v47  ;;  %v8265_v39 = vld [vmem:[#allocation2 + $0x84] sm:$0xf] }
 0x1c5   : > { %v1342_v44 = vrot.slane %v1340_v56, 7  ;;  %10564 = vst [vmem:[#allocation50_spill] sm:$0xff] %v8254_v28  ;;  %v1945_v6 = vsel %vm7704_vm8, %v1937_v55, %v1944_v36  ;;  %v1336_v33 = vor.u32 %v1334_v19, %v1333_v63  ;;  %v665_v11 = vpop.f32.mrb[47].mxu0  ;;  %v8270_v36 = vld [vmem:[#allocation2 + $0x88] sm:$0xf]  ;;  %v1338_v61 = vrot.slane %v1333_v63, 4 }
 0x1c6   : > { %v1608_v58 = vrot.slane %v10563_v22, 5  ;;  %v5953_v27 = vcombine.low %v1936_v12, %v1945_v6  ;;  %v8267_v22 = vrot.slane %v1334_v19, 5  ;;  %v1607_v30 = vrot.slane %v1606_v9, 4 }
 0x1c7   : > { %v799_v7 = vmax.f32 %v767_v49, 0.0  ;;  %v800_v3 = vmax.f32 %v768_v13, 0.0  ;;  %v10565_v28 = vshll.u32 %v8222_v5, 16  ;;  %v1337_v19 = vsel %vm7704_vm8, %v7835_v21, %v1336_v33 }
 0x1c8   : > { %v1611_v55 = vor.u32 %v8177_v52, %v1608_v58  ;;  %4521 = vmatprep.mubr.bf16.mxu0 %v5953_v27  ;;  %v1609_v47 = vsel %vm7721_vm11, %v1607_v30, %v1608_v58  ;;  %v10412_v12 = vshrl.u32 %v8265_v39, 16  ;;  %v1127_v52 = vld [vmem:[#allocation2 + $0x94] sm:$0xf]  ;;  %v10409_v49 = vshrl.u32 %v8270_v36, 16 }
 0x1c9   : > { %v1345_v0 = vor.u32 %v10565_v28, %v1342_v44  ;;  %v6183_v9 = vpack.c.bf16 %v799_v7, %v799_v7  ;;  %v6184_v6 = vpack.c.bf16 %v800_v3, %v800_v3  ;;  %v8283_v44 = vld [vmem:[#allocation2 + $0x98] sm:$0xf]  ;;  %v10410_v33 = vshll.u32 %v8265_v39, 16  ;;  %v8291_v28 = vpop.f32.mrb[48].mxu0 }
 0x1ca   : > { %v1612_v42 = vrot.slane %v1611_v55, 4  ;;  %v1954_v21 = vrot.slane %v10412_v12, 7  ;;  %10566 = vst [vmem:[#allocation51_spill] sm:$0xff] %v8291_v28  ;;  %v10411_v13 = vshll.u32 %v8270_v36, 16  ;;  %v1353_v27 = vshrl.u32 %v1127_v52, 16  ;;  %v8296_v55 = vpop.f32.mrb[49].mxu0 }
 0x1cb   : > { %v1346_v63 = vsel %vm7704_vm8, %v1338_v61, %v1345_v0  ;;  %1087 = vst [vmem:[#allocation2 + $0xb4] sm:$0xf] %v6183_v9  ;;  %1088 = vst [vmem:[#allocation2 + $0xb8] sm:$0xf] %v6184_v6  ;;  %v1963_v61 = vrot.slane %v10409_v49, 7  ;;  %v1356_v7 = vshll.u32 %v1127_v52, 16  ;;  %v769_v12 = vadd.f32 %v8261_v2, %v8245_v31 }
 0x1cc   : > { %v1617_v30 = vsel %vm7721_vm11, %v1612_v42, %v7821_v45  ;;  %v5907_v58 = vcombine.low %v1337_v19, %v1346_v63  ;;  %v8298_v45 = vrot.slane %v1340_v56, 4  ;;  %v1957_v42 = vor.u32 %v10410_v33, %v1954_v21  ;;  %v8324_v63 = vld [vmem:[#allocation2 + $0x94] sm:$0xf] }
 0x1cd   : > { %v5937_v3 = vcombine.low %v1609_v47, %v1617_v30  ;;  %v1362_v0 = vshrl.u32 %v8283_v44, 16  ;;  %v8303_v47 = vpop.f32.mrb[50].mxu0  ;;  %v1959_v19 = vrot.slane %v1954_v21, 4  ;;  %v1966_v9 = vor.u32 %v10411_v13, %v1963_v61 }
 0x1ce   : > { %4377 = vmatmul.mubr.bf16.gmra.mrb[32].mxu1 %v5907_v58  ;;  %10567 = vst [vmem:[#allocation52_spill] sm:$0xff] %v8303_v47  ;;  %v1355_v6 = vrot.slane %v1353_v27, 7  ;;  %v8308_v30 = vpop.f32.mrb[51].mxu0  ;;  %v1958_v56 = vsel %vm7704_vm8, %v7837_v23, %v1957_v42  ;;  %v8313_v49 = vrot.slane %v1353_v27, 4  ;;  %v5924_v33 = vcombine.low %v1127_v52, %v8283_v44 }
 0x1cf   : > { %4522 = vmatmul.mubr.bf16.gmra.mrb[88].mxu0 %v5937_v3  ;;  %v1364_v58 = vrot.slane %v1362_v0, 7  ;;  %v1967_v21 = vsel %vm7704_vm8, %v1959_v19, %v1966_v9  ;;  %v1620_v3 = vor.u32 %v8210_v29, %v8188_v34  ;;  %v10568_v61 = vshll.u32 %v8164_v46, 16  ;;  %v8330_v46 = vld [vmem:[#allocation2 + $0x98] sm:$0xf] }
 0x1d0   : > { %v5954_v23 = vcombine.low %v1958_v56, %v1967_v21  ;;  %4384 = vmatprep.mubr.bf16.mxu1 %v5924_v33  ;;  %v770_v27 = vadd.f32 %v8261_v2, %v665_v11  ;;  %v1358_v42 = vor.u32 %v1356_v7, %v1355_v6  ;;  %v1360_v52 = vrot.slane %v1355_v6, 4  ;;  %v1130_v6 = vld [vmem:[#allocation2 + $0xa4] sm:$0xf]  ;;  %v8338_v56 = vpop.f32.mrb[52].mxu0 }
 0x1d1   : > { %v1622_v13 = vrot.slane %v10568_v61, 5  ;;  %v1621_v47 = vrot.slane %v1620_v3, 4  ;;  %v801_v9 = vmax.f32 %v769_v12, 0.0  ;;  %v10569_v29 = vshll.u32 %v8283_v44, 16  ;;  %10570 = vst [vmem:[#allocation53_spill] sm:$0xff] %v8338_v56  ;;  %v8343_v3 = vpop.f32.mrb[53].mxu0 }
 0x1d2   : > { %4529 = vmatprep.mubr.bf16.mxu0 %v5954_v23  ;;  %v8332_v61 = vrot.slane %v1356_v7, 5  ;;  %v802_v31 = vmax.f32 %v770_v27, 0.0  ;;  %v1359_v33 = vsel %vm7704_vm8, %v7841_v38, %v1358_v42  ;;  %v10413_v11 = vshrl.u32 %v8324_v63, 16  ;;  %v8348_v42 = vld [vmem:[#allocation2 + $0xa8] sm:$0xf] }
 0x1d3   : > { %v1625_v19 = vor.u32 %v8224_v43, %v1622_v13  ;;  %v1367_v34 = vor.u32 %v10569_v29, %v1364_v58  ;;  %v6185_v12 = vpack.c.bf16 %v801_v9, %v801_v9  ;;  %v10416_v21 = vshll.u32 %v8324_v63, 16  ;;  %v8350_v29 = vpop.f32.mrb[54].mxu0 }
 0x1d4   : > { %v6186_v7 = vpack.c.bf16 %v802_v31, %v802_v31  ;;  %v1976_v27 = vrot.slane %v10413_v11, 7  ;;  %v10414_v38 = vshrl.u32 %v8330_v46, 16  ;;  %10571 = vst [vmem:[#allocation54_spill] sm:$0xff] %v8350_v29  ;;  %v8359_v31 = vpop.f32.mrb[55].mxu0  ;;  %v10415_v11 = vshll.u32 %v8330_v46, 16 }
 0x1d5   : > { %v1626_v43 = vrot.slane %v1625_v19, 4  ;;  %v1368_v58 = vsel %vm7704_vm8, %v1360_v52, %v1367_v34  ;;  %v8352_v19 = vrot.slane %v1362_v0, 4  ;;  %v1623_v52 = vsel %vm7721_vm11, %v1621_v47, %v1622_v13  ;;  %1089 = vst [vmem:[#allocation2 + $0xc4] sm:$0xf] %v6185_v12 }
 0x1d6   : > { %v5908_v23 = vcombine.low %v1359_v33, %v1368_v58  ;;  %v1375_v34 = vshrl.u32 %v1130_v6, 16  ;;  %1090 = vst [vmem:[#allocation2 + $0xc8] sm:$0xf] %v6186_v7  ;;  %v1979_v58 = vor.u32 %v10416_v21, %v1976_v27  ;;  %v1985_v0 = vrot.slane %v10414_v38, 7  ;;  %v8386_v21 = vld [vmem:[#allocation2 + $0xa4] sm:$0xf] }
 0x1d7   : > { %v1631_v9 = vsel %vm7721_vm11, %v1626_v43, %v7832_v14  ;;  %v1981_v13 = vrot.slane %v1976_v27, 4  ;;  %v1378_v29 = vshll.u32 %v1130_v6, 16  ;;  %v1384_v14 = vshrl.u32 %v8348_v42, 16 }
 0x1d8   : > { %v5938_v33 = vcombine.low %v1623_v52, %v1631_v9  ;;  %4385 = vmatmul.mubr.bf16.gmra.mrb[36].mxu1 %v5908_v23  ;;  %v1377_v47 = vrot.slane %v1375_v34, 7  ;;  %v1988_v43 = vor.u32 %v10415_v11, %v1985_v0  ;;  %v10417_v12 = vshll.u32 %v8348_v42, 16 }
 0x1d9   : > { %v8370_v7 = vrot.slane %v1375_v34, 4  ;;  %v5925_v23 = vcombine.low %v1130_v6, %v8348_v42  ;;  %v1980_v52 = vsel %vm7704_vm8, %v7845_v54, %v1979_v58  ;;  %v1386_v9 = vrot.slane %v1384_v14, 7  ;;  %v8388_v54 = vpop.f32.mrb[56].mxu0 }
 0x1da   : > { %4530 = vmatmul.mubr.bf16.gmra.mrb[92].mxu0 %v5938_v33  ;;  %v1634_v27 = vor.u32 %v8267_v22, %v8242_v50  ;;  %v10572_v38 = vshll.u32 %v8222_v5, 16  ;;  %v1989_v0 = vsel %vm7704_vm8, %v1981_v13, %v1988_v43  ;;  %v771_v34 = vadd.f32 %v8261_v2, %v8296_v55  ;;  %10573 = vst [vmem:[#allocation55_spill] sm:$0xff] %v8388_v54  ;;  %v8395_v13 = vpop.f32.mrb[57].mxu0  ;;  %v8460_v54 = vld [vmem:[#allocation2 + $0xb8] sm:$0xf] }
 0x1db   : > { %4392 = vmatprep.mubr.bf16.mxu1 %v5925_v23  ;;  %v772_v6 = vadd.f32 %v8261_v2, %v8308_v30  ;;  %v1380_v11 = vor.u32 %v1378_v29, %v1377_v47  ;;  %v5955_v58 = vcombine.low %v1980_v52, %v1989_v0  ;;  %v8390_v50 = vrot.slane %v1378_v29, 5  ;;  %v8399_v28 = vpop.f32.mrb[58].mxu0  ;;  %v1133_v0 = vld [vmem:[#allocation2 + $0xb4] sm:$0xf] }
 0x1dc   : > { %v1636_v33 = vrot.slane %v10572_v38, 5  ;;  %v1635_v5 = vrot.slane %v1634_v27, 4  ;;  %v8393_v38 = vld [vmem:[#allocation2 + $0xa8] sm:$0xf]  ;;  %v803_v43 = vmax.f32 %v771_v34, 0.0  ;;  %v1382_v23 = vrot.slane %v1377_v47, 4 }
 0x1dd   : > { %v804_v55 = vmax.f32 %v772_v6, 0.0  ;;  %v1389_v30 = vor.u32 %v10417_v12, %v1386_v9  ;;  %10574 = vst [vmem:[#allocation56_spill] sm:$0xff] %v8399_v28  ;;  %4537 = vmatprep.mubr.bf16.mxu0 %v5955_v58  ;;  %v10420_v27 = vshrl.u32 %v8386_v21, 16  ;;  %v8407_v34 = vpop.f32.mrb[59].mxu0  ;;  %v10418_v58 = vshrl.u32 %v8393_v38, 16 }
 0x1de   : > { %v1639_v22 = vor.u32 %v8298_v45, %v1636_v33  ;;  %v1637_v29 = vsel %vm7721_vm11, %v1635_v5, %v1636_v33  ;;  %v1381_v45 = vsel %vm7704_vm8, %v7852_v60, %v1380_v11  ;;  %v6187_v47 = vpack.c.bf16 %v803_v43, %v803_v43  ;;  %v8412_v12 = vld [vmem:[#allocation2 + $0xb8] sm:$0xf] }
 0x1df   : > { %v6188_v6 = vpack.c.bf16 %v804_v55, %v804_v55  ;;  %v1390_v9 = vsel %vm7704_vm8, %v1382_v23, %v1389_v30  ;;  %v1998_v60 = vrot.slane %v10420_v27, 7  ;;  %v10419_v11 = vshll.u32 %v8386_v21, 16 }
 0x1e0   : > { %v1640_v52 = vrot.slane %v1639_v22, 4  ;;  %v5909_v5 = vcombine.low %v1381_v45, %v1390_v9  ;;  %1091 = vst [vmem:[#allocation2 + $0xd4] sm:$0xf] %v6187_v47  ;;  %v2007_v43 = vrot.slane %v10418_v58, 7  ;;  %v10421_v55 = vshll.u32 %v8393_v38, 16 }
 0x1e1   : > { %1092 = vst [vmem:[#allocation2 + $0xd8] sm:$0xf] %v6188_v6  ;;  %v1397_v23 = vshrl.u32 %v1133_v0, 16  ;;  %v8423_v30 = vrot.slane %v1384_v14, 4  ;;  %v1406_v45 = vshrl.u32 %v8412_v12, 16  ;;  %v2003_v9 = vrot.slane %v1998_v60, 4 }
 0x1e2   : > { %v1645_v33 = vsel %vm7721_vm11, %v1640_v52, %v7839_v24  ;;  %4393 = vmatmul.mubr.bf16.gmra.mrb[40].mxu1 %v5909_v5  ;;  %v2001_v24 = vor.u32 %v10419_v11, %v1998_v60  ;;  %v1400_v52 = vshll.u32 %v1133_v0, 16  ;;  %v5926_v11 = vcombine.low %v1133_v0, %v8412_v12 }
 0x1e3   : > { %v5939_v22 = vcombine.low %v1637_v29, %v1645_v33  ;;  %v2010_v29 = vor.u32 %v10421_v55, %v2007_v43  ;;  %v1399_v47 = vrot.slane %v1397_v23, 7  ;;  %v8431_v33 = vpop.f32.mrb[60].mxu0  ;;  %v1408_v5 = vrot.slane %v1406_v45, 7 }
 0x1e4   : > { %10575 = vst [vmem:[#allocation57_spill] sm:$0xff] %v8431_v33  ;;  %v2002_v14 = vsel %vm7704_vm8, %v7856_v1, %v2001_v24  ;;  %v8436_v58 = vrot.slane %v1397_v23, 4  ;;  %v8439_v27 = vpop.f32.mrb[61].mxu0  ;;  %v10576_v43 = vshll.u32 %v8283_v44, 16  ;;  %v773_v6 = vadd.f32 %v8261_v2, %v8343_v3  ;;  %v8449_v1 = vld [vmem:[#allocation2 + $0xb4] sm:$0xf]  ;;  %4400 = vmatprep.mubr.bf16.mxu1 %v5926_v11 }
 0x1e5   : > { %4538 = vmatmul.mubr.bf16.gmra.mrb[96].mxu0 %v5939_v22  ;;  %v2011_v60 = vsel %vm7704_vm8, %v2003_v9, %v2010_v29  ;;  %v1648_v22 = vor.u32 %v8332_v61, %v8313_v49  ;;  %v8451_v23 = vpop.f32.mrb[62].mxu0  ;;  %v774_v0 = vadd.f32 %v8261_v2, %v8359_v31  ;;  %v1402_v28 = vor.u32 %v1400_v52, %v1399_v47 }
 0x1e6   : > { %v1650_v55 = vrot.slane %v10576_v43, 5  ;;  %10577 = vst [vmem:[#allocation58_spill] sm:$0xff] %v8451_v23  ;;  %v5956_v24 = vcombine.low %v2002_v14, %v2011_v60  ;;  %v1404_v9 = vrot.slane %v1399_v47, 4  ;;  %v8455_v29 = vpop.f32.mrb[63].mxu0  ;;  %v805_v61 = vmax.f32 %v773_v6, 0.0 }
 0x1e7   : > { %v1649_v49 = vrot.slane %v1648_v22, 4  ;;  %v10578_v43 = vshll.u32 %v8412_v12, 16  ;;  %v8462_v23 = vrot.slane %v1400_v52, 5  ;;  %v806_v11 = vmax.f32 %v774_v0, 0.0  ;;  %v1136_v14 = vld [vmem:[#allocation2 + $0xc4] sm:$0xf] }
 0x1e8   : > { %v1653_v44 = vor.u32 %v8352_v19, %v1650_v55  ;;  %4545 = vmatprep.mubr.bf16.mxu0 %v5956_v24  ;;  %v1403_v31 = vsel %vm7704_vm8, %v7864_v17, %v1402_v28  ;;  %v10422_v47 = vshrl.u32 %v8449_v1, 16  ;;  %v6189_v22 = vpack.c.bf16 %v805_v61, %v805_v61  ;;  %v8474_v0 = vld [vmem:[#allocation2 + $0xc8] sm:$0xf]  ;;  %v8520_v56 = vld [vmem:[#allocation2 + $0xd4] sm:$0xf] }
 0x1e9   : > { %v1411_v3 = vor.u32 %v10578_v43, %v1408_v5  ;;  %v10425_v6 = vshll.u32 %v8449_v1, 16  ;;  %v6190_v5 = vpack.c.bf16 %v806_v11, %v806_v11  ;;  %v10423_v24 = vshrl.u32 %v8460_v54, 16 }
 0x1ea   : > { %v1654_v60 = vrot.slane %v1653_v44, 4  ;;  %v2020_v52 = vrot.slane %v10422_v47, 7  ;;  %v8476_v17 = vrot.slane %v1406_v45, 4  ;;  %v1651_v28 = vsel %vm7721_vm11, %v1649_v49, %v1650_v55  ;;  %1093 = vst [vmem:[#allocation2 + $0xe4] sm:$0xf] %v6189_v22 }
 0x1eb   : > { %v1412_v19 = vsel %vm7704_vm8, %v1404_v9, %v1411_v3  ;;  %v1419_v44 = vshrl.u32 %v1136_v14, 16  ;;  %1094 = vst [vmem:[#allocation2 + $0xe8] sm:$0xf] %v6190_v5  ;;  %v2029_v11 = vrot.slane %v10423_v24, 7  ;;  %v10424_v45 = vshll.u32 %v8460_v54, 16 }
 0x1ec   : > { %v5910_v43 = vcombine.low %v1403_v31, %v1412_v19  ;;  %v1659_v9 = vsel %vm7721_vm11, %v1654_v60, %v7847_v51  ;;  %v2023_v3 = vor.u32 %v10425_v6, %v2020_v52  ;;  %v2025_v31 = vrot.slane %v2020_v52, 4  ;;  %v1135_v47 = vld [vmem:[#allocation2 + $0xc0] sm:$0x8] }
 0x1ed   : > { %v5940_v61 = vcombine.low %v1651_v28, %v1659_v9  ;;  %v1421_v19 = vrot.slane %v1419_v44, 7  ;;  %v1422_v55 = vshll.u32 %v1136_v14, 16  ;;  %v1428_v49 = vshrl.u32 %v8474_v0, 16 }
 0x1ee   : > { %4401 = vmatmul.mubr.bf16.gmra.mrb[44].mxu1 %v5910_v43  ;;  %v2032_v51 = vor.u32 %v10424_v45, %v2029_v11  ;;  %v8492_v22 = vrot.slane %v1419_v44, 4  ;;  %v5927_v5 = vcombine.low %v1136_v14, %v8474_v0  ;;  %v10579_v43 = vld [vmem:[#allocation29_spill] sm:$0xff]  ;;  %v1662_v9 = vor.u32 %v8390_v50, %v8370_v7  ;;  %v1777_v7 = vld [vmem:[#allocation2 + $0xc0] sm:$0x8]  ;;  %v8509_v50 = vld [vmem:[#allocation2 + $0xc4] sm:$0xf] }
 0x1ef   : > { %4546 = vmatmul.mubr.bf16.gmra.mrb[100].mxu0 %v5940_v61  ;;  %v2024_v28 = vsel %vm7704_vm8, %v10579_v43, %v2023_v3  ;;  %v1430_v52 = vrot.slane %v1428_v49, 7  ;;  %v10580_v24 = vshll.u32 %v8348_v42, 16  ;;  %v775_v44 = vadd.f32 %v8261_v2, %v8395_v13 }
 0x1f0   : > { %v2033_v11 = vsel %vm7704_vm8, %v2025_v31, %v2032_v51  ;;  %4408 = vmatprep.mubr.bf16.mxu1 %v5927_v5  ;;  %v776_v14 = vadd.f32 %v8261_v2, %v8407_v34  ;;  %v1414_v45 = vshrl.u32 %v1135_v47, 16  ;;  %v1663_v3 = vrot.slane %v1662_v9, 4  ;;  %v8517_v9 = vld [vmem:[#allocation2 + $0xc8] sm:$0xf] }
 0x1f1   : > { %v1664_v61 = vrot.slane %v10580_v24, 5  ;;  %v5957_v6 = vcombine.low %v2024_v28, %v2033_v11  ;;  %v1424_v60 = vor.u32 %v1422_v55, %v1421_v19  ;;  %v8511_v42 = vrot.slane %v1422_v55, 5 }
 0x1f2   : > { %v807_v24 = vmax.f32 %v775_v44, 0.0  ;;  %v808_v31 = vmax.f32 %v776_v14, 0.0  ;;  %v5863_v51 = vrot.slane %v1414_v45, 11  ;;  %v1426_v34 = vrot.slane %v1421_v19, 4  ;;  %v8522_v44 = vld [vmem:[#allocation2 + $0xd8] sm:$0xf] }
 0x1f3   : > { %v1667_v43 = vor.u32 %v8423_v30, %v1664_v61  ;;  %4553 = vmatprep.mubr.bf16.mxu0 %v5957_v6  ;;  %v1665_v13 = vsel %vm7721_vm11, %v1663_v3, %v1664_v61  ;;  %v10581_v47 = vshll.u32 %v8474_v0, 16  ;;  %v2035_v33 = vshrl.u32 %v1777_v7, 16  ;;  %v10582_v6 = vld [vmem:[#allocation26_spill] sm:$0xff] }
 0x1f4   : > { %v6191_v30 = vpack.c.bf16 %v807_v24, %v807_v24  ;;  %v6192_v11 = vpack.c.bf16 %v808_v31, %v808_v31  ;;  %v10428_v55 = vshrl.u32 %v8509_v50, 16  ;;  %v1425_v19 = vsel %vm7704_vm8, %v5863_v51, %v1424_v60 }
 0x1f5   : > { %v1668_v5 = vrot.slane %v1667_v43, 4  ;;  %v1433_v28 = vor.u32 %v10581_v47, %v1430_v52  ;;  %v10427_v61 = vshll.u32 %v8509_v50, 16  ;;  %v10426_v7 = vshrl.u32 %v8517_v9, 16 }
 0x1f6   : > { %1095 = vst [vmem:[#allocation2 + $0xf4] sm:$0xf] %v6191_v30  ;;  %1096 = vst [vmem:[#allocation2 + $0xf8] sm:$0xf] %v6192_v11  ;;  %v2042_v43 = vrot.slane %v10428_v55, 7  ;;  %v8535_v24 = vrot.slane %v1428_v49, 4  ;;  %v777_v55 = vadd.f32 %v8261_v2, %v8439_v27 }
 0x1f7   : > { %v1673_v45 = vsel %vm7721_vm11, %v1668_v5, %v10582_v6  ;;  %v1434_v52 = vsel %vm7704_vm8, %v1426_v34, %v1433_v28  ;;  %v1441_v31 = vshrl.u32 %v8520_v56, 16  ;;  %v1444_v60 = vshll.u32 %v8520_v56, 16  ;;  %v1512_v28 = vld [vmem:[#allocation2 + $0xbc] sm:$0x1]  ;;  %v8571_v6 = vld [vmem:[#allocation2 + $0xd8] sm:$0xf] }
 0x1f8   : > { %v5941_v14 = vcombine.low %v1665_v13, %v1673_v45  ;;  %v5911_v3 = vcombine.low %v1425_v19, %v1434_v52  ;;  %v1450_v51 = vshrl.u32 %v8522_v44, 16  ;;  %v5878_v5 = vrot.slane %v2035_v33, 11  ;;  %v885_v45 = vld [vmem:[#allocation2 + $0xd0] sm:$0x8]  ;;  %10586 = vst [vmem:[#allocation26_spill] sm:$0xff] %v8571_v6 }
 0x1f9   : > { %v2045_v13 = vor.u32 %v10427_v61, %v2042_v43  ;;  %v2051_v34 = vrot.slane %v10426_v7, 7  ;;  %v10429_v47 = vshll.u32 %v8517_v9, 16  ;;  %v2047_v49 = vrot.slane %v2042_v43, 4 }
 0x1fa   : > { %4554 = vmatmul.mubr.bf16.gmra.mrb[104].mxu0 %v5941_v14  ;;  %4409 = vmatmul.mubr.bf16.gmra.mrb[48].mxu1 %v5911_v3  ;;  %v1443_v30 = vrot.slane %v1441_v31, 7  ;;  %v1452_v11 = vrot.slane %v1450_v51, 7  ;;  %v8548_v52 = vrot.slane %v1441_v31, 4  ;;  %v8550_v33 = vrot.slane %v1444_v60, 5 }
 0x1fb   : > { %v2054_v19 = vor.u32 %v10429_v47, %v2051_v34  ;;  %v5928_v14 = vcombine.low %v8520_v56, %v8522_v44  ;;  %v1676_v3 = vor.u32 %v8462_v23, %v8436_v58  ;;  %v10583_v43 = vshll.u32 %v8412_v12, 16  ;;  %v8568_v23 = vld [vmem:[#allocation2 + $0xd4] sm:$0xf] }
 0x1fc   : > { %v1684_v61 = vshll.u32 %v1512_v28, 16  ;;  %v2046_v34 = vsel %vm7704_vm8, %v5878_v5, %v2045_v13  ;;  %v778_v56 = vadd.f32 %v8261_v2, %v8455_v29  ;;  %v886_v58 = vsel %vm7683_vm3, 0, %v885_v45  ;;  %10585 = vst [vmem:[#allocation29_spill] sm:$0xff] %v8568_v23 }
 0x1fd   : > { %v1678_v7 = vrot.slane %v10583_v43, 5  ;;  %v2055_v31 = vsel %vm7704_vm8, %v2047_v49, %v2054_v19  ;;  %4416 = vmatprep.mubr.bf16.mxu1 %v5928_v14  ;;  %v1677_v28 = vrot.slane %v1676_v3, 4  ;;  %887 = vst [vmem:[#allocation2 + $0xd0] sm:$0x8] %v886_v58  ;;  %v8573_v5 = vrot.slane %v1450_v51, 4 }
 0x1fe   : > { %v5958_v12 = vcombine.low %v2046_v34, %v2055_v31  ;;  %v1686_v27 = vrot.slane %v1684_v61, 5  ;;  %v809_v13 = vmax.f32 %v777_v55, 0.0  ;;  %v810_v49 = vmax.f32 %v778_v56, 0.0  ;;  %v8575_v14 = vld [vmem:[#allocation2 + $0xe4] sm:$0xf] }
 0x1ff   : > { %v1681_v43 = vor.u32 %v8476_v17, %v1678_v7  ;;  %v1448_v19 = vrot.slane %v1443_v30, 4  ;;  %v1679_v2 = vsel %vm7721_vm11, %v1677_v28, %v1678_v7  ;;  %v10587_v45 = vshll.u32 %v8522_v44, 16  ;;  %v8582_v61 = vld [vmem:[#allocation2 + $0xe8] sm:$0xf]  ;;  %v888_v55 = vld [vmem:[#allocation2 + $0xe0] sm:$0x8] }
 0x200   : > { %4561 = vmatprep.mubr.bf16.mxu0 %v5958_v12  ;;  %v10430_v17 = vshrl.u32 %v8568_v23, 16  ;;  %v6193_v34 = vpack.c.bf16 %v809_v13, %v809_v13  ;;  %v6194_v51 = vpack.c.bf16 %v810_v49, %v810_v49  ;;  %v10431_v31 = vshrl.u32 %v8571_v6, 16  ;;  %v936_v49 = vld [vmem:[#allocation2 + $0xcc] sm:$0x1] }
 0x201   : > { %v1682_v29 = vrot.slane %v1681_v43, 4  ;;  %v1455_v3 = vor.u32 %v10587_v45, %v1452_v11  ;;  %v1463_v11 = vshrl.u32 %v8575_v14, 16  ;;  %v1466_v43 = vshll.u32 %v8575_v14, 16  ;;  %v8596_v45 = vpop.f32.mrb[0].mxu1 }
 0x202   : > { %v2064_v7 = vrot.slane %v10430_v17, 7  ;;  %1097 = vst [vmem:[#allocation2 + $0x104] sm:$0xf] %v6193_v34  ;;  %1098 = vst [vmem:[#allocation2 + $0x108] sm:$0xf] %v6194_v51  ;;  %v2073_v28 = vrot.slane %v10431_v31, 7 }
 0x203   : > { %v1687_v56 = vsel %vm7721_vm11, %v1682_v29, %v1686_v27  ;;  %v1472_v13 = vshrl.u32 %v8582_v61, 16  ;;  %v1446_v27 = vor.u32 %v1444_v60, %v1443_v30  ;;  %v1456_v29 = vsel %vm7704_vm8, %v1448_v19, %v1455_v3 }
 0x204   : > { %v5942_v12 = vcombine.low %v1679_v2, %v1687_v56  ;;  %v2069_v17 = vrot.slane %v2064_v7, 4  ;;  %v1465_v58 = vrot.slane %v1463_v11, 7  ;;  %v8600_v2 = vpop.f32.mrb[1].mxu1  ;;  %v1138_v34 = vld [vmem:[#allocation2 + $0xd0] sm:$0x8]  ;;  %v10588_v56 = vshll.u32 %v8568_v23, 16 }
 0x205   : > { %v1780_v51 = vld [vmem:[#allocation2 + $0xd0] sm:$0x8]  ;;  %v10589_v16 = vshll.u32 %v8571_v6, 16  ;;  %v1474_v37 = vrot.slane %v1472_v13, 7  ;;  %v1436_v30 = vshrl.u32 %v1138_v34, 16  ;;  %v8607_v19 = vrot.slane %v1463_v11, 4 }
 0x206   : > { %4562 = vmatmul.mubr.bf16.gmra.mrb[108].mxu0 %v5942_v12  ;;  %v2067_v31 = vor.u32 %v10588_v56, %v2064_v7  ;;  %v2057_v59 = vshrl.u32 %v1780_v51, 16  ;;  %v5929_v3 = vcombine.low %v8575_v14, %v8582_v61  ;;  %v8611_v20 = vpop.f32.mrb[2].mxu1  ;;  %v8613_v12 = vrot.slane %v1466_v43, 5  ;;  %v8623_v34 = vld [vmem:[#allocation2 + $0xe4] sm:$0xf] }
 0x207   : > { %v2076_v35 = vor.u32 %v10589_v16, %v2073_v28  ;;  %10590 = vst [vmem:[#allocation59_spill] sm:$0xff] %v8611_v20  ;;  %v937_v7 = vsel %vm7692_vm6, 0, %v936_v49  ;;  %v1690_v16 = vor.u32 %v8511_v42, %v8492_v22  ;;  %v10592_v28 = vshll.u32 %v8474_v0, 16  ;;  %10593 = vst [vmem:[#allocation60_spill] sm:$0xff] %v8623_v34 }
 0x208   : > { %v5864_v11 = vrot.slane %v1436_v30, 11  ;;  %v5879_v51 = vrot.slane %v2057_v59, 11  ;;  %938 = vst [vmem:[#allocation2 + $0xcc] sm:$0x1] %v937_v7  ;;  %v889_v60 = vsel %vm7683_vm3, 0, %v888_v55  ;;  %v8629_v15 = vrot.slane %v1472_v13, 4 }
 0x209   : > { %v8621_v56 = vrot.slane %v10592_v28, 5  ;;  %v2077_v14 = vsel %vm7704_vm8, %v2069_v17, %v2076_v35  ;;  %v8631_v49 = vrot.slane %v1690_v16, 4  ;;  %890 = vst [vmem:[#allocation2 + $0xe0] sm:$0x8] %v889_v60  ;;  %v10594_v22 = vshll.u32 %v8582_v61, 16  ;;  %v8651_v28 = vpop.f32.mrb[3].mxu1 }
 0x20a   : > { %v8637_v30 = vld [vmem:[#allocation2 + $0xe8] sm:$0xf]  ;;  %v1447_v59 = vsel %vm7704_vm8, %v5864_v11, %v1446_v27  ;;  %v2068_v35 = vsel %vm7704_vm8, %v5879_v51, %v2067_v31  ;;  %v8643_v17 = vor.u32 %v1466_v43, %v1465_v58  ;;  %v10432_v55 = vshrl.u32 %v8623_v34, 16  ;;  %v8646_v13 = vld [vmem:[#allocation2 + $0xf4] sm:$0xf]  ;;  %10596 = vst [vmem:[#allocation62_spill] sm:$0xff] %v8651_v28 }
 0x20b   : > { %v1695_v0 = vor.u32 %v8535_v24, %v8621_v56  ;;  %v1477_v42 = vor.u32 %v10594_v22, %v1474_v37  ;;  %10595 = vst [vmem:[#allocation61_spill] sm:$0xff] %v8637_v30  ;;  %v8648_v7 = vld [vmem:[#allocation2 + $0xf8] sm:$0xf]  ;;  %v5912_v24 = vcombine.low %v1447_v59, %v1456_v29  ;;  %v5959_v60 = vcombine.low %v2068_v35, %v2077_v14  ;;  %v939_v22 = vld [vmem:[#allocation2 + $0xdc] sm:$0x1] }
 0x20c   : > { %v1470_v16 = vrot.slane %v1465_v58, 4  ;;  %v10433_v37 = vshll.u32 %v8623_v34, 16  ;;  %v1693_v31 = vsel %vm7721_vm11, %v8631_v49, %v8621_v56  ;;  %v2086_v27 = vrot.slane %v10432_v55, 7  ;;  %v891_v35 = vld [vmem:[#allocation2 + $0xf0] sm:$0x8] }
 0x20d   : > { %v1696_v43 = vrot.slane %v1695_v0, 4  ;;  %v10436_v11 = vshrl.u32 %v8637_v30, 16  ;;  %4417 = vmatmul.mubr.bf16.gmra.mrb[52].mxu1 %v5912_v24  ;;  %4569 = vmatprep.mubr.bf16.mxu0 %v5959_v60  ;;  %v1485_v51 = vshrl.u32 %v8646_v13, 16  ;;  %v1494_v14 = vshrl.u32 %v8648_v7, 16 }
 0x20e   : > { %v1478_v58 = vsel %vm7704_vm8, %v1470_v16, %v1477_v42  ;;  %4424 = vmatprep.mubr.bf16.mxu1 %v5929_v3  ;;  %v2089_v56 = vor.u32 %v10433_v37, %v2086_v27  ;;  %v1488_v0 = vshll.u32 %v8646_v13, 16  ;;  %v2091_v24 = vrot.slane %v2086_v27, 4 }
 0x20f   : > { %v2095_v49 = vrot.slane %v10436_v11, 7  ;;  %v1513_v42 = vld [vmem:[#allocation2 + $0xcc] sm:$0x1]  ;;  %v1487_v60 = vrot.slane %v1485_v51, 7  ;;  %v1496_v16 = vrot.slane %v1494_v14, 7  ;;  %v5930_v55 = vcombine.low %v8646_v13, %v8648_v7 }
 0x210   : > { %v1698_v29 = vshll.u32 %v1513_v42, 16  ;;  %v1141_v3 = vld [vmem:[#allocation2 + $0xe0] sm:$0x8]  ;;  %v10597_v37 = vshll.u32 %v8637_v30, 16  ;;  %v8675_v28 = vrot.slane %v1485_v51, 4  ;;  %v1704_v11 = vor.u32 %v8550_v33, %v8548_v52 }
 0x211   : > { %v1783_v40 = vld [vmem:[#allocation2 + $0xe0] sm:$0x8]  ;;  %v1458_v59 = vshrl.u32 %v1141_v3, 16  ;;  %v940_v27 = vsel %vm7692_vm6, 0, %v939_v22  ;;  %v10598_v6 = vshll.u32 %v8522_v44, 16  ;;  %v8685_v42 = vrot.slane %v1488_v0, 5 }
 0x212   : > { %v2098_v34 = vor.u32 %v10597_v37, %v2095_v49  ;;  %v2079_v20 = vshrl.u32 %v1783_v40, 16  ;;  %v1700_v13 = vrot.slane %v1698_v29, 5  ;;  %941 = vst [vmem:[#allocation2 + $0xdc] sm:$0x1] %v940_v27  ;;  %v8687_v30 = vrot.slane %v1704_v11, 4  ;;  %v10601_v27 = vld [vmem:[#allocation24_spill] sm:$0xff] }
 0x213   : > { %v8683_v23 = vrot.slane %v10598_v6, 5  ;;  %v892_v37 = vsel %vm7683_vm3, 0, %v891_v35  ;;  %v5865_v51 = vrot.slane %v1458_v59, 11  ;;  %v8693_v33 = vrot.slane %v1494_v14, 4  ;;  %v8695_v44 = vld [vmem:[#allocation2 + $0xf4] sm:$0xf] }
 0x214   : > { %v5880_v52 = vrot.slane %v2079_v20, 11  ;;  %v2099_v40 = vsel %vm7704_vm8, %v2091_v24, %v2098_v34  ;;  %893 = vst [vmem:[#allocation2 + $0xf0] sm:$0x8] %v892_v37  ;;  %v1701_v6 = vsel %vm7721_vm11, %v1696_v43, %v1700_v13  ;;  %v1490_v20 = vor.u32 %v1488_v0, %v1487_v60  ;;  %v8705_v22 = vld [vmem:[#allocation2 + $0xf8] sm:$0xf] }
 0x215   : > { %v1707_v11 = vsel %vm7721_vm11, %v8687_v30, %v8683_v23  ;;  %v1709_v29 = vor.u32 %v8573_v5, %v8683_v23  ;;  %v942_v34 = vld [vmem:[#allocation2 + $0xec] sm:$0x1]  ;;  %v5943_v14 = vcombine.low %v1693_v31, %v1701_v6  ;;  %v1469_v49 = vsel %vm7704_vm8, %v5865_v51, %v8643_v17 }
 0x216   : > { %v2090_v43 = vsel %vm7704_vm8, %v5880_v52, %v2089_v56  ;;  %v1492_v59 = vrot.slane %v1487_v60, 4  ;;  %v5913_v35 = vcombine.low %v1469_v49, %v1478_v58  ;;  %v10599_v30 = vshll.u32 %v8648_v7, 16 }
 0x217   : > { %v5960_v24 = vcombine.low %v2090_v43, %v2099_v40  ;;  %v10451_v23 = vshrl.u32 %v8695_v44, 16  ;;  %4570 = vmatmul.mubr.bf16.gmra.mrb[112].mxu0 %v5943_v14  ;;  %v10444_v5 = vshll.u32 %v8695_v44, 16  ;;  %v10443_v31 = vshrl.u32 %v8705_v22, 16 }
 0x218   : > { %v1499_v3 = vor.u32 %v10599_v30, %v1496_v16  ;;  %v10445_v0 = vshll.u32 %v8705_v22, 16  ;;  %v943_v17 = vsel %vm7692_vm6, 0, %v942_v34  ;;  %4425 = vmatmul.mubr.bf16.gmra.mrb[56].mxu1 %v5913_v35  ;;  %v1718_v56 = vor.u32 %v8613_v12, %v8607_v19  ;;  %v10604_v34 = vld [vmem:[#allocation28_spill] sm:$0xff] }
 0x219   : > { %4577 = vmatprep.mubr.bf16.mxu0 %v5960_v24  ;;  %v2108_v58 = vrot.slane %v10451_v23, 7  ;;  %944 = vst [vmem:[#allocation2 + $0xec] sm:$0x1] %v943_v17  ;;  %v10600_v60 = vshll.u32 %v8582_v61, 16  ;;  %v10602_v13 = vshrl.u32 %v10601_v27, 16  ;;  %4432 = vmatprep.mubr.bf16.mxu1 %v5930_v55  ;;  %v2117_v52 = vrot.slane %v10443_v31, 7 }
 0x21a   : > { %v1514_v51 = vld [vmem:[#allocation2 + $0xdc] sm:$0x1]  ;;  %v10603_v40 = vshll.u32 %v10601_v27, 16  ;;  %v10605_v14 = vshll.u32 %v10604_v34, 16  ;;  %v10606_v19 = vshrl.u32 %v10604_v34, 16  ;;  %v1710_v61 = vrot.slane %v1709_v29, 4 }
 0x21b   : > { %v8726_v16 = vrot.slane %v10600_v60, 5  ;;  %v2160_v37 = vrot.slane %v10602_v13, 4  ;;  %v1712_v43 = vshll.u32 %v1514_v51, 16  ;;  %v1144_v35 = vld [vmem:[#allocation2 + $0xf0] sm:$0x8]  ;;  %v1500_v24 = vsel %vm7704_vm8, %v1492_v59, %v1499_v3 }
 0x21c   : > { %v2161_v6 = vrot.slane %v10603_v40, 5  ;;  %v2164_v49 = vrot.slane %v10605_v14, 5  ;;  %v2166_v12 = vrot.slane %v10606_v19, 4  ;;  %v1786_v55 = vld [vmem:[#allocation2 + $0xf0] sm:$0x8]  ;;  %v2111_v30 = vor.u32 %v10444_v5, %v2108_v58 }
 0x21d   : > { %v1480_v17 = vshrl.u32 %v1144_v35, 16  ;;  %v2101_v60 = vshrl.u32 %v1786_v55, 16  ;;  %v2113_v27 = vrot.slane %v2108_v58, 4  ;;  %v2120_v13 = vor.u32 %v10445_v0, %v2117_v52  ;;  %v2144_v40 = vld [vmem:[#allocation2 + $0x1c] sm:$0x1] }
 0x21e   : > { %v1714_v14 = vrot.slane %v1712_v43, 5  ;;  %v1723_v29 = vor.u32 %v8629_v15, %v8726_v16  ;;  %v2162_v51 = vor.u32 %v2161_v6, %v2160_v37  ;;  %v2167_v34 = vor.u32 %v2166_v12, %v2164_v49  ;;  %v894_v19 = vld [vmem:[#allocation2 + $0x100] sm:$0x8]  ;;  %v8748_v35 = vld [vmem:[#allocation2 + $0x104] sm:$0xf] }
 0x21f   : > { %v5866_v31 = vrot.slane %v1480_v17, 11  ;;  %v5881_v59 = vrot.slane %v2101_v60, 11  ;;  %v2121_v3 = vsel %vm7704_vm8, %v2113_v27, %v2120_v13  ;;  %v1719_v5 = vrot.slane %v1718_v56, 4  ;;  %v8752_v0 = vld [vmem:[#allocation2 + $0x108] sm:$0xf] }
 0x220   : > { %v1715_v58 = vsel %vm7721_vm11, %v1710_v61, %v1714_v14  ;;  %v2163_v52 = vrot.slane %v2162_v51, 4  ;;  %v2168_v55 = vrot.slane %v2167_v34, 4  ;;  %v2170_v43 = vshll.u32 %v2144_v40, 16  ;;  %v1515_v12 = vld [vmem:[#allocation2 + $0xec] sm:$0x1] }
 0x221   : > { %v5944_v15 = vcombine.low %v1707_v11, %v1715_v58  ;;  %v1491_v37 = vsel %vm7704_vm8, %v5866_v31, %v1490_v20  ;;  %v2112_v6 = vsel %vm7704_vm8, %v5881_v59, %v2111_v30  ;;  %v895_v56 = vsel %vm7683_vm3, 0, %v894_v19  ;;  %v945_v17 = vld [vmem:[#allocation2 + $0xfc] sm:$0x1]  ;;  %v2145_v58 = vld [vmem:[#allocation2 + $0x2c] sm:$0x1] }
 0x222   : > { %v5914_v60 = vcombine.low %v1491_v37, %v1500_v24  ;;  %v5961_v27 = vcombine.low %v2112_v6, %v2121_v3  ;;  %v1724_v61 = vrot.slane %v1723_v29, 4  ;;  %v1726_v13 = vshll.u32 %v1515_v12, 16  ;;  %896 = vst [vmem:[#allocation2 + $0x100] sm:$0x8] %v895_v56 }
 0x223   : > { %4578 = vmatmul.mubr.bf16.gmra.mrb[116].mxu0 %v5944_v15  ;;  %v1721_v11 = vsel %vm7721_vm11, %v1719_v5, %v8726_v16  ;;  %v2172_v40 = vrot.slane %v2170_v43, 5  ;;  %v10450_v20 = vshrl.u32 %v8748_v35, 16  ;;  %v10446_v31 = vshrl.u32 %v8752_v0, 16  ;;  %v8786_v15 = vld [vmem:[#allocation2 + $0x24] sm:$0xf] }
 0x224   : > { %4433 = vmatmul.mubr.bf16.gmra.mrb[60].mxu1 %v5914_v60  ;;  %4585 = vmatprep.mubr.bf16.mxu0 %v5961_v27  ;;  %v1728_v30 = vrot.slane %v1726_v13, 5  ;;  %v2165_v24 = vsel %vm7721_vm11, %v2163_v52, %v2164_v49  ;;  %v10448_v14 = vshll.u32 %v8752_v0, 16  ;;  %v946_v29 = vsel %vm7692_vm6, 0, %v945_v17  ;;  %v10608_v52 = vld [vmem:[#allocation32_spill] sm:$0xff]  ;;  %v10611_v17 = vld [vmem:[#allocation33_spill] sm:$0xff] }
 0x225   : > { %v2173_v51 = vsel %vm7721_vm11, %v2168_v55, %v2172_v40  ;;  %v2130_v5 = vrot.slane %v10450_v20, 7  ;;  %v2139_v16 = vrot.slane %v10446_v31, 7  ;;  %947 = vst [vmem:[#allocation2 + $0xfc] sm:$0x1] %v946_v29  ;;  %v1732_v34 = vor.u32 %v8685_v42, %v8675_v28  ;;  %v8834_v31 = vld [vmem:[#allocation2 + $0x34] sm:$0xf] }
 0x226   : > { %v1729_v49 = vsel %vm7721_vm11, %v1724_v61, %v1728_v30  ;;  %v5979_v19 = vcombine.low %v2165_v24, %v2173_v51  ;;  %v10607_v59 = vshll.u32 %v8648_v7, 16  ;;  %v10609_v55 = vshrl.u32 %v10608_v52, 16  ;;  %v8795_v61 = vld [vmem:[#allocation2 + $0x28] sm:$0xf]  ;;  %v2388_v20 = vld [vmem:[#allocation2 + $0x30] sm:$0x8] }
 0x227   : > { %v5945_v37 = vcombine.low %v1721_v11, %v1729_v49  ;;  %v10449_v6 = vshll.u32 %v8748_v35, 16  ;;  %v2142_v28 = vor.u32 %v10448_v14, %v2139_v16  ;;  %v2135_v42 = vrot.slane %v2130_v5, 4  ;;  %10613 = vst [vmem:[#allocation24_spill] sm:$0xff] %v8795_v61  ;;  %v7148_v49 = vld [vmem:[#allocation2 + $0x18] sm:$0xf] }
 0x228   : > { %v8782_v3 = vrot.slane %v10607_v59, 5  ;;  %v2174_v43 = vrot.slane %v10609_v55, 4  ;;  %4634 = vmatprep.mubr.bf16.mxu1 %v5979_v19  ;;  %v1733_v12 = vrot.slane %v1732_v34, 4  ;;  %v10610_v56 = vshll.u32 %v10608_v52, 16  ;;  %v7147_v34 = vld [vmem:[#allocation2 + $0x14] sm:$0xf] }
 0x229   : > { %v10612_v60 = vshll.u32 %v10611_v17, 16  ;;  %v1789_v13 = vld [vmem:[#allocation2 + $0x100] sm:$0x8]  ;;  %v10614_v40 = vshrl.u32 %v10611_v17, 16  ;;  %v2184_v24 = vshll.u32 %v2145_v58, 16  ;;  %v10454_v29 = vshrl.u32 %v8786_v15, 16 }
 0x22a   : > { %v2175_v7 = vrot.slane %v10610_v56, 5  ;;  %v1737_v11 = vor.u32 %v8693_v33, %v8782_v3  ;;  %v2123_v51 = vshrl.u32 %v1789_v13, 16  ;;  %v2133_v16 = vor.u32 %v10449_v6, %v2130_v5  ;;  %v8804_v52 = vld [vmem:[#allocation9 + $0x208] sm:$0xff]  }
 0x22b   : > { %v2178_v27 = vrot.slane %v10612_v60, 5  ;;  %v2180_v30 = vrot.slane %v10614_v40, 4  ;;  %v5963_v19 = vcombine.low %v7147_v34, %v7148_v49  ;;  %4586 = vmatmul.mubr.bf16.gmra.mrb[120].mxu0 %v5945_v37  ;;  %v2143_v33 = vsel %vm7704_vm8, %v2135_v42, %v2142_v28  ;;  %v8814_v34 = vld [vmem:[#allocation9 + $0x200] sm:$0xff]  }
 0x22c   : > { %v2176_v59 = vor.u32 %v2175_v7, %v2174_v43  ;;  %v2186_v56 = vrot.slane %v2184_v24, 5  ;;  %v5882_v17 = vrot.slane %v2123_v51, 11  ;;  %v1516_v58 = vld [vmem:[#allocation2 + $0xfc] sm:$0x1]  ;;  %v2441_v13 = vrot.slane %v10454_v29, 7 }
 0x22d   : > { %v2181_v55 = vor.u32 %v2180_v30, %v2178_v27  ;;  %4635 = vmatmul.mubr.bf16.vlgmr.msra.gmra.mrb[64].mxu1 %v5963_v19  ;;  %v10452_v5 = vshrl.u32 %v8795_v61, 16  ;;  %v1735_v43 = vsel %vm7721_vm11, %v1733_v12, %v8782_v3  ;;  %v1738_v7 = vrot.slane %v1737_v11, 4  ;;  %v8824_v3 = vld [vmem:[#allocation9 + $0x210] sm:$0xff]  }
 0x22e   : > { %v2177_v60 = vrot.slane %v2176_v59, 4  ;;  %v1740_v37 = vshll.u32 %v1516_v58, 16  ;;  %6923 = vmatpush3.bf16.msra.mxu1 %v8814_v34  ;;  %v2134_v28 = vsel %vm7704_vm8, %v5882_v17, %v2133_v16  ;;  %v10453_v42 = vshll.u32 %v8786_v15, 16  ;;  %v2146_v16 = vld [vmem:[#allocation2 + $0x3c] sm:$0x1] }
 0x22f   : > { %v2182_v40 = vrot.slane %v2181_v55, 4  ;;  %v2450_v30 = vrot.slane %v10452_v5, 7  ;;  %v10447_v24 = vshll.u32 %v8795_v61, 16  ;;  %6916 = vmatprep.subr.bf16.mxu1 %v8804_v52  ;;  %v5962_v12 = vcombine.low %v2134_v28, %v2143_v33  ;;  %v2385_v58 = vld [vmem:[#allocation2 + $0x20] sm:$0x8] }
 0x230   : > { %v1742_v11 = vrot.slane %v1740_v37, 5  ;;  %v2179_v51 = vsel %vm7721_vm11, %v2177_v60, %v2178_v27  ;;  %v2444_v59 = vor.u32 %v10453_v42, %v2441_v13  ;;  %v2446_v55 = vrot.slane %v2441_v13, 4  ;;  %v7150_v27 = vld [vmem:[#allocation2 + $0x24] sm:$0xf]  ;;  %v7151_v60 = vld [vmem:[#allocation2 + $0x28] sm:$0xf] }
 0x231   : > { %v2187_v49 = vsel %vm7721_vm11, %v2182_v40, %v2186_v56  ;;  %v2453_v17 = vor.u32 %v10447_v24, %v2450_v30  ;;  %4593 = vmatprep.mubr.bf16.mxu0 %v5962_v12  ;;  %v5964_v37 = vcombine.low %v7150_v27, %v7151_v60  ;;  %v10615_v56 = vld [vmem:[#allocation36_spill] sm:$0xff]  ;;  %v8842_v13 = vld [vmem:[#allocation2 + $0x38] sm:$0xf]  ;;  %v10618_v12 = vshll.u32 %v7969_v48, 16  ;;  %v8850_v27 = vld [vmem:[#allocation9 + $0x218] sm:$0xff]  }
 0x232   : > { %v5980_v19 = vcombine.low %v2179_v51, %v2187_v49  ;;  %v1743_v33 = vsel %vm7721_vm11, %v1738_v7, %v1742_v11  ;;  %v10616_v40 = vshrl.u32 %v10615_v56, 16  ;;  %v10617_v51 = vshll.u32 %v10615_v56, 16  ;;  %6924 = vmatpush3.bf16.msra.mxu1 %v8804_v52 }
 0x233   : > { %v5946_v30 = vcombine.low %v1735_v43, %v1743_v33  ;;  %v2192_v24 = vrot.slane %v10618_v12, 5  ;;  %v10619_v7 = vshrl.u32 %v7969_v48, 16  ;;  %v2198_v14 = vshll.u32 %v2146_v16, 16  ;;  %6917 = vmatprep.subr.bf16.mxu1 %v8824_v3 }
 0x234   : > { %v2188_v28 = vrot.slane %v10616_v40, 4  ;;  %v2189_v49 = vrot.slane %v10617_v51, 5  ;;  %4642 = vmatprep.mubr.bf16.mxu1 %v5980_v19  ;;  %v6011_v60 = vcombine.low %v8786_v15, %v8795_v61  ;;  %v2434_v40 = vshrl.u32 %v2385_v58, 16 }
 0x235   : > { %v2194_v11 = vrot.slane %v10619_v7, 4  ;;  %v2461_v51 = vshrl.u32 %v8834_v31, 16  ;;  %4594 = vmatmul.mubr.bf16.gmra.mrb[124].mxu0 %v5946_v30  ;;  %4643 = vmatmul.mubr.bf16.gmra.mrb[68].mxu1 %v5964_v37  ;;  %v2200_v19 = vrot.slane %v2198_v14, 5  ;;  %v2464_v33 = vshll.u32 %v8834_v31, 16  ;;  %v8866_v14 = vld [vmem:[#allocation9 + $0x220] sm:$0xff]  }
 0x236   : > { %v2190_v56 = vor.u32 %v2189_v49, %v2188_v28  ;;  %v2470_v48 = vshrl.u32 %v8842_v13, 16  ;;  %4795 = vmatprep.mubr.bf16.mxu0 %v6011_v60  ;;  %v5883_v12 = vrot.slane %v2434_v40, 11  ;;  %v2473_v7 = vshll.u32 %v8842_v13, 16  ;;  %6925 = vmatpush3.bf16.msra.mxu1 %v8824_v3 }
 0x237   : > { %v2195_v43 = vor.u32 %v2194_v11, %v2192_v24  ;;  %v2454_v58 = vsel %vm7704_vm8, %v2446_v55, %v2453_v17  ;;  %v8861_v28 = vrot.slane %v2461_v51, 4  ;;  %v8863_v37 = vrot.slane %v2464_v33, 5  ;;  %6918 = vmatprep.subr.bf16.mxu1 %v8850_v27 }
 0x238   : > { %v2191_v16 = vrot.slane %v2190_v56, 4  ;;  %v2463_v49 = vrot.slane %v2461_v51, 7  ;;  %v2472_v30 = vrot.slane %v2470_v48, 7  ;;  %v8868_v11 = vrot.slane %v2473_v7, 5 }
 0x239   : > { %v2196_v6 = vrot.slane %v2195_v43, 4  ;;  %v8870_v60 = vrot.slane %v2470_v48, 4  ;;  %v2445_v17 = vsel %vm7704_vm8, %v5883_v12, %v2444_v59  ;;  %v2147_v43 = vld [vmem:[#allocation2 + $0x4c] sm:$0x1]  ;;  %v10621_v5 = vshrl.u32 %v8022_v32, 16 }
 0x23a   : > { %10620 = vst [vmem:[#allocation28_spill] sm:$0xff] %v8868_v11  ;;  %v2193_v56 = vsel %vm7721_vm11, %v2191_v16, %v2192_v24  ;;  %v5995_v23 = vcombine.low %v2445_v17, %v2454_v58  ;;  %6926 = vmatpush3.bf16.msra.mxu1 %v8850_v27  ;;  %v7152_v24 = vld [vmem:[#allocation2 + $0x34] sm:$0xf]  ;;  %v10622_v59 = vshll.u32 %v8022_v32, 16  ;;  %v10623_v12 = vshll.u32 %v8028_v8, 16  ;;  %v8898_v32 = vld [vmem:[#allocation9 + $0x228] sm:$0xff]  }
 0x23b   : > { %v2201_v55 = vsel %vm7721_vm11, %v2196_v6, %v2200_v19  ;;  %v2202_v42 = vrot.slane %v10621_v5, 4  ;;  %v7153_v6 = vld [vmem:[#allocation2 + $0x38] sm:$0xf]  ;;  %6919 = vmatprep.subr.bf16.mxu1 %v8866_v14  ;;  %v6012_v5 = vcombine.low %v8834_v31, %v8842_v13  ;;  %v2212_v17 = vshll.u32 %v2147_v43, 16 }
 0x23c   : > { %v5981_v51 = vcombine.low %v2193_v56, %v2201_v55  ;;  %v5965_v19 = vcombine.low %v7152_v24, %v7153_v6  ;;  %v2203_v16 = vrot.slane %v10622_v59, 5  ;;  %v2206_v40 = vrot.slane %v10623_v12, 5  ;;  %v8891_v55 = vld [vmem:[#allocation2 + $0x44] sm:$0xf]  ;;  %v8896_v6 = vld [vmem:[#allocation2 + $0x48] sm:$0xf] }
 0x23d   : > { %v10624_v56 = vshrl.u32 %v8028_v8, 16  ;;  %v2456_v48 = vshrl.u32 %v2388_v20, 16  ;;  %v2466_v24 = vor.u32 %v2464_v33, %v2463_v49  ;;  %10625 = vst [vmem:[#allocation32_spill] sm:$0xff] %v8896_v6  ;;  %4796 = vmatmul.mubr.bf16.vlgmr.msra.gmra.mrb[128].mxu0 %v5995_v23  ;;  %v2468_v12 = vrot.slane %v2463_v49, 4 }
 0x23e   : > { %4650 = vmatprep.mubr.bf16.mxu1 %v5981_v51  ;;  %v2204_v59 = vor.u32 %v2203_v16, %v2202_v42  ;;  %6820 = vmatpush3.bf16.msra.mxu0 %v8814_v34  ;;  %v2214_v51 = vrot.slane %v2212_v17, 5  ;;  %v10458_v31 = vshrl.u32 %v8891_v55, 16  ;;  %v10455_v43 = vshrl.u32 %v8896_v6, 16  ;;  %v2391_v17 = vld [vmem:[#allocation2 + $0x40] sm:$0x8] }
 0x23f   : > { %v2208_v58 = vrot.slane %v10624_v56, 4  ;;  %4651 = vmatmul.mubr.bf16.gmra.mrb[72].mxu1 %v5965_v19  ;;  %v2475_v56 = vor.u32 %v2473_v7, %v2472_v30  ;;  %4803 = vmatprep.mubr.bf16.mxu0 %v6012_v5  ;;  %v5884_v29 = vrot.slane %v2456_v48, 11  ;;  %v10626_v23 = vshrl.u32 %v8786_v15, 16  ;;  %v8919_v48 = vld [vmem:[#allocation9 + $0x230] sm:$0xff]   ;;  %v2148_v5 = vld [vmem:[#allocation2 + $0x5c] sm:$0x1] }
 0x240   : > { %v2205_v13 = vrot.slane %v2204_v59, 4  ;;  %6821 = vmatprep.subr.bf16.mxu0 %v8804_v52  ;;  %6927 = vmatpush3.bf16.msra.mxu1 %v8866_v14  ;;  %v10628_v34 = vshll.u32 %v8786_v15, 16  ;;  %v2485_v49 = vrot.slane %v10458_v31, 7  ;;  %v10456_v30 = vshll.u32 %v8891_v55, 16 }
 0x241   : > { %v2209_v8 = vor.u32 %v2208_v58, %v2206_v40  ;;  %v2476_v33 = vsel %vm7704_vm8, %v2468_v12, %v2475_v56  ;;  %v8909_v42 = vrot.slane %v10626_v23, 4  ;;  %6920 = vmatprep.subr.bf16.mxu1 %v8898_v32  ;;  %v2467_v15 = vsel %vm7704_vm8, %v5884_v29, %v2466_v24 }
 0x242   : > { %v8913_v7 = vrot.slane %v10628_v34, 5  ;;  %v2207_v19 = vsel %vm7721_vm11, %v2205_v13, %v2206_v40  ;;  %v2494_v58 = vrot.slane %v10455_v43, 7  ;;  %v10457_v12 = vshll.u32 %v8896_v6, 16  ;;  %6822 = vmatpush3.bf16.msra.mxu0 %v8804_v52  ;;  %v8933_v40 = vld [vmem:[#allocation2 + $0x54] sm:$0xf] }
 0x243   : > { %v2210_v20 = vrot.slane %v2209_v8, 4  ;;  %10627 = vst [vmem:[#allocation33_spill] sm:$0xff] %v8909_v42  ;;  %v5996_v8 = vcombine.low %v2467_v15, %v2476_v33  ;;  %v6013_v56 = vcombine.low %v8891_v55, %v8896_v6  ;;  %v7155_v13 = vld [vmem:[#allocation2 + $0x48] sm:$0xf]  ;;  %v10630_v29 = vshrl.u32 %v8088_v18, 16  ;;  %6823 = vmatprep.subr.bf16.mxu0 %v8824_v3 }
 0x244   : > { %10629 = vst [vmem:[#allocation36_spill] sm:$0xff] %v8913_v7  ;;  %v10631_v23 = vshll.u32 %v8088_v18, 16  ;;  %v10632_v33 = vshll.u32 %v8091_v57, 16  ;;  %6928 = vmatpush3.bf16.msra.mxu1 %v8898_v32  ;;  %v10633_v52 = vshrl.u32 %v8091_v57, 16  ;;  %v2226_v15 = vshll.u32 %v2148_v5, 16  ;;  %v8950_v18 = vld [vmem:[#allocation9 + $0x238] sm:$0xff]  }
 0x245   : > { %v2215_v16 = vsel %vm7721_vm11, %v2210_v20, %v2214_v51  ;;  %v7154_v51 = vld [vmem:[#allocation2 + $0x44] sm:$0xf]  ;;  %v2216_v24 = vrot.slane %v10630_v29, 4  ;;  %v2478_v43 = vshrl.u32 %v2391_v17, 16  ;;  %6921 = vmatprep.subr.bf16.mxu1 %v8919_v48  ;;  %4804 = vmatmul.mubr.bf16.gmra.mrb[132].mxu0 %v5996_v8  ;;  %v2505_v57 = vshrl.u32 %v8933_v40, 16 }
 0x246   : > { %v5982_v59 = vcombine.low %v2207_v19, %v2215_v16  ;;  %v5966_v20 = vcombine.low %v7154_v51, %v7155_v13  ;;  %v2217_v34 = vrot.slane %v10631_v23, 5  ;;  %v2220_v19 = vrot.slane %v10632_v33, 5  ;;  %v8947_v13 = vld [vmem:[#allocation2 + $0x58] sm:$0xf]  ;;  %4811 = vmatprep.mubr.bf16.mxu0 %v6013_v56  ;;  %6824 = vmatpush3.bf16.msra.mxu0 %v8824_v3  ;;  %v9001_v7 = vld [vmem:[#allocation2 + $0x68] sm:$0xf] }
 0x247   : > { %v2222_v16 = vrot.slane %v10633_v52, 4  ;;  %v2488_v51 = vor.u32 %v10456_v30, %v2485_v49  ;;  %v2490_v23 = vrot.slane %v2485_v49, 4  ;;  %v2228_v17 = vrot.slane %v2226_v15, 5  ;;  %6825 = vmatprep.subr.bf16.mxu0 %v8850_v27  ;;  %10641 = vst [vmem:[#allocation65_spill] sm:$0xff] %v9001_v7  ;;  %v9214_v42 = vld [vmem:[#allocation2 + $0xa4] sm:$0xf] }
 0x248   : > { %4658 = vmatprep.mubr.bf16.mxu1 %v5982_v59  ;;  %v2218_v29 = vor.u32 %v2217_v34, %v2216_v24  ;;  %v2497_v59 = vor.u32 %v10457_v12, %v2494_v58  ;;  %v5885_v33 = vrot.slane %v2478_v43, 11  ;;  %v2508_v52 = vshll.u32 %v8933_v40, 16  ;;  %6929 = vmatpush3.bf16.msra.mxu1 %v8919_v48 }
 0x249   : > { %4659 = vmatmul.mubr.bf16.gmra.mrb[76].mxu1 %v5966_v20  ;;  %v2223_v5 = vor.u32 %v2222_v16, %v2220_v19  ;;  %v2507_v20 = vrot.slane %v2505_v57, 7  ;;  %v2514_v49 = vshrl.u32 %v8947_v13, 16  ;;  %v2517_v43 = vshll.u32 %v8947_v13, 16  ;;  %6922 = vmatprep.subr.bf16.mxu1 %v8950_v18 }
 0x24a   : > { %v2219_v30 = vrot.slane %v2218_v29, 4  ;;  %v2498_v8 = vsel %vm7704_vm8, %v2490_v23, %v2497_v59  ;;  %v2489_v56 = vsel %vm7704_vm8, %v5885_v33, %v2488_v51  ;;  %v8965_v24 = vrot.slane %v2505_v57, 4  ;;  %v2149_v57 = vld [vmem:[#allocation2 + $0x6c] sm:$0x1]  ;;  %6826 = vmatpush3.bf16.msra.mxu0 %v8850_v27 }
 0x24b   : > { %v2224_v58 = vrot.slane %v2223_v5, 4  ;;  %v5997_v34 = vcombine.low %v2489_v56, %v2498_v8  ;;  %v2516_v16 = vrot.slane %v2514_v49, 7  ;;  %v8970_v15 = vrot.slane %v2508_v52, 5  ;;  %v2394_v5 = vld [vmem:[#allocation2 + $0x50] sm:$0x8]  ;;  %6827 = vmatprep.subr.bf16.mxu0 %v8866_v14 }
 0x24c   : > { %v2221_v3 = vsel %vm7721_vm11, %v2219_v30, %v2220_v19  ;;  %v8974_v23 = vrot.slane %v2517_v43, 5  ;;  %v8976_v59 = vrot.slane %v2514_v49, 4  ;;  %v6014_v51 = vcombine.low %v8933_v40, %v8947_v13  ;;  %v7156_v19 = vld [vmem:[#allocation2 + $0x54] sm:$0xf]  ;;  %v7157_v8 = vld [vmem:[#allocation2 + $0x58] sm:$0xf]  ;;  %6930 = vmatpush3.bf16.msra.mxu1 %v8950_v18 }
 0x24d   : > { %v2229_v29 = vsel %vm7721_vm11, %v2224_v58, %v2228_v17  ;;  %v5967_v56 = vcombine.low %v7156_v19, %v7157_v8  ;;  %v10635_v17 = vshrl.u32 %v8144_v53, 16  ;;  %v10636_v13 = vshll.u32 %v8144_v53, 16  ;;  %v8995_v19 = vld [vmem:[#allocation2 + $0x64] sm:$0xf]  ;;  %4812 = vmatmul.mubr.bf16.gmra.mrb[136].mxu0 %v5997_v34 }
 0x24e   : > { %10634 = vst [vmem:[#allocation63_spill] sm:$0xff] %v8974_v23  ;;  %v5983_v33 = vcombine.low %v2221_v3, %v2229_v29  ;;  %v10637_v49 = vshll.u32 %v8149_v10, 16  ;;  %v10638_v29 = vshrl.u32 %v8149_v10, 16  ;;  %v10639_v8 = vshrl.u32 %v8795_v61, 16  ;;  %4819 = vmatprep.mubr.bf16.mxu0 %v6014_v51  ;;  %6828 = vmatpush3.bf16.msra.mxu0 %v8866_v14 }
 0x24f   : > { %v2230_v58 = vrot.slane %v10635_v17, 4  ;;  %v2231_v27 = vrot.slane %v10636_v13, 5  ;;  %v2240_v30 = vshll.u32 %v2149_v57, 16  ;;  %v2500_v31 = vshrl.u32 %v2394_v5, 16  ;;  %6829 = vmatprep.subr.bf16.mxu0 %v8898_v32 }
 0x250   : > { %v2234_v3 = vrot.slane %v10637_v49, 5  ;;  %v2236_v12 = vrot.slane %v10638_v29, 4  ;;  %v8999_v17 = vrot.slane %v10639_v8, 4  ;;  %4666 = vmatprep.mubr.bf16.mxu1 %v5983_v33  ;;  %v2510_v40 = vor.u32 %v2508_v52, %v2507_v20 }
 0x251   : > { %v10642_v53 = vor.u32 %v8863_v37, %v8861_v28  ;;  %4667 = vmatmul.mubr.bf16.gmra.mrb[80].mxu1 %v5967_v56  ;;  %v2232_v10 = vor.u32 %v2231_v27, %v2230_v58  ;;  %v2512_v29 = vrot.slane %v2507_v20, 4  ;;  %v2242_v61 = vrot.slane %v2240_v30, 5  ;;  %v2150_v30 = vld [vmem:[#allocation2 + $0x7c] sm:$0x1]  ;;  %v2397_v56 = vld [vmem:[#allocation2 + $0x60] sm:$0x8] }
 0x252   : > { %10640 = vst [vmem:[#allocation64_spill] sm:$0xff] %v8999_v17  ;;  %v2237_v49 = vor.u32 %v2236_v12, %v2234_v3  ;;  %v5886_v8 = vrot.slane %v2500_v31, 11  ;;  %v2519_v17 = vor.u32 %v2517_v43, %v2516_v16  ;;  %v2527_v34 = vshrl.u32 %v8995_v19, 16  ;;  %6830 = vmatpush3.bf16.msra.mxu0 %v8898_v32 }
 0x253   : > { %v9006_v13 = vrot.slane %v10642_v53, 4  ;;  %v10644_v52 = vor.u32 %v8870_v60, %v8868_v11  ;;  %v2233_v28 = vrot.slane %v2232_v10, 4  ;;  %v2536_v51 = vshrl.u32 %v9001_v7, 16  ;;  %v7159_v53 = vld [vmem:[#allocation2 + $0x68] sm:$0xf]  ;;  %6831 = vmatprep.subr.bf16.mxu0 %v8919_v48 }
 0x254   : > { %v2238_v37 = vrot.slane %v2237_v49, 4  ;;  %v10646_v12 = vshrl.u32 %v8891_v55, 16  ;;  %v10648_v31 = vshll.u32 %v8891_v55, 16  ;;  %v2511_v14 = vsel %vm7704_vm8, %v5886_v8, %v2510_v40 }
 0x255   : > { %10643 = vst [vmem:[#allocation66_spill] sm:$0xff] %v9006_v13  ;;  %v9013_v57 = vrot.slane %v10644_v52, 4  ;;  %v2520_v60 = vsel %vm7704_vm8, %v2512_v29, %v2519_v17  ;;  %v2235_v16 = vsel %vm7721_vm11, %v2233_v28, %v2234_v3  ;;  %v2529_v33 = vrot.slane %v2527_v34, 7  ;;  %v9046_v28 = vld [vmem:[#allocation2 + $0x74] sm:$0xf] }
 0x256   : > { %v9019_v20 = vrot.slane %v10646_v12, 4  ;;  %v9023_v43 = vrot.slane %v10648_v31, 5  ;;  %v2243_v5 = vsel %vm7721_vm11, %v2238_v37, %v2242_v61  ;;  %v2538_v55 = vrot.slane %v2536_v51, 7  ;;  %v7158_v61 = vld [vmem:[#allocation2 + $0x64] sm:$0xf]  ;;  %6832 = vmatpush3.bf16.msra.mxu0 %v8919_v48 }
 0x257   : > { %10645 = vst [vmem:[#allocation67_spill] sm:$0xff] %v9013_v57  ;;  %v5984_v58 = vcombine.low %v2235_v16, %v2243_v5  ;;  %v5998_v27 = vcombine.low %v2511_v14, %v2520_v60  ;;  %v2530_v40 = vshll.u32 %v8995_v19, 16  ;;  %v10460_v17 = vshll.u32 %v9001_v7, 16  ;;  %v9053_v16 = vld [vmem:[#allocation2 + $0x78] sm:$0xf]  ;;  %6833 = vmatprep.subr.bf16.mxu0 %v8950_v18 }
 0x258   : > { %10647 = vst [vmem:[#allocation68_spill] sm:$0xff] %v9019_v20  ;;  %10649 = vst [vmem:[#allocation69_spill] sm:$0xff] %v9023_v43  ;;  %v6015_v3 = vcombine.low %v8995_v19, %v9001_v7  ;;  %v5968_v10 = vcombine.low %v7158_v61, %v7159_v53  ;;  %v10650_v49 = vshrl.u32 %v8198_v26, 16  ;;  %v10651_v8 = vshll.u32 %v8198_v26, 16  ;;  %v9158_v57 = vld [vmem:[#allocation2 + $0x98] sm:$0xf] }
 0x259   : > { %4674 = vmatprep.mubr.bf16.mxu1 %v5984_v58  ;;  %4820 = vmatmul.mubr.bf16.gmra.mrb[140].mxu0 %v5998_v27  ;;  %v10652_v32 = vshll.u32 %v8206_v62, 16  ;;  %v10653_v12 = vshrl.u32 %v8206_v62, 16  ;;  %v2254_v14 = vshll.u32 %v2150_v30, 16  ;;  %v2522_v60 = vshrl.u32 %v2397_v56, 16  ;;  %10654 = vst [vmem:[#allocation70_spill] sm:$0xff] %v9053_v16  ;;  %10671 = vst [vmem:[#allocation78_spill] sm:$0xff] %v9158_v57 }
 0x25a   : > { %v2244_v29 = vrot.slane %v10650_v49, 4  ;;  %v2245_v52 = vrot.slane %v10651_v8, 5  ;;  %4827 = vmatprep.mubr.bf16.mxu0 %v6015_v3  ;;  %4675 = vmatmul.mubr.bf16.gmra.mrb[84].mxu1 %v5968_v10  ;;  %v2532_v5 = vor.u32 %v2530_v40, %v2529_v33  ;;  %v2534_v61 = vrot.slane %v2529_v33, 4 }
 0x25b   : > { %v2248_v37 = vrot.slane %v10652_v32, 5  ;;  %v2250_v31 = vrot.slane %v10653_v12, 4  ;;  %v2541_v58 = vor.u32 %v10460_v17, %v2538_v55  ;;  %v2256_v53 = vrot.slane %v2254_v14, 5  ;;  %v2400_v12 = vld [vmem:[#allocation2 + $0x70] sm:$0x8]  ;;  %6834 = vmatpush3.bf16.msra.mxu0 %v8950_v18 }
 0x25c   : > { %v2246_v26 = vor.u32 %v2245_v52, %v2244_v29  ;;  %v5887_v49 = vrot.slane %v2522_v60, 11  ;;  %v10466_v62 = vshrl.u32 %v9046_v28, 16  ;;  %v10655_v30 = vshrl.u32 %v8896_v6, 16  ;;  %v2151_v60 = vld [vmem:[#allocation2 + $0x8c] sm:$0x1] }
 0x25d   : > { %v2251_v27 = vor.u32 %v2250_v31, %v2248_v37  ;;  %v2542_v10 = vsel %vm7704_vm8, %v2534_v61, %v2541_v58  ;;  %v10461_v33 = vshrl.u32 %v9053_v16, 16  ;;  %v10657_v55 = vor.u32 %v8970_v15, %v8965_v24 }
 0x25e   : > { %v9063_v56 = vrot.slane %v10655_v30, 4  ;;  %v2247_v3 = vrot.slane %v2246_v26, 4  ;;  %v10659_v48 = vor.u32 %v8976_v59, %v8974_v23  ;;  %v10465_v32 = vshll.u32 %v9046_v28, 16 }
 0x25f   : > { %v9072_v29 = vrot.slane %v10657_v55, 4  ;;  %v2252_v52 = vrot.slane %v2251_v27, 4  ;;  %v2533_v31 = vsel %vm7704_vm8, %v5887_v49, %v2532_v5  ;;  %v2551_v14 = vrot.slane %v10466_v62, 7  ;;  %v7160_v27 = vld [vmem:[#allocation2 + $0x74] sm:$0xf] }
 0x260   : > { %10656 = vst [vmem:[#allocation71_spill] sm:$0xff] %v9063_v56  ;;  %v9077_v8 = vrot.slane %v10659_v48, 4  ;;  %v2560_v24 = vrot.slane %v10461_v33, 7  ;;  %v10462_v15 = vshll.u32 %v9053_v16, 16  ;;  %v2249_v59 = vsel %vm7721_vm11, %v2247_v3, %v2248_v37  ;;  %v7161_v49 = vld [vmem:[#allocation2 + $0x78] sm:$0xf] }
 0x261   : > { %10658 = vst [vmem:[#allocation72_spill] sm:$0xff] %v9072_v29  ;;  %v2257_v26 = vsel %vm7721_vm11, %v2252_v52, %v2256_v53  ;;  %v5999_v61 = vcombine.low %v2533_v31, %v2542_v10  ;;  %v6016_v58 = vcombine.low %v9046_v28, %v9053_v16  ;;  %v5969_v30 = vcombine.low %v7160_v27, %v7161_v49  ;;  %v9098_v37 = vld [vmem:[#allocation2 + $0x84] sm:$0xf]  ;;  %v9100_v3 = vld [vmem:[#allocation2 + $0x88] sm:$0xf] }
 0x262   : > { %10660 = vst [vmem:[#allocation73_spill] sm:$0xff] %v9077_v8  ;;  %v5985_v5 = vcombine.low %v2249_v59, %v2257_v26  ;;  %v10661_v55 = vshrl.u32 %v8265_v39, 16  ;;  %v10662_v17 = vshll.u32 %v8265_v39, 16  ;;  %10663 = vst [vmem:[#allocation74_spill] sm:$0xff] %v9100_v3  ;;  %v10664_v53 = vshll.u32 %v8270_v36, 16  ;;  %v9106_v26 = vpop.f32.mrb[4].mxu1 }
 0x263   : > { %4828 = vmatmul.mubr.bf16.gmra.mrb[144].mxu0 %v5999_v61  ;;  %v10665_v18 = vshrl.u32 %v8270_v36, 16  ;;  %v2268_v31 = vshll.u32 %v2151_v60, 16  ;;  %v2544_v59 = vshrl.u32 %v2400_v12, 16  ;;  %v2554_v39 = vor.u32 %v10465_v32, %v2551_v14  ;;  %v9112_v49 = vpop.f32.mrb[5].mxu1  ;;  %v7163_v32 = vld [vmem:[#allocation2 + $0x88] sm:$0xf] }
 0x264   : > { %v2258_v48 = vrot.slane %v10661_v55, 4  ;;  %v2259_v33 = vrot.slane %v10662_v17, 5  ;;  %v2262_v10 = vrot.slane %v10664_v53, 5  ;;  %4682 = vmatprep.mubr.bf16.mxu1 %v5985_v5  ;;  %4835 = vmatprep.mubr.bf16.mxu0 %v6016_v58  ;;  %v2556_v17 = vrot.slane %v2551_v14, 4  ;;  %v9115_v60 = vpop.f32.mrb[6].mxu1 }
 0x265   : > { %v2264_v52 = vrot.slane %v10665_v18, 4  ;;  %v2563_v61 = vor.u32 %v10462_v15, %v2560_v24  ;;  %4683 = vmatmul.mubr.bf16.gmra.mrb[88].mxu1 %v5969_v30  ;;  %v2270_v36 = vrot.slane %v2268_v31, 5  ;;  %v5888_v53 = vrot.slane %v2544_v59, 11  ;;  %v9124_v5 = vpop.f32.mrb[7].mxu1 }
 0x266   : > { %v2260_v27 = vor.u32 %v2259_v33, %v2258_v48  ;;  %v10464_v12 = vshrl.u32 %v9098_v37, 16  ;;  %v9119_v33 = vrot.slane %v2527_v34, 4  ;;  %v10463_v24 = vshrl.u32 %v9100_v3, 16 }
 0x267   : > { %v2265_v55 = vor.u32 %v2264_v52, %v2262_v10  ;;  %v2564_v14 = vsel %vm7704_vm8, %v2556_v17, %v2563_v61  ;;  %v9128_v30 = vrot.slane %v2530_v40, 5  ;;  %v9132_v48 = vrot.slane %v2536_v51, 4  ;;  %v2403_v52 = vld [vmem:[#allocation2 + $0x80] sm:$0x8]  ;;  %v2152_v40 = vld [vmem:[#allocation2 + $0x9c] sm:$0x1] }
 0x268   : > { %10666 = vst [vmem:[#allocation75_spill] sm:$0xff] %v9119_v33  ;;  %v2261_v58 = vrot.slane %v2260_v27, 4  ;;  %v2555_v31 = vsel %vm7704_vm8, %v5888_v53, %v2554_v39  ;;  %v2573_v59 = vrot.slane %v10464_v12, 7  ;;  %v2582_v27 = vrot.slane %v10463_v24, 7  ;;  %v9142_v17 = vpop.f32.mrb[64].mxu0 }
 0x269   : > { %10667 = vst [vmem:[#allocation76_spill] sm:$0xff] %v9128_v30  ;;  %10668 = vst [vmem:[#allocation77_spill] sm:$0xff] %v9132_v48  ;;  %v2266_v18 = vrot.slane %v2265_v55, 4  ;;  %v6000_v55 = vcombine.low %v2555_v31, %v2564_v14  ;;  %v6017_v39 = vcombine.low %v9098_v37, %v9100_v3  ;;  %v9150_v53 = vld [vmem:[#allocation2 + $0x94] sm:$0xf]  ;;  %v9152_v15 = vpop.f32.mrb[65].mxu0 }
 0x26a   : > { %v2263_v51 = vsel %vm7721_vm11, %v2261_v58, %v2262_v10  ;;  %v7162_v12 = vld [vmem:[#allocation2 + $0x84] sm:$0xf]  ;;  %v10669_v19 = vshrl.u32 %v8324_v63, 16  ;;  %v10670_v10 = vshll.u32 %v8324_v63, 16  ;;  %v10672_v14 = vshll.u32 %v8330_v46, 16 }
 0x26b   : > { %v2271_v61 = vsel %vm7721_vm11, %v2266_v18, %v2270_v36  ;;  %v5970_v62 = vcombine.low %v7162_v12, %v7163_v32  ;;  %v9160_v36 = vpop.f32.mrb[66].mxu0  ;;  %4836 = vmatmul.mubr.bf16.gmra.mrb[148].mxu0 %v6000_v55  ;;  %v10673_v31 = vshrl.u32 %v8330_v46, 16  ;;  %v2566_v13 = vshrl.u32 %v2403_v52, 16  ;;  %v9168_v12 = vpop.f32.mrb[8].mxu1 }
 0x26c   : > { %v5986_v24 = vcombine.low %v2263_v51, %v2271_v61  ;;  %v2272_v34 = vrot.slane %v10669_v19, 4  ;;  %v2273_v58 = vrot.slane %v10670_v10, 5  ;;  %v2276_v18 = vrot.slane %v10672_v14, 5  ;;  %v9166_v32 = vpop.f32.mrb[67].mxu0  ;;  %4843 = vmatprep.mubr.bf16.mxu0 %v6017_v39  ;;  %v9174_v14 = vpop.f32.mrb[9].mxu1 }
 0x26d   : > { %v2278_v51 = vrot.slane %v10673_v31, 4  ;;  %v2282_v61 = vshll.u32 %v2152_v40, 16  ;;  %v10674_v19 = vshll.u32 %v9098_v37, 16  ;;  %v2578_v11 = vrot.slane %v2573_v59, 4  ;;  %v9177_v48 = vpop.f32.mrb[10].mxu1 }
 0x26e   : > { %4690 = vmatprep.mubr.bf16.mxu1 %v5986_v24  ;;  %v2274_v63 = vor.u32 %v2273_v58, %v2272_v34  ;;  %v10675_v55 = vshll.u32 %v9100_v3, 16  ;;  %v5889_v52 = vrot.slane %v2566_v13, 11  ;;  %v10469_v31 = vshrl.u32 %v9150_v53, 16  ;;  %v9186_v58 = vpop.f32.mrb[11].mxu1 }
 0x26f   : > { %v2576_v10 = vor.u32 %v10674_v19, %v2573_v59  ;;  %4691 = vmatmul.mubr.bf16.gmra.mrb[92].mxu1 %v5970_v62  ;;  %v2279_v46 = vor.u32 %v2278_v51, %v2276_v18  ;;  %v2284_v40 = vrot.slane %v2282_v61, 5  ;;  %v10676_v24 = vshrl.u32 %v9046_v28, 16 }
 0x270   : > { %v2585_v8 = vor.u32 %v10675_v55, %v2582_v27  ;;  %v2275_v39 = vrot.slane %v2274_v63, 4  ;;  %v10470_v27 = vshrl.u32 %v9158_v57, 16  ;;  %v10678_v62 = vshll.u32 %v9046_v28, 16 }
 0x271   : > { %v9181_v34 = vrot.slane %v10676_v24, 4  ;;  %v10680_v13 = vshrl.u32 %v9053_v16, 16  ;;  %v2280_v19 = vrot.slane %v2279_v46, 4  ;;  %v2153_v24 = vld [vmem:[#allocation2 + $0xac] sm:$0x1]  ;;  %v2577_v63 = vsel %vm7704_vm8, %v5889_v52, %v2576_v10 }
 0x272   : > { %v2586_v59 = vsel %vm7704_vm8, %v2578_v11, %v2585_v8  ;;  %v9190_v51 = vrot.slane %v10678_v62, 5  ;;  %v2595_v11 = vrot.slane %v10469_v31, 7  ;;  %v2604_v8 = vrot.slane %v10470_v27, 7  ;;  %v2406_v62 = vld [vmem:[#allocation2 + $0x90] sm:$0x8] }
 0x273   : > { %10677 = vst [vmem:[#allocation79_spill] sm:$0xff] %v9181_v34  ;;  %v9194_v61 = vrot.slane %v10680_v13, 4  ;;  %v2277_v13 = vsel %vm7721_vm11, %v2275_v39, %v2276_v18  ;;  %v2285_v46 = vsel %vm7721_vm11, %v2280_v19, %v2284_v40  ;;  %v6001_v55 = vcombine.low %v2577_v63, %v2586_v59  ;;  %v7164_v52 = vld [vmem:[#allocation2 + $0x94] sm:$0xf]  ;;  %v7165_v16 = vld [vmem:[#allocation2 + $0x98] sm:$0xf] }
 0x274   : > { %10679 = vst [vmem:[#allocation80_spill] sm:$0xff] %v9190_v51  ;;  %v5987_v10 = vcombine.low %v2277_v13, %v2285_v46  ;;  %v5971_v31 = vcombine.low %v7164_v52, %v7165_v16  ;;  %v10682_v51 = vshrl.u32 %v8386_v21, 16  ;;  %v10683_v28 = vshll.u32 %v8386_v21, 16  ;;  %v9220_v13 = vld [vmem:[#allocation2 + $0xa8] sm:$0xf]  ;;  %v9226_v52 = vpop.f32.mrb[12].mxu1 }
 0x275   : > { %10681 = vst [vmem:[#allocation81_spill] sm:$0xff] %v9194_v61  ;;  %v6018_v61 = vcombine.low %v9150_v53, %v9158_v57  ;;  %4844 = vmatmul.mubr.bf16.gmra.mrb[152].mxu0 %v6001_v55  ;;  %v10684_v18 = vshll.u32 %v8393_v38, 16  ;;  %v10685_v39 = vshrl.u32 %v8393_v38, 16  ;;  %v2296_v19 = vshll.u32 %v2153_v24, 16  ;;  %10686 = vst [vmem:[#allocation82_spill] sm:$0xff] %v9220_v13 }
 0x276   : > { %v2286_v27 = vrot.slane %v10682_v51, 4  ;;  %v2287_v34 = vrot.slane %v10683_v28, 5  ;;  %v2588_v63 = vshrl.u32 %v2406_v62, 16  ;;  %4698 = vmatprep.mubr.bf16.mxu1 %v5987_v10  ;;  %v10687_v51 = vshll.u32 %v9150_v53, 16  ;;  %v9229_v62 = vpop.f32.mrb[13].mxu1 }
 0x277   : > { %v2290_v40 = vrot.slane %v10684_v18, 5  ;;  %v2292_v59 = vrot.slane %v10685_v39, 4  ;;  %4851 = vmatprep.mubr.bf16.mxu0 %v6018_v61  ;;  %v2600_v28 = vrot.slane %v2595_v11, 4  ;;  %v10688_v46 = vshll.u32 %v9158_v57, 16  ;;  %4699 = vmatmul.mubr.bf16.gmra.mrb[96].mxu1 %v5971_v31  ;;  %v2409_v10 = vld [vmem:[#allocation2 + $0xa0] sm:$0x8] }
 0x278   : > { %v2288_v16 = vor.u32 %v2287_v34, %v2286_v27  ;;  %v2598_v21 = vor.u32 %v10687_v51, %v2595_v11  ;;  %v2298_v38 = vrot.slane %v2296_v19, 5  ;;  %v5890_v39 = vrot.slane %v2588_v63, 11  ;;  %v9238_v51 = vpop.f32.mrb[14].mxu1 }
 0x279   : > { %v2607_v55 = vor.u32 %v10688_v46, %v2604_v8  ;;  %v2293_v18 = vor.u32 %v2292_v59, %v2290_v40  ;;  %v10689_v61 = vshrl.u32 %v9098_v37, 16  ;;  %v10691_v31 = vshll.u32 %v9098_v37, 16  ;;  %v9251_v24 = vpop.f32.mrb[15].mxu1 }
 0x27a   : > { %v2289_v27 = vrot.slane %v2288_v16, 4  ;;  %v10693_v19 = vshrl.u32 %v9100_v3, 16  ;;  %v9249_v16 = vpop.f32.mrb[68].mxu0  ;;  %v10696_v37 = vshrl.u32 %v9220_v13, 16  ;;  %v10697_v3 = vshrl.u32 %v8449_v1, 16 }
 0x27b   : > { %v9233_v34 = vrot.slane %v10689_v61, 4  ;;  %v2608_v11 = vsel %vm7704_vm8, %v2600_v28, %v2607_v55  ;;  %v9242_v59 = vrot.slane %v10691_v31, 5  ;;  %v2294_v46 = vrot.slane %v2293_v18, 4 }
 0x27c   : > { %v9246_v63 = vrot.slane %v10693_v19, 4  ;;  %v2599_v28 = vsel %vm7704_vm8, %v5890_v39, %v2598_v21  ;;  %v10695_v55 = vshrl.u32 %v9214_v42, 16  ;;  %v2626_v31 = vrot.slane %v10696_v37, 7  ;;  %v2154_v19 = vld [vmem:[#allocation2 + $0xbc] sm:$0x1] }
 0x27d   : > { %10690 = vst [vmem:[#allocation83_spill] sm:$0xff] %v9233_v34  ;;  %10692 = vst [vmem:[#allocation84_spill] sm:$0xff] %v9242_v59  ;;  %v2291_v18 = vsel %vm7721_vm11, %v2289_v27, %v2290_v40  ;;  %v2299_v61 = vsel %vm7721_vm11, %v2294_v46, %v2298_v38  ;;  %v6002_v59 = vcombine.low %v2599_v28, %v2608_v11  ;;  %v7166_v34 = vld [vmem:[#allocation2 + $0xa4] sm:$0xf]  ;;  %v7167_v37 = vld [vmem:[#allocation2 + $0xa8] sm:$0xf] }
 0x27e   : > { %10694 = vst [vmem:[#allocation85_spill] sm:$0xff] %v9246_v63  ;;  %v2617_v8 = vrot.slane %v10695_v55, 7  ;;  %v9260_v63 = vpop.f32.mrb[69].mxu0  ;;  %v6019_v21 = vcombine.low %v9214_v42, %v9220_v13  ;;  %v5988_v55 = vcombine.low %v2291_v18, %v2299_v61  ;;  %v5972_v7 = vcombine.low %v7166_v34, %v7167_v37  ;;  %v9274_v40 = vld [vmem:[#allocation2 + $0xb4] sm:$0xf] }
 0x27f   : > { %v9268_v39 = vpop.f32.mrb[70].mxu0  ;;  %v2300_v30 = vrot.slane %v10697_v3, 4  ;;  %v10698_v33 = vshll.u32 %v8449_v1, 16  ;;  %4852 = vmatmul.mubr.bf16.gmra.mrb[156].mxu0 %v6002_v59  ;;  %v10699_v38 = vshll.u32 %v8460_v54, 16  ;;  %v10700_v46 = vshrl.u32 %v8460_v54, 16 }
 0x280   : > { %v9276_v27 = vpop.f32.mrb[71].mxu0  ;;  %v2310_v28 = vshll.u32 %v2154_v19, 16  ;;  %v2610_v18 = vshrl.u32 %v2409_v10, 16  ;;  %v9282_v34 = vld [vmem:[#allocation2 + $0xb8] sm:$0xf]  ;;  %4706 = vmatprep.mubr.bf16.mxu1 %v5988_v55  ;;  %4859 = vmatprep.mubr.bf16.mxu0 %v6019_v21  ;;  %v10702_v1 = vshll.u32 %v9214_v42, 16 }
 0x281   : > { %v2301_v47 = vrot.slane %v10698_v33, 5  ;;  %v2304_v11 = vrot.slane %v10699_v38, 5  ;;  %v2306_v61 = vrot.slane %v10700_v46, 4  ;;  %10701 = vst [vmem:[#allocation86_spill] sm:$0xff] %v9282_v34  ;;  %v2622_v37 = vrot.slane %v2617_v8, 4  ;;  %4707 = vmatmul.mubr.bf16.gmra.mrb[100].mxu1 %v5972_v7 }
 0x282   : > { %v2620_v33 = vor.u32 %v10702_v1, %v2617_v8  ;;  %v10703_v29 = vshll.u32 %v9220_v13, 16  ;;  %v2312_v38 = vrot.slane %v2310_v28, 5  ;;  %v5891_v56 = vrot.slane %v2610_v18, 11  ;;  %v2412_v8 = vld [vmem:[#allocation2 + $0xb0] sm:$0x8]  ;;  %v9305_v28 = vpop.f32.mrb[16].mxu1 }
 0x283   : > { %v2302_v3 = vor.u32 %v2301_v47, %v2300_v30  ;;  %v2307_v23 = vor.u32 %v2306_v61, %v2304_v11  ;;  %v10476_v54 = vshrl.u32 %v9274_v40, 16  ;;  %v10704_v10 = vshrl.u32 %v9150_v53, 16  ;;  %v7169_v1 = vld [vmem:[#allocation2 + $0xb8] sm:$0xf] }
 0x284   : > { %v2629_v59 = vor.u32 %v10703_v29, %v2626_v31  ;;  %v10475_v30 = vshrl.u32 %v9282_v34, 16  ;;  %v10706_v21 = vshll.u32 %v9150_v53, 16  ;;  %v10708_v7 = vshrl.u32 %v9158_v57, 16 }
 0x285   : > { %v9291_v19 = vrot.slane %v10704_v10, 4  ;;  %v2303_v55 = vrot.slane %v2302_v3, 4  ;;  %v2308_v46 = vrot.slane %v2307_v23, 4  ;;  %v2621_v18 = vsel %vm7704_vm8, %v5891_v56, %v2620_v33  ;;  %v9322_v33 = vld [vmem:[#allocation2 + $0xc4] sm:$0xf] }
 0x286   : > { %v2630_v47 = vsel %vm7704_vm8, %v2622_v37, %v2629_v59  ;;  %v9298_v29 = vrot.slane %v10706_v21, 5  ;;  %v9302_v31 = vrot.slane %v10708_v7, 4  ;;  %v2639_v3 = vrot.slane %v10476_v54, 7  ;;  %v2155_v37 = vld [vmem:[#allocation2 + $0xcc] sm:$0x1]  ;;  %v9314_v59 = vpop.f32.mrb[17].mxu1 }
 0x287   : > { %10705 = vst [vmem:[#allocation87_spill] sm:$0xff] %v9291_v19  ;;  %v2648_v53 = vrot.slane %v10475_v30, 7  ;;  %10710 = vst [vmem:[#allocation90_spill] sm:$0xff] %v9314_v59  ;;  %v2305_v23 = vsel %vm7721_vm11, %v2303_v55, %v2304_v11  ;;  %v2313_v10 = vsel %vm7721_vm11, %v2308_v46, %v2312_v38  ;;  %v6003_v21 = vcombine.low %v2621_v18, %v2630_v47  ;;  %v9324_v7 = vpop.f32.mrb[18].mxu1  ;;  %v7168_v54 = vld [vmem:[#allocation2 + $0xb4] sm:$0xf] }
 0x288   : > { %10707 = vst [vmem:[#allocation88_spill] sm:$0xff] %v9298_v29  ;;  %10709 = vst [vmem:[#allocation89_spill] sm:$0xff] %v9302_v31  ;;  %v6020_v56 = vcombine.low %v9274_v40, %v9282_v34  ;;  %v5989_v30 = vcombine.low %v2305_v23, %v2313_v10  ;;  %v5973_v61 = vcombine.low %v7168_v54, %v7169_v1  ;;  %v10712_v31 = vshrl.u32 %v8509_v50, 16  ;;  %v9330_v29 = vld [vmem:[#allocation2 + $0xc8] sm:$0xf]  ;;  %v9332_v38 = vpop.f32.mrb[72].mxu0 }
 0x289   : > { %10711 = vst [vmem:[#allocation91_spill] sm:$0xff] %v9324_v7  ;;  %v10713_v11 = vshll.u32 %v8509_v50, 16  ;;  %v9334_v47 = vpop.f32.mrb[19].mxu1  ;;  %4860 = vmatmul.mubr.bf16.gmra.mrb[160].mxu0 %v6003_v21  ;;  %v10715_v46 = vshll.u32 %v8517_v9, 16  ;;  %v10716_v23 = vshrl.u32 %v8517_v9, 16  ;;  %v2324_v54 = vshll.u32 %v2155_v37, 16 }
 0x28a   : > { %v2314_v57 = vrot.slane %v10712_v31, 4  ;;  %10714 = vst [vmem:[#allocation92_spill] sm:$0xff] %v9334_v47  ;;  %v2632_v1 = vshrl.u32 %v2412_v8, 16  ;;  %v9340_v19 = vpop.f32.mrb[73].mxu0  ;;  %4714 = vmatprep.mubr.bf16.mxu1 %v5989_v30  ;;  %4867 = vmatprep.mubr.bf16.mxu0 %v6020_v56  ;;  %v10717_v31 = vshll.u32 %v9274_v40, 16  ;;  %v2644_v6 = vrot.slane %v2639_v3, 4 }
 0x28b   : > { %v2315_v55 = vrot.slane %v10713_v11, 5  ;;  %v2318_v18 = vrot.slane %v10715_v46, 5  ;;  %v2320_v10 = vrot.slane %v10716_v23, 4  ;;  %v10718_v43 = vshll.u32 %v9282_v34, 16  ;;  %v9346_v20 = vpop.f32.mrb[74].mxu0  ;;  %4715 = vmatmul.mubr.bf16.gmra.mrb[104].mxu1 %v5973_v61 }
 0x28c   : > { %v2642_v11 = vor.u32 %v10717_v31, %v2639_v3  ;;  %v2326_v9 = vrot.slane %v2324_v54, 5  ;;  %v5892_v23 = vrot.slane %v2632_v1, 11  ;;  %v2659_v8 = vshrl.u32 %v9322_v33, 16  ;;  %v9349_v37 = vpop.f32.mrb[75].mxu0  ;;  %v9382_v47 = vld [vmem:[#allocation2 + $0xd4] sm:$0xf] }
 0x28d   : > { %v2316_v50 = vor.u32 %v2315_v55, %v2314_v57  ;;  %v2651_v21 = vor.u32 %v10718_v43, %v2648_v53  ;;  %v2321_v46 = vor.u32 %v2320_v10, %v2318_v18  ;;  %v10719_v30 = vshrl.u32 %v9214_v42, 16 }
 0x28e   : > { %v10480_v43 = vshrl.u32 %v9330_v29, 16  ;;  %v10721_v53 = vshll.u32 %v9214_v42, 16  ;;  %v10723_v55 = vshrl.u32 %v9220_v13, 16  ;;  %v2662_v1 = vshll.u32 %v9322_v33, 16 }
 0x28f   : > { %v9353_v57 = vrot.slane %v10719_v30, 4  ;;  %v2317_v56 = vrot.slane %v2316_v50, 4  ;;  %v2652_v3 = vsel %vm7704_vm8, %v2644_v6, %v2651_v21  ;;  %v2322_v54 = vrot.slane %v2321_v46, 4  ;;  %v2156_v30 = vld [vmem:[#allocation2 + $0xdc] sm:$0x1]  ;;  %v10725_v21 = vld [vmem:[#allocation29_spill] sm:$0xff] }
 0x290   : > { %v9360_v61 = vrot.slane %v10721_v53, 5  ;;  %v9364_v10 = vrot.slane %v10723_v55, 4  ;;  %v2643_v50 = vsel %vm7704_vm8, %v5892_v23, %v2642_v11  ;;  %v2661_v6 = vrot.slane %v2659_v8, 7  ;;  %v7170_v11 = vld [vmem:[#allocation2 + $0xc4] sm:$0xf] }
 0x291   : > { %10720 = vst [vmem:[#allocation93_spill] sm:$0xff] %v9353_v57  ;;  %v2319_v31 = vsel %vm7721_vm11, %v2317_v56, %v2318_v18  ;;  %v2327_v42 = vsel %vm7721_vm11, %v2322_v54, %v2326_v9  ;;  %v6004_v53 = vcombine.low %v2643_v50, %v2652_v3  ;;  %v2670_v55 = vrot.slane %v10480_v43, 7  ;;  %v7171_v23 = vld [vmem:[#allocation2 + $0xc8] sm:$0xf]  ;;  %v9384_v9 = vld [vmem:[#allocation2 + $0xd8] sm:$0xf] }
 0x292   : > { %10722 = vst [vmem:[#allocation94_spill] sm:$0xff] %v9360_v61  ;;  %10724 = vst [vmem:[#allocation95_spill] sm:$0xff] %v9364_v10  ;;  %v6021_v46 = vcombine.low %v9322_v33, %v9330_v29  ;;  %v2415_v10 = vld [vmem:[#allocation2 + $0xc0] sm:$0x8]  ;;  %v5990_v13 = vcombine.low %v2319_v31, %v2327_v42  ;;  %v6341_v18 = vadd.f32 %v8600_v2, %v8596_v45  ;;  %v10726_v61 = vshrl.u32 %v10725_v21, 16  ;;  %v9386_v3 = vpop.f32.mrb[20].mxu1 }
 0x293   : > { %v5974_v56 = vcombine.low %v7170_v11, %v7171_v23  ;;  %10727 = vst [vmem:[#allocation29_spill] sm:$0xff] %v9384_v9  ;;  %10728 = vst [vmem:[#allocation96_spill] sm:$0xff] %v9386_v3  ;;  %4868 = vmatmul.mubr.bf16.gmra.mrb[164].mxu0 %v6004_v53  ;;  %v10729_v33 = vshll.u32 %v10725_v21, 16  ;;  %v10730_v31 = vld [vmem:[#allocation26_spill] sm:$0xff]  ;;  %v2338_v11 = vshll.u32 %v2156_v30, 16  ;;  %v9394_v23 = vpop.f32.mrb[21].mxu1  ;;  %v2664_v53 = vor.u32 %v2662_v1, %v2661_v6 }
 0x294   : > { %v2328_v57 = vrot.slane %v10726_v61, 4  ;;  %v10731_v50 = vshll.u32 %v10730_v31, 16  ;;  %v10732_v45 = vshrl.u32 %v10730_v31, 16  ;;  %10733 = vst [vmem:[#allocation26_spill] sm:$0xff] %v9394_v23  ;;  %v10734_v61 = vshrl.u32 %v9274_v40, 16  ;;  %4722 = vmatprep.mubr.bf16.mxu1 %v5990_v13  ;;  %4875 = vmatprep.mubr.bf16.mxu0 %v6021_v46  ;;  %v9400_v21 = vpop.f32.mrb[76].mxu0 }
 0x295   : > { %v2329_v54 = vrot.slane %v10729_v33, 5  ;;  %v2654_v3 = vshrl.u32 %v2415_v10, 16  ;;  %v2666_v7 = vrot.slane %v2661_v6, 4  ;;  %v9402_v33 = vpop.f32.mrb[22].mxu1  ;;  %4723 = vmatmul.mubr.bf16.gmra.mrb[108].mxu1 %v5974_v56  ;;  %v10736_v30 = vshll.u32 %v9330_v29, 16  ;;  %v9406_v59 = vpop.f32.mrb[77].mxu0 }
 0x296   : > { %v2332_v42 = vrot.slane %v10731_v50, 5  ;;  %v2334_v2 = vrot.slane %v10732_v45, 4  ;;  %v9398_v43 = vrot.slane %v10734_v61, 4  ;;  %v2340_v45 = vrot.slane %v2338_v11, 5  ;;  %v9408_v61 = vpop.f32.mrb[23].mxu1  ;;  %v10741_v56 = vld [vmem:[#allocation62_spill] sm:$0xff] }
 0x297   : > { %v2330_v50 = vor.u32 %v2329_v54, %v2328_v57  ;;  %v2673_v23 = vor.u32 %v10736_v30, %v2670_v55  ;;  %10737 = vst [vmem:[#allocation98_spill] sm:$0xff] %v9408_v61  ;;  %v10738_v13 = vshll.u32 %v9274_v40, 16  ;;  %v9417_v6 = vld [vmem:[%s10357_s4] ss:$0 sm:$0xff]  ;;  %v5893_v46 = vrot.slane %v2654_v3, 11  ;;  %v10740_v57 = vld [vmem:[#allocation59_spill] sm:$0xff] }
 0x298   : > { %10735 = vst [vmem:[#allocation97_spill] sm:$0xff] %v9398_v43  ;;  %v2335_v31 = vor.u32 %v2334_v2, %v2332_v42  ;;  %v6344_v54 = vadd.f32 %v10741_v56, %v10740_v57  ;;  %v10481_v2 = vshrl.u32 %v9382_v47, 16  ;;  %v9422_v55 = vpop.f32.mrb[78].mxu0  ;;  %v10742_v43 = vshrl.u32 %v9282_v34, 16 }
 0x299   : > { %v9412_v10 = vrot.slane %v10738_v13, 5  ;;  %v2331_v11 = vrot.slane %v2330_v50, 4  ;;  %v2674_v40 = vsel %vm7704_vm8, %v2666_v7, %v2673_v23  ;;  %v9433_v3 = vrot.slane %v2659_v8, 4 }
 0x29a   : > { %v2336_v30 = vrot.slane %v2335_v31, 4  ;;  %v9431_v61 = vrot.slane %v10742_v43, 4  ;;  %v9435_v57 = vrot.slane %v2662_v1, 5  ;;  %v2665_v56 = vsel %vm7704_vm8, %v5893_v46, %v2664_v53  ;;  %v2157_v46 = vld [vmem:[#allocation2 + $0xec] sm:$0x1] }
 0x29b   : > { %10739 = vst [vmem:[#allocation99_spill] sm:$0xff] %v9412_v10  ;;  %v9427_v10 = vpop.f32.mrb[79].mxu0  ;;  %10744 = vst [vmem:[#allocation62_spill] sm:$0xff] %v9433_v3  ;;  %v4315_v50 = vadd.f32 %v6341_v18, %v9417_v6  ;;  %v2333_v7 = vsel %vm7721_vm11, %v2331_v11, %v2332_v42  ;;  %v6005_v31 = vcombine.low %v2665_v56, %v2674_v40  ;;  %v2683_v8 = vrot.slane %v10481_v2, 7  ;;  %v7172_v11 = vld [vmem:[#allocation2 + $0xd4] sm:$0xf] }
 0x29c   : > { %10743 = vst [vmem:[#allocation59_spill] sm:$0xff] %v9431_v61  ;;  %10745 = vst [vmem:[#allocation100_spill] sm:$0xff] %v9435_v57  ;;  %v2341_v23 = vsel %vm7721_vm11, %v2336_v30, %v2340_v45  ;;  %v4318_v43 = vadd.f32 %v6344_v54, %v9417_v6  ;;  %v10746_v1 = vshrl.u32 %v9384_v9, 16  ;;  %v6022_v18 = vcombine.low %v9382_v47, %v9384_v9  ;;  %v7173_v30 = vld [vmem:[#allocation2 + $0xd8] sm:$0xf]  ;;  %v10747_v56 = vld [vmem:[#allocation60_spill] sm:$0xff] }
 0x29d   : > { %v5991_v13 = vcombine.low %v2333_v7, %v2341_v23  ;;  %4876 = vmatmul.mubr.bf16.gmra.mrb[168].mxu0 %v6005_v31  ;;  %v6347_v42 = vadd.f32 %v9112_v49, %v9106_v26  ;;  %v6453_v53 = vadd.f32 %v9152_v15, %v9142_v17  ;;  %v6350_v45 = vadd.f32 %v9124_v5, %v9115_v60  ;;  %v2418_v49 = vld [vmem:[#allocation2 + $0xd0] sm:$0x8]  ;;  %v10751_v5 = vld [vmem:[#allocation61_spill] sm:$0xff] }
 0x29e   : > { %v2692_v57 = vrot.slane %v10746_v1, 7  ;;  %v6456_v54 = vadd.f32 %v9166_v32, %v9160_v36  ;;  %v5975_v40 = vcombine.low %v7172_v11, %v7173_v30  ;;  %v10748_v7 = vshrl.u32 %v10747_v56, 16  ;;  %4883 = vmatprep.mubr.bf16.mxu0 %v6022_v18  ;;  %v9469_v32 = vld [vmem:[#allocation2 + $0xe4] sm:$0xf]  ;;  %v9471_v1 = vpop.f32.mrb[24].mxu1  ;;  %v9479_v18 = vpop.f32.mrb[80].mxu0 }
 0x29f   : > { %4730 = vmatprep.mubr.bf16.mxu1 %v5991_v13  ;;  %v10749_v31 = vshll.u32 %v10747_v56, 16  ;;  %v2684_v15 = vshll.u32 %v9382_v47, 16  ;;  %v9465_v60 = vadd.f32 %v6453_v53, %v4315_v50  ;;  %v10752_v13 = vshll.u32 %v10751_v5, 16  ;;  %v9477_v2 = vld [vmem:[#allocation2 + $0xe8] sm:$0xf]  ;;  %v9481_v50 = vpop.f32.mrb[25].mxu1 }
 0x2a0   : > { %v2342_v23 = vrot.slane %v10748_v7, 4  ;;  %v9473_v11 = vadd.f32 %v6456_v54, %v4318_v43  ;;  %4731 = vmatmul.mubr.bf16.gmra.mrb[112].mxu1 %v5975_v40  ;;  %v10754_v56 = vshrl.u32 %v10751_v5, 16  ;;  %10755 = vst [vmem:[#allocation101_spill] sm:$0xff] %v9477_v2  ;;  %v2676_v53 = vshrl.u32 %v2418_v49, 16  ;;  %v9485_v43 = vpop.f32.mrb[81].mxu0  ;;  %v9487_v54 = vpop.f32.mrb[26].mxu1 }
 0x2a1   : > { %v2343_v26 = vrot.slane %v10749_v31, 5  ;;  %10750 = vst [vmem:[#allocation60_spill] sm:$0xff] %v9465_v60  ;;  %v2346_v36 = vrot.slane %v10752_v13, 5  ;;  %v2352_v31 = vshll.u32 %v2157_v46, 16  ;;  %v2686_v13 = vor.u32 %v2684_v15, %v2683_v8  ;;  %v9490_v5 = vpop.f32.mrb[82].mxu0 }
 0x2a2   : > { %10753 = vst [vmem:[#allocation61_spill] sm:$0xff] %v9473_v11  ;;  %v2348_v7 = vrot.slane %v10754_v56, 4  ;;  %v2688_v17 = vrot.slane %v2683_v8, 4  ;;  %v10756_v60 = vshll.u32 %v9384_v9, 16  ;;  %v9492_v56 = vpop.f32.mrb[27].mxu1  ;;  %v10757_v49 = vshrl.u32 %v9330_v29, 16 }
 0x2a3   : > { %v2344_v30 = vor.u32 %v2343_v26, %v2342_v23  ;;  %v2354_v26 = vrot.slane %v2352_v31, 5  ;;  %v5894_v8 = vrot.slane %v2676_v53, 11  ;;  %v9501_v61 = vpop.f32.mrb[83].mxu0  ;;  %v9507_v31 = vrot.slane %v2684_v15, 5 }
 0x2a4   : > { %v2695_v3 = vor.u32 %v10756_v60, %v2692_v57  ;;  %v2349_v23 = vor.u32 %v2348_v7, %v2346_v36  ;;  %v9496_v11 = vrot.slane %v10757_v49, 4  ;;  %v4323_v46 = vadd.f32 %v6347_v42, %v9417_v6 }
 0x2a5   : > { %v2345_v40 = vrot.slane %v2344_v30, 4  ;;  %v10758_v30 = vshrl.u32 %v9382_v47, 16  ;;  %10760 = vst [vmem:[#allocation103_spill] sm:$0xff] %v9507_v31  ;;  %v4326_v49 = vadd.f32 %v6350_v45, %v9417_v6  ;;  %v10762_v15 = vshrl.u32 %v9477_v2, 16 }
 0x2a6   : > { %v2696_v57 = vsel %vm7704_vm8, %v2688_v17, %v2695_v3  ;;  %v2350_v34 = vrot.slane %v2349_v23, 4  ;;  %v2687_v3 = vsel %vm7704_vm8, %v5894_v8, %v2686_v13  ;;  %v10761_v17 = vshrl.u32 %v9469_v32, 16  ;;  %v2158_v23 = vld [vmem:[#allocation2 + $0xfc] sm:$0x1]  ;;  %v7175_v8 = vld [vmem:[#allocation2 + $0xe8] sm:$0xf] }
 0x2a7   : > { %v9505_v7 = vrot.slane %v10758_v30, 4  ;;  %v2347_v53 = vsel %vm7721_vm11, %v2345_v40, %v2346_v36  ;;  %v6006_v30 = vcombine.low %v2687_v3, %v2696_v57  ;;  %v2714_v31 = vrot.slane %v10762_v15, 7 }
 0x2a8   : > { %v2705_v60 = vrot.slane %v10761_v17, 7  ;;  %v2355_v47 = vsel %vm7721_vm11, %v2350_v34, %v2354_v26  ;;  %v6023_v42 = vcombine.low %v9469_v32, %v9477_v2  ;;  %v6353_v36 = vadd.f32 %v9174_v14, %v9168_v12  ;;  %v7174_v26 = vld [vmem:[#allocation2 + $0xe4] sm:$0xf]  ;;  %v2421_v14 = vld [vmem:[#allocation2 + $0xe0] sm:$0x8] }
 0x2a9   : > { %10759 = vst [vmem:[#allocation102_spill] sm:$0xff] %v9505_v7  ;;  %v5992_v45 = vcombine.low %v2347_v53, %v2355_v47  ;;  %v6459_v13 = vadd.f32 %v9260_v63, %v9249_v16  ;;  %v6356_v40 = vadd.f32 %v9186_v58, %v9177_v48  ;;  %4884 = vmatmul.mubr.bf16.gmra.mrb[172].mxu0 %v6006_v30  ;;  %v10763_v3 = vshrl.u32 %v8695_v44, 16  ;;  %v9543_v47 = vpop.f32.mrb[28].mxu1 }
 0x2aa   : > { %v6462_v34 = vadd.f32 %v9276_v27, %v9268_v39  ;;  %v5976_v57 = vcombine.low %v7174_v26, %v7175_v8  ;;  %v10764_v17 = vshll.u32 %v8695_v44, 16  ;;  %v2706_v63 = vshll.u32 %v9469_v32, 16  ;;  %4891 = vmatprep.mubr.bf16.mxu0 %v6023_v42  ;;  %v9541_v27 = vld [vmem:[#allocation2 + $0xf4] sm:$0xf]  ;;  %v9549_v8 = vld [vmem:[#allocation2 + $0xf8] sm:$0xf] }
 0x2ab   : > { %v2356_v53 = vrot.slane %v10763_v3, 4  ;;  %4738 = vmatprep.mubr.bf16.mxu1 %v5992_v45  ;;  %v10483_v48 = vshll.u32 %v9477_v2, 16  ;;  %v9537_v58 = vadd.f32 %v6459_v13, %v4323_v46  ;;  %v10766_v16 = vshll.u32 %v8705_v22, 16  ;;  %10769 = vst [vmem:[#allocation106_spill] sm:$0xff] %v9549_v8  ;;  %v9551_v42 = vpop.f32.mrb[29].mxu1 }
 0x2ac   : > { %v2357_v12 = vrot.slane %v10764_v17, 5  ;;  %v9545_v30 = vadd.f32 %v6462_v34, %v4326_v49  ;;  %4739 = vmatmul.mubr.bf16.gmra.mrb[116].mxu1 %v5976_v57  ;;  %v10768_v15 = vshrl.u32 %v8705_v22, 16  ;;  %v2366_v26 = vshll.u32 %v2158_v23, 16  ;;  %v9557_v49 = vpop.f32.mrb[30].mxu1 }
 0x2ad   : > { %10765 = vst [vmem:[#allocation104_spill] sm:$0xff] %v9537_v58  ;;  %v2360_v39 = vrot.slane %v10766_v16, 5  ;;  %v2698_v46 = vshrl.u32 %v2421_v14, 16  ;;  %v2708_v13 = vor.u32 %v2706_v63, %v2705_v60  ;;  %v2710_v3 = vrot.slane %v2705_v60, 4  ;;  %v9555_v16 = vpop.f32.mrb[84].mxu0 }
 0x2ae   : > { %10767 = vst [vmem:[#allocation105_spill] sm:$0xff] %v9545_v30  ;;  %v2358_v44 = vor.u32 %v2357_v12, %v2356_v53  ;;  %v2362_v45 = vrot.slane %v10768_v15, 4  ;;  %v2717_v17 = vor.u32 %v10483_v48, %v2714_v31  ;;  %v2368_v53 = vrot.slane %v2366_v26, 5  ;;  %v9560_v23 = vpop.f32.mrb[85].mxu0  ;;  %v9562_v12 = vpop.f32.mrb[31].mxu1 }
 0x2af   : > { %v2725_v22 = vshrl.u32 %v9541_v27, 16  ;;  %v10770_v14 = vshrl.u32 %v9384_v9, 16  ;;  %v5895_v60 = vrot.slane %v2698_v46, 11  ;;  %v9571_v30 = vpop.f32.mrb[86].mxu0  ;;  %v9577_v26 = vrot.slane %v2706_v63, 5 }
 0x2b0   : > { %v2359_v34 = vrot.slane %v2358_v44, 4  ;;  %v2363_v57 = vor.u32 %v2362_v45, %v2360_v39  ;;  %v2718_v31 = vsel %vm7704_vm8, %v2710_v3, %v2717_v17  ;;  %v10772_v44 = vshrl.u32 %v9469_v32, 16  ;;  %v9580_v9 = vpop.f32.mrb[87].mxu0  ;;  %v948_v48 = vld [vmem:[#allocation2 + $0x10c] sm:$0x1] }
 0x2b1   : > { %v9566_v15 = vrot.slane %v10770_v14, 4  ;;  %10774 = vst [vmem:[#allocation109_spill] sm:$0xff] %v9577_v26  ;;  %v4331_v58 = vadd.f32 %v6353_v36, %v9417_v6  ;;  %v4334_v46 = vadd.f32 %v6356_v40, %v9417_v6  ;;  %v2709_v17 = vsel %vm7704_vm8, %v5895_v60, %v2708_v13  ;;  %v7177_v60 = vld [vmem:[#allocation2 + $0xf8] sm:$0xf]  ;;  %v10821_v26 = vld [vmem:[#allocation24_spill] sm:$0xff] }
 0x2b2   : > { %v9575_v45 = vrot.slane %v10772_v44, 4  ;;  %v2364_v7 = vrot.slane %v2363_v57, 4  ;;  %v2361_v3 = vsel %vm7721_vm11, %v2359_v34, %v2360_v39  ;;  %v2727_v14 = vrot.slane %v2725_v22, 7  ;;  %v2424_v34 = vld [vmem:[#allocation2 + $0xf0] sm:$0x8] }
 0x2b3   : > { %10771 = vst [vmem:[#allocation107_spill] sm:$0xff] %v9566_v15  ;;  %v6007_v63 = vcombine.low %v2709_v17, %v2718_v31  ;;  %v10775_v44 = vshrl.u32 %v9549_v8, 16  ;;  %v6024_v57 = vcombine.low %v9541_v27, %v9549_v8  ;;  %v6359_v40 = vadd.f32 %v9229_v62, %v9226_v52 }
 0x2b4   : > { %10773 = vst [vmem:[#allocation108_spill] sm:$0xff] %v9575_v45  ;;  %v2369_v32 = vsel %vm7721_vm11, %v2364_v7, %v2368_v53  ;;  %v6465_v39 = vadd.f32 %v9340_v19, %v9332_v38  ;;  %v6362_v13 = vadd.f32 %v9251_v24, %v9238_v51  ;;  %v6468_v7 = vadd.f32 %v9349_v37, %v9346_v20  ;;  %v7176_v53 = vld [vmem:[#allocation2 + $0xf4] sm:$0xf]  ;;  %v9611_v38 = vld [vmem:[#allocation2 + $0x104] sm:$0xf] }
 0x2b5   : > { %v2736_v36 = vrot.slane %v10775_v44, 7  ;;  %v5993_v15 = vcombine.low %v2361_v3, %v2369_v32  ;;  %4892 = vmatmul.mubr.bf16.gmra.mrb[176].mxu0 %v6007_v63  ;;  %v5977_v31 = vcombine.low %v7176_v53, %v7177_v60  ;;  %v949_v3 = vsel %vm7692_vm6, 0, %v948_v48  ;;  %v9621_v44 = vld [vmem:[#allocation2 + $0x108] sm:$0xf] }
 0x2b6   : > { %v10776_v17 = vshrl.u32 %v8748_v35, 16  ;;  %v2728_v62 = vshll.u32 %v9541_v27, 16  ;;  %v10485_v19 = vshll.u32 %v9549_v8, 16  ;;  %4899 = vmatprep.mubr.bf16.mxu0 %v6024_v57  ;;  %v9607_v24 = vadd.f32 %v6465_v39, %v4331_v58  ;;  %950 = vst [vmem:[#allocation2 + $0x10c] sm:$0x1] %v949_v3  ;;  %10782 = vst [vmem:[#allocation112_spill] sm:$0xff] %v9621_v44 }
 0x2b7   : > { %4746 = vmatprep.mubr.bf16.mxu1 %v5993_v15  ;;  %v10778_v20 = vshll.u32 %v8748_v35, 16  ;;  %v9613_v37 = vadd.f32 %v6468_v7, %v4334_v46  ;;  %v10780_v48 = vshll.u32 %v8752_v0, 16  ;;  %v10781_v27 = vshrl.u32 %v8752_v0, 16  ;;  %v9623_v58 = vpop.f32.mrb[32].mxu1  ;;  %v9627_v7 = vpop.f32.mrb[88].mxu0 }
 0x2b8   : > { %v2370_v52 = vrot.slane %v10776_v17, 4  ;;  %10777 = vst [vmem:[#allocation110_spill] sm:$0xff] %v9607_v24  ;;  %4747 = vmatmul.mubr.bf16.gmra.mrb[120].mxu1 %v5977_v31  ;;  %v2720_v63 = vshrl.u32 %v2424_v34, 16  ;;  %v2730_v35 = vor.u32 %v2728_v62, %v2727_v14  ;;  %v2732_v39 = vrot.slane %v2727_v14, 4  ;;  %v9629_v53 = vpop.f32.mrb[33].mxu1  ;;  %v9638_v17 = vpop.f32.mrb[89].mxu0 }
 0x2b9   : > { %v2371_v51 = vrot.slane %v10778_v20, 5  ;;  %10779 = vst [vmem:[#allocation111_spill] sm:$0xff] %v9613_v37  ;;  %v9617_v32 = vrot.slane %v10780_v48, 5  ;;  %v2376_v15 = vrot.slane %v10781_v27, 4  ;;  %v2739_v46 = vor.u32 %v10485_v19, %v2736_v36  ;;  %v9648_v48 = vpop.f32.mrb[90].mxu0 }
 0x2ba   : > { %v10783_v60 = vshrl.u32 %v9477_v2, 16  ;;  %v9635_v0 = vrot.slane %v2725_v22, 4  ;;  %v5896_v34 = vrot.slane %v2720_v63, 11  ;;  %v10486_v3 = vshrl.u32 %v9611_v38, 16  ;;  %v9657_v19 = vpop.f32.mrb[91].mxu0 }
 0x2bb   : > { %v2372_v57 = vor.u32 %v2371_v51, %v2370_v52  ;;  %v9640_v52 = vpop.f32.mrb[34].mxu1  ;;  %v9642_v14 = vrot.slane %v2728_v62, 5  ;;  %v2377_v36 = vor.u32 %v2376_v15, %v9617_v32  ;;  %v2740_v20 = vsel %vm7704_vm8, %v2732_v39, %v2739_v46  ;;  %v2427_v37 = vld [vmem:[#allocation2 + $0x100] sm:$0x8] }
 0x2bc   : > { %v9633_v31 = vrot.slane %v10783_v60, 4  ;;  %10785 = vst [vmem:[#allocation114_spill] sm:$0xff] %v9635_v0  ;;  %v9650_v22 = vpop.f32.mrb[35].mxu1  ;;  %v4339_v27 = vadd.f32 %v6359_v40, %v9417_v6  ;;  %v2731_v60 = vsel %vm7704_vm8, %v5896_v34, %v2730_v35  ;;  %v2749_v62 = vrot.slane %v10486_v3, 7  ;;  %v10788_v34 = vld [vmem:[#allocation90_spill] sm:$0xff]  ;;  %v10790_v46 = vld [vmem:[#allocation92_spill] sm:$0xff] }
 0x2bd   : > { %10786 = vst [vmem:[#allocation115_spill] sm:$0xff] %v9642_v14  ;;  %v2373_v63 = vrot.slane %v2372_v57, 4  ;;  %v4342_v15 = vadd.f32 %v6362_v13, %v9417_v6  ;;  %v6008_v39 = vcombine.low %v2731_v60, %v2740_v20  ;;  %v2159_v24 = vld [vmem:[#allocation2 + $0x10c] sm:$0x1]  ;;  %v10787_v40 = vshrl.u32 %v9621_v44, 16  ;;  %v10789_v60 = vld [vmem:[#allocation91_spill] sm:$0xff] }
 0x2be   : > { %10784 = vst [vmem:[#allocation113_spill] sm:$0xff] %v9633_v31  ;;  %v6025_v35 = vcombine.low %v9611_v38, %v9621_v44  ;;  %v6365_v3 = vadd.f32 %v10788_v34, %v9305_v28  ;;  %v6471_v41 = vadd.f32 %v9406_v59, %v9400_v21  ;;  %v2378_v13 = vrot.slane %v2377_v36, 4  ;;  %v2787_v21 = vld [vmem:[#allocation2 + $0x4c] sm:$0x1] }
 0x2bf   : > { %v2758_v57 = vrot.slane %v10787_v40, 7  ;;  %v2380_v20 = vshll.u32 %v2159_v24, 16  ;;  %4900 = vmatmul.mubr.bf16.gmra.mrb[180].mxu0 %v6008_v39  ;;  %v6368_v51 = vadd.f32 %v10790_v46, %v10789_v60  ;;  %v6474_v14 = vadd.f32 %v9427_v10, %v9422_v55  ;;  %v7178_v39 = vld [vmem:[#allocation2 + $0x104] sm:$0xf]  ;;  %v7179_v46 = vld [vmem:[#allocation2 + $0x108] sm:$0xf] }
 0x2c0   : > { %v2375_v40 = vsel %vm7721_vm11, %v2373_v63, %v9617_v32  ;;  %4907 = vmatprep.mubr.bf16.mxu0 %v6025_v35  ;;  %v9677_v0 = vadd.f32 %v6471_v41, %v4339_v27  ;;  %v2742_v28 = vshrl.u32 %v2427_v37, 16  ;;  %v10792_v34 = vshll.u32 %v9611_v38, 16  ;;  %v10795_v32 = vld [vmem:[#allocation68_spill] sm:$0xff]  ;;  %v10796_v63 = vld [vmem:[#allocation69_spill] sm:$0xff] }
 0x2c1   : > { %v2382_v24 = vrot.slane %v2380_v20, 5  ;;  %v9681_v36 = vadd.f32 %v6474_v14, %v4342_v15  ;;  %v5978_v60 = vcombine.low %v7178_v39, %v7179_v46  ;;  %v2754_v31 = vrot.slane %v2749_v62, 4  ;;  %v10797_v27 = vld [vmem:[#allocation32_spill] sm:$0xff] }
 0x2c2   : > { %10791 = vst [vmem:[#allocation90_spill] sm:$0xff] %v9677_v0  ;;  %v2752_v59 = vor.u32 %v10792_v34, %v2749_v62  ;;  %v5897_v10 = vrot.slane %v2742_v28, 11  ;;  %v10794_v55 = vshll.u32 %v9621_v44, 16  ;;  %v2831_v41 = vor.u32 %v10796_v63, %v10795_v32  ;;  %v9689_v0 = vpop.f32.mrb[36].mxu1  ;;  %v10799_v20 = vld [vmem:[#allocation96_spill] sm:$0xff]  ;;  %v10800_v34 = vld [vmem:[#allocation26_spill] sm:$0xff] }
 0x2c3   : > { %10793 = vst [vmem:[#allocation91_spill] sm:$0xff] %v9681_v36  ;;  %v10798_v37 = vshll.u32 %v10797_v27, 16  ;;  %v2383_v14 = vsel %vm7721_vm11, %v2378_v13, %v2382_v24  ;;  %v2839_v15 = vshll.u32 %v2787_v21, 16  ;;  %v6371_v39 = vadd.f32 %v10800_v34, %v10799_v20  ;;  %v9697_v28 = vpop.f32.mrb[37].mxu1  ;;  %v9704_v63 = vld [vmem:[#allocation2 + $0x114] sm:$0xf] }
 0x2c4   : > { %v2761_v2 = vor.u32 %v10794_v55, %v2758_v57  ;;  %v6477_v62 = vadd.f32 %v9485_v43, %v9479_v18  ;;  %v5994_v57 = vcombine.low %v2375_v40, %v2383_v14  ;;  %v4347_v46 = vadd.f32 %v6365_v3, %v9417_v6  ;;  %10801 = vst [vmem:[#allocation92_spill] sm:$0xff] %v9704_v63  ;;  %v9706_v13 = vld [vmem:[#allocation2 + $0x118] sm:$0xf]  ;;  %v9708_v21 = vpop.f32.mrb[92].mxu0  ;;  %v9710_v24 = vpop.f32.mrb[38].mxu1  ;;  %v10819_v44 = vld [vmem:[#allocation33_spill] sm:$0xff] }
 0x2c5   : > { %v2833_v35 = vrot.slane %v10798_v37, 5  ;;  %v2753_v55 = vsel %vm7704_vm8, %v5897_v10, %v2752_v59  ;;  %10802 = vst [vmem:[#allocation68_spill] sm:$0xff] %v9706_v13  ;;  %v2832_v43 = vrot.slane %v2831_v41, 4  ;;  %v10803_v27 = vld [vmem:[#allocation71_spill] sm:$0xff]  ;;  %v2841_v37 = vrot.slane %v2839_v15, 5  ;;  %v9713_v3 = vpop.f32.mrb[93].mxu0 }
 0x2c6   : > { %v2762_v32 = vsel %vm7704_vm8, %v2754_v31, %v2761_v2  ;;  %v9715_v14 = vpop.f32.mrb[39].mxu1  ;;  %4754 = vmatprep.mubr.bf16.mxu1 %v5994_v57  ;;  %v4350_v2 = vadd.f32 %v6368_v51, %v9417_v6  ;;  %v9718_v31 = vadd.f32 %v6477_v62, %v4347_v46  ;;  %v10805_v59 = vld [vmem:[#allocation98_spill] sm:$0xff]  ;;  %v6480_v20 = vadd.f32 %v9501_v61, %v9490_v5  ;;  %v9724_v34 = vpop.f32.mrb[94].mxu0 }
 0x2c7   : > { %v6009_v18 = vcombine.low %v2753_v55, %v2762_v32  ;;  %v2836_v40 = vor.u32 %v10803_v27, %v2833_v35  ;;  %v6374_v10 = vadd.f32 %v10805_v59, %v9402_v33  ;;  %v10806_v41 = vshrl.u32 %v9549_v8, 16  ;;  %4755 = vmatmul.mubr.bf16.gmra.mrb[124].mxu1 %v5978_v60  ;;  %v9732_v62 = vpop.f32.mrb[95].mxu0  ;;  %v2788_v60 = vld [vmem:[#allocation2 + $0x5c] sm:$0x1] }
 0x2c8   : > { %10804 = vst [vmem:[#allocation69_spill] sm:$0xff] %v9718_v31  ;;  %v10489_v57 = vshrl.u32 %v9704_v63, 16  ;;  %v10490_v51 = vshrl.u32 %v9706_v13, 16  ;;  %v10808_v33 = vshrl.u32 %v9611_v38, 16  ;;  %v9738_v61 = vadd.f32 %v6480_v20, %v4350_v2  ;;  %v2789_v20 = vld [vmem:[#allocation2 + $0x6c] sm:$0x1] }
 0x2c9   : > { %v9728_v15 = vrot.slane %v10806_v41, 4  ;;  %4908 = vmatmul.mubr.bf16.gmra.mrb[184].mxu0 %v6009_v18  ;;  %v2837_v55 = vrot.slane %v2836_v40, 4  ;;  %v6026_v32 = vcombine.low %v9704_v63, %v9706_v13  ;;  %v897_v18 = vld [vmem:[#allocation2 + $0x110] sm:$0x8]  ;;  %v2834_v27 = vsel %vm7721_vm11, %v2832_v43, %v2833_v35  ;;  %v10812_v31 = vld [vmem:[#allocation72_spill] sm:$0xff] }
 0x2ca   : > { %v9736_v46 = vrot.slane %v10808_v33, 4  ;;  %10810 = vst [vmem:[#allocation26_spill] sm:$0xff] %v9738_v61  ;;  %v2771_v59 = vrot.slane %v10489_v57, 7  ;;  %v2780_v2 = vrot.slane %v10490_v51, 7  ;;  %v4355_v33 = vadd.f32 %v6371_v39, %v9417_v6  ;;  %v10811_v61 = vld [vmem:[#allocation63_spill] sm:$0xff] }
 0x2cb   : > { %10807 = vst [vmem:[#allocation32_spill] sm:$0xff] %v9728_v15  ;;  %v2842_v40 = vsel %vm7721_vm11, %v2837_v55, %v2841_v37  ;;  %4915 = vmatprep.mubr.bf16.mxu0 %v6026_v32  ;;  %v2848_v35 = vsel %vm7721_vm11, %v10812_v31, %v10811_v61  ;;  %v2785_v43 = vld [vmem:[#allocation2 + $0x2c] sm:$0x1]  ;;  %v4358_v37 = vadd.f32 %v6374_v10, %v9417_v6  ;;  %v2853_v55 = vshll.u32 %v2788_v60, 16  ;;  %v10816_v32 = vld [vmem:[#allocation76_spill] sm:$0xff] }
 0x2cc   : > { %10809 = vst [vmem:[#allocation96_spill] sm:$0xff] %v9736_v46  ;;  %v6029_v41 = vcombine.low %v2834_v27, %v2842_v40  ;;  %v898_v36 = vsel %vm7683_vm3, 0, %v897_v18  ;;  %v2776_v51 = vrot.slane %v2771_v59, 4  ;;  %v10814_v39 = vshll.u32 %v9706_v13, 16  ;;  %v10815_v40 = vld [vmem:[#allocation75_spill] sm:$0xff]  ;;  %v10817_v46 = vld [vmem:[#allocation65_spill] sm:$0xff] }
 0x2cd   : > { %899 = vst [vmem:[#allocation2 + $0x110] sm:$0x8] %v898_v36  ;;  %v2859_v5 = vor.u32 %v10816_v32, %v10815_v40  ;;  %v10818_v15 = vshll.u32 %v10817_v46, 16  ;;  %v2867_v31 = vshll.u32 %v2789_v20, 16  ;;  %v2855_v61 = vrot.slane %v2853_v55, 5  ;;  %v10820_v10 = vld [vmem:[#allocation36_spill] sm:$0xff] }
 0x2ce   : > { %6839 = vmatprep.mubr.bf16.mxu1 %v6029_v41  ;;  %v2783_v27 = vor.u32 %v10814_v39, %v2780_v2  ;;  %v2803_v60 = vor.u32 %v10820_v10, %v10819_v44  ;;  %v10822_v57 = vshll.u32 %v10821_v26, 16  ;;  %v2811_v45 = vshll.u32 %v2785_v43, 16  ;;  %v9770_v41 = vpop.f32.mrb[40].mxu1  ;;  %v10824_v13 = vld [vmem:[#allocation77_spill] sm:$0xff]  ;;  %v9775_v46 = vpop.f32.mrb[96].mxu0  ;;  %v10827_v55 = vld [vmem:[#allocation64_spill] sm:$0xff] }
 0x2cf   : > { %v2861_v8 = vrot.slane %v10818_v15, 5  ;;  %v10823_v36 = vshll.u32 %v9704_v63, 16  ;;  %v2860_v39 = vrot.slane %v2859_v5, 4  ;;  %v2869_v32 = vrot.slane %v2867_v31, 5  ;;  %v9777_v15 = vpop.f32.mrb[41].mxu1  ;;  %v10826_v20 = vld [vmem:[#allocation73_spill] sm:$0xff] }
 0x2d0   : > { %v2805_v18 = vrot.slane %v10822_v57, 5  ;;  %10825 = vst [vmem:[#allocation71_spill] sm:$0xff] %v9777_v15  ;;  %v2856_v44 = vsel %vm7721_vm11, %v10826_v20, %v2855_v61  ;;  %v2804_v26 = vrot.slane %v2803_v60, 4  ;;  %v2813_v10 = vrot.slane %v2811_v45, 5  ;;  %v9783_v57 = vpop.f32.mrb[97].mxu0  ;;  %v9785_v63 = vpop.f32.mrb[42].mxu1 }
 0x2d1   : > { %v2774_v2 = vor.u32 %v10823_v36, %v2771_v59  ;;  %v2864_v40 = vor.u32 %v10824_v13, %v2861_v8  ;;  %v6030_v5 = vcombine.low %v2848_v35, %v2856_v44  ;;  %v2784_v13 = vsel %vm7704_vm8, %v2776_v51, %v2783_v27  ;;  %v9791_v36 = vpop.f32.mrb[98].mxu0  ;;  %v9793_v15 = vpop.f32.mrb[43].mxu1  ;;  %v10828_v27 = vld [vmem:[#allocation79_spill] sm:$0xff] }
 0x2d2   : > { %v2808_v43 = vor.u32 %v10827_v55, %v2805_v18  ;;  %v6377_v31 = vadd.f32 %v9481_v50, %v9471_v1  ;;  %v2862_v61 = vsel %vm7721_vm11, %v2860_v39, %v2861_v8  ;;  %v6483_v60 = vadd.f32 %v9560_v23, %v9555_v16  ;;  %v9801_v20 = vpop.f32.mrb[99].mxu0  ;;  %v2790_v8 = vld [vmem:[#allocation2 + $0x7c] sm:$0x1]  ;;  %v10829_v39 = vld [vmem:[#allocation80_spill] sm:$0xff] }
 0x2d3   : > { %v2865_v59 = vrot.slane %v2864_v40, 4  ;;  %v6380_v35 = vadd.f32 %v9492_v56, %v9487_v54  ;;  %6840 = vmatmul.mubr.bf16.vlgmr.msra.gmra.mrb[128].mxu1 %v6030_v5  ;;  %v2806_v50 = vsel %vm7721_vm11, %v2804_v26, %v2805_v18  ;;  %v6486_v51 = vadd.f32 %v9580_v9, %v9571_v30  ;;  %v2786_v16 = vld [vmem:[#allocation2 + $0x3c] sm:$0x1]  ;;  %v10831_v30 = vld [vmem:[#allocation70_spill] sm:$0xff] }
 0x2d4   : > { %v2809_v45 = vrot.slane %v2808_v43, 4  ;;  %v2873_v40 = vor.u32 %v10829_v39, %v10828_v27  ;;  %v2430_v23 = vld [vmem:[#allocation2 + $0x110] sm:$0x8]  ;;  %v4363_v56 = vadd.f32 %v6377_v31, %v9417_v6  ;;  %v9814_v55 = vadd.f32 %v6483_v60, %v4355_v33  ;;  %v10833_v39 = vld [vmem:[#allocation28_spill] sm:$0xff]  ;;  %v10835_v33 = vld [vmem:[#allocation83_spill] sm:$0xff] }
 0x2d5   : > { %v2870_v1 = vsel %vm7721_vm11, %v2865_v59, %v2869_v32  ;;  %v2791_v32 = vld [vmem:[#allocation2 + $0x8c] sm:$0x1]  ;;  %v2764_v43 = vshrl.u32 %v2430_v23, 16  ;;  %v9816_v26 = vadd.f32 %v6486_v51, %v4358_v37  ;;  %v10832_v5 = vshll.u32 %v10831_v30, 16  ;;  %v10836_v60 = vld [vmem:[#allocation84_spill] sm:$0xff]  ;;  %v10837_v23 = vld [vmem:[#allocation74_spill] sm:$0xff] }
 0x2d6   : > { %v6031_v44 = vcombine.low %v2862_v61, %v2870_v1  ;;  %v2814_v54 = vsel %vm7721_vm11, %v2809_v45, %v2813_v10  ;;  %v2874_v9 = vrot.slane %v2873_v40, 4  ;;  %v2881_v27 = vshll.u32 %v2790_v8, 16  ;;  %v10834_v61 = vld [vmem:[#allocation66_spill] sm:$0xff] }
 0x2d7   : > { %v6027_v18 = vcombine.low %v2806_v50, %v2814_v54  ;;  %10830 = vst [vmem:[#allocation98_spill] sm:$0xff] %v9816_v26  ;;  %v2875_v59 = vrot.slane %v10832_v5, 5  ;;  %v2820_v10 = vsel %vm7721_vm11, %v10834_v61, %v10833_v39  ;;  %v2825_v45 = vshll.u32 %v2786_v16, 16  ;;  %v9830_v5 = vpop.f32.mrb[44].mxu1 }
 0x2d8   : > { %6843 = vmatprep.mubr.bf16.mxu1 %v6031_v44  ;;  %v5898_v31 = vrot.slane %v2764_v43, 11  ;;  %v2887_v1 = vor.u32 %v10836_v60, %v10835_v33  ;;  %v10838_v50 = vshll.u32 %v10837_v23, 16  ;;  %v2895_v51 = vshll.u32 %v2791_v32, 16  ;;  %v10839_v44 = vld [vmem:[#allocation81_spill] sm:$0xff]  ;;  %v9835_v33 = vpop.f32.mrb[45].mxu1  ;;  %v10841_v32 = vld [vmem:[#allocation67_spill] sm:$0xff] }
 0x2d9   : > { %v4366_v40 = vadd.f32 %v6380_v35, %v9417_v6  ;;  %v2878_v54 = vor.u32 %v10839_v44, %v2875_v59  ;;  %v2883_v30 = vrot.slane %v2881_v27, 5  ;;  %v2827_v8 = vrot.slane %v2825_v45, 5  ;;  %v10840_v43 = vld [vmem:[#allocation85_spill] sm:$0xff]  ;;  %v9842_v45 = vpop.f32.mrb[100].mxu0 }
 0x2da   : > { %v2889_v37 = vrot.slane %v10838_v50, 5  ;;  %v2775_v39 = vsel %vm7704_vm8, %v5898_v31, %v2774_v2  ;;  %v2888_v16 = vrot.slane %v2887_v1, 4  ;;  %v2897_v26 = vrot.slane %v2895_v51, 5  ;;  %v9844_v50 = vpop.f32.mrb[46].mxu1  ;;  %v9850_v1 = vpop.f32.mrb[101].mxu0 }
 0x2db   : > { %v6010_v60 = vcombine.low %v2775_v39, %v2784_v13  ;;  %v2879_v23 = vrot.slane %v2878_v54, 4  ;;  %v2828_v35 = vsel %vm7721_vm11, %v10841_v32, %v2827_v8  ;;  %v6383_v27 = vadd.f32 %v9551_v42, %v9543_v47  ;;  %v9852_v51 = vpop.f32.mrb[47].mxu1  ;;  %v10843_v8 = vld [vmem:[#allocation88_spill] sm:$0xff]  ;;  %v10848_v32 = vld [vmem:[#allocation82_spill] sm:$0xff] }
 0x2dc   : > { %v2892_v61 = vor.u32 %v10840_v43, %v2889_v37  ;;  %v2876_v4 = vsel %vm7721_vm11, %v2874_v9, %v2875_v59  ;;  %v6028_v2 = vcombine.low %v2820_v10, %v2828_v35  ;;  %v6489_v13 = vadd.f32 %v9638_v17, %v9627_v7  ;;  %v2792_v59 = vld [vmem:[#allocation2 + $0x9c] sm:$0x1]  ;;  %v9862_v10 = vpop.f32.mrb[102].mxu0 }
 0x2dd   : > { %4916 = vmatmul.mubr.bf16.gmra.mrb[188].mxu0 %v6010_v60  ;;  %v2884_v47 = vsel %vm7721_vm11, %v2879_v23, %v2883_v30  ;;  %v2890_v42 = vsel %vm7721_vm11, %v2888_v16, %v2889_v37  ;;  %v6386_v44 = vadd.f32 %v9562_v12, %v9557_v49  ;;  %v6492_v9 = vadd.f32 %v9657_v19, %v9648_v48  ;;  %v10842_v30 = vld [vmem:[#allocation87_spill] sm:$0xff]  ;;  %v2793_v37 = vld [vmem:[#allocation2 + $0xac] sm:$0x1]  ;;  %v9870_v16 = vpop.f32.mrb[103].mxu0  ;;  %v10844_v48 = vld [vmem:[#allocation78_spill] sm:$0xff] }
 0x2de   : > { %v2893_v31 = vrot.slane %v2892_v61, 4  ;;  %6835 = vmatprep.mubr.bf16.mxu0 %v6027_v18  ;;  %v6032_v7 = vcombine.low %v2876_v4, %v2884_v47  ;;  %v9866_v54 = vadd.f32 %v6489_v13, %v4363_v56  ;;  %v2901_v39 = vor.u32 %v10843_v8, %v10842_v30  ;;  %v10847_v56 = vld [vmem:[#allocation94_spill] sm:$0xff]  ;;  %v2794_v8 = vld [vmem:[#allocation2 + $0xbc] sm:$0x1] }
 0x2df   : > { %v4371_v12 = vadd.f32 %v6383_v27, %v9417_v6  ;;  %v9873_v19 = vadd.f32 %v6492_v9, %v4366_v40  ;;  %v10845_v43 = vshll.u32 %v10844_v48, 16  ;;  %v2909_v60 = vshll.u32 %v2792_v59, 16 }
 0x2e0   : > { %v2898_v17 = vsel %vm7721_vm11, %v2893_v31, %v2897_v26  ;;  %6844 = vmatmul.mubr.bf16.gmra.mrb[132].mxu1 %v6032_v7  ;;  %v2902_v61 = vrot.slane %v2901_v39, 4  ;;  %v10846_v26 = vld [vmem:[#allocation93_spill] sm:$0xff]  ;;  %v10849_v35 = vshll.u32 %v10848_v32, 16  ;;  %v2923_v47 = vshll.u32 %v2793_v37, 16 }
 0x2e1   : > { %v6033_v49 = vcombine.low %v2890_v42, %v2898_v17  ;;  %v2903_v18 = vrot.slane %v10845_v43, 5  ;;  %v2915_v23 = vor.u32 %v10847_v56, %v10846_v26  ;;  %v10850_v31 = vld [vmem:[#allocation89_spill] sm:$0xff]  ;;  %v6389_v40 = vadd.f32 %v9629_v53, %v9623_v58  ;;  %v10852_v17 = vld [vmem:[#allocation95_spill] sm:$0xff]  ;;  %v10855_v26 = vld [vmem:[#allocation86_spill] sm:$0xff] }
 0x2e2   : > { %v2917_v4 = vrot.slane %v10849_v35, 5  ;;  %v6495_v27 = vadd.f32 %v9713_v3, %v9708_v21  ;;  %v10851_v42 = vshll.u32 %v9611_v38, 16  ;;  %v2911_v59 = vrot.slane %v2909_v60, 5  ;;  %v10853_v43 = vld [vmem:[#allocation97_spill] sm:$0xff] }
 0x2e3   : > { %6847 = vmatprep.mubr.bf16.mxu1 %v6033_v49  ;;  %v2906_v13 = vor.u32 %v10850_v31, %v2903_v18  ;;  %v2916_v7 = vrot.slane %v2915_v23, 4  ;;  %v4374_v39 = vadd.f32 %v6386_v44, %v9417_v6  ;;  %v2925_v48 = vrot.slane %v2923_v47, 5  ;;  %v10854_v44 = vld [vmem:[#allocation99_spill] sm:$0xff]  ;;  %v2795_v32 = vld [vmem:[#allocation2 + $0xcc] sm:$0x1] }
 0x2e4   : > { %v9888_v9 = vrot.slane %v10851_v42, 5  ;;  %v2920_v30 = vor.u32 %v10852_v17, %v2917_v4  ;;  %v9892_v37 = vadd.f32 %v6495_v27, %v4371_v12  ;;  %v2904_v58 = vsel %vm7721_vm11, %v2902_v61, %v2903_v18  ;;  %v9906_v18 = vpop.f32.mrb[104].mxu0  ;;  %v9908_v61 = vpop.f32.mrb[48].mxu1  ;;  %v10857_v47 = vld [vmem:[#allocation59_spill] sm:$0xff] }
 0x2e5   : > { %v2907_v49 = vrot.slane %v2906_v13, 4  ;;  %v6392_v38 = vadd.f32 %v9650_v22, %v9640_v52  ;;  %v6498_v21 = vadd.f32 %v9732_v62, %v9724_v34  ;;  %6836 = vmatmul.mubr.bf16.vlgmr.msra.gmra.mrb[192].mxu0 %v6028_v2  ;;  %v2929_v60 = vor.u32 %v10854_v44, %v10853_v43  ;;  %v9916_v2 = vpop.f32.mrb[105].mxu0  ;;  %v9918_v35 = vpop.f32.mrb[49].mxu1 }
 0x2e6   : > { %v2921_v53 = vrot.slane %v2920_v30, 4  ;;  %v10856_v12 = vshll.u32 %v10855_v26, 16  ;;  %v2937_v23 = vshll.u32 %v2794_v8, 16  ;;  %v2918_v22 = vsel %vm7721_vm11, %v2916_v7, %v2917_v4  ;;  %v9923_v17 = vpop.f32.mrb[50].mxu1  ;;  %v10858_v4 = vld [vmem:[#allocation62_spill] sm:$0xff]  ;;  %v10859_v7 = vld [vmem:[#allocation100_spill] sm:$0xff] }
 0x2e7   : > { %v2912_v3 = vsel %vm7721_vm11, %v2907_v49, %v2911_v59  ;;  %v9914_v62 = vadd.f32 %v6498_v21, %v4374_v39  ;;  %v2930_v13 = vrot.slane %v2929_v60, 4  ;;  %v9921_v59 = vpop.f32.mrb[106].mxu0  ;;  %v2943_v30 = vor.u32 %v10859_v7, %v10858_v4  ;;  %v10867_v4 = vld [vmem:[#allocation101_spill] sm:$0xff] }
 0x2e8   : > { %v2931_v56 = vrot.slane %v10856_v12, 5  ;;  %v6034_v52 = vcombine.low %v2904_v58, %v2912_v3  ;;  %v2926_v34 = vsel %vm7721_vm11, %v2921_v53, %v2925_v48  ;;  %v2939_v42 = vrot.slane %v2937_v23, 5  ;;  %v9931_v58 = vpop.f32.mrb[107].mxu0  ;;  %v9933_v53 = vpop.f32.mrb[51].mxu1 }
 0x2e9   : > { %v6035_v31 = vcombine.low %v2918_v22, %v2926_v34  ;;  %v10860_v8 = vshll.u32 %v9330_v29, 16  ;;  %v2951_v49 = vshll.u32 %v2795_v32, 16  ;;  %v6395_v48 = vadd.f32 %v9697_v28, %v9689_v0  ;;  %v2796_v28 = vld [vmem:[#allocation2 + $0xdc] sm:$0x1] }
 0x2ea   : > { %v2934_v27 = vor.u32 %v10857_v47, %v2931_v56  ;;  %6848 = vmatmul.mubr.bf16.gmra.mrb[136].mxu1 %v6034_v52  ;;  %v4379_v21 = vadd.f32 %v6389_v40, %v9417_v6  ;;  %v6501_v43 = vadd.f32 %v9783_v57, %v9775_v46  ;;  %v6398_v44 = vadd.f32 %v9715_v14, %v9710_v24  ;;  %v2797_v57 = vld [vmem:[#allocation2 + $0xec] sm:$0x1]  ;;  %v10862_v32 = vld [vmem:[#allocation103_spill] sm:$0xff]  ;;  %v10865_v47 = vld [vmem:[#allocation108_spill] sm:$0xff] }
 0x2eb   : > { %v2945_v39 = vrot.slane %v10860_v8, 5  ;;  %6851 = vmatprep.mubr.bf16.mxu1 %v6035_v31  ;;  %v4382_v29 = vadd.f32 %v6392_v38, %v9417_v6  ;;  %v2944_v60 = vrot.slane %v2943_v30, 4  ;;  %v2953_v0 = vrot.slane %v2951_v49, 5  ;;  %v10869_v49 = vld [vmem:[#allocation107_spill] sm:$0xff] }
 0x2ec   : > { %v2935_v3 = vrot.slane %v2934_v27, 4  ;;  %v2932_v12 = vsel %vm7721_vm11, %v2930_v13, %v2931_v56  ;;  %v9946_v23 = vadd.f32 %v6501_v43, %v4379_v21  ;;  %v6504_v46 = vadd.f32 %v9801_v20, %v9791_v36  ;;  %v10863_v56 = vld [vmem:[#allocation29_spill] sm:$0xff] }
 0x2ed   : > { %v2948_v26 = vor.u32 %v9496_v11, %v2945_v39  ;;  %v2946_v14 = vsel %vm7721_vm11, %v2944_v60, %v2945_v39  ;;  %v10861_v11 = vld [vmem:[#allocation102_spill] sm:$0xff]  ;;  %v10864_v34 = vshll.u32 %v10863_v56, 16  ;;  %v2965_v13 = vshll.u32 %v2796_v28, 16  ;;  %v10866_v27 = vld [vmem:[#allocation109_spill] sm:$0xff] }
 0x2ee   : > { %v2940_v40 = vsel %vm7721_vm11, %v2935_v3, %v2939_v42  ;;  %v2957_v52 = vor.u32 %v10862_v32, %v10861_v11  ;;  %v9954_v22 = vadd.f32 %v6504_v46, %v4382_v29  ;;  %v2971_v42 = vor.u32 %v10866_v27, %v10865_v47  ;;  %v10870_v29 = vld [vmem:[#allocation112_spill] sm:$0xff]  ;;  %v10872_v28 = vld [vmem:[#allocation113_spill] sm:$0xff]  ;;  %v10873_v46 = vld [vmem:[#allocation71_spill] sm:$0xff]  ;;  %v6517_v32 = vpop.f32.mrb[108].mxu0 }
 0x2ef   : > { %v6036_v24 = vcombine.low %v2932_v12, %v2940_v40  ;;  %v2949_v38 = vrot.slane %v2948_v26, 4  ;;  %v2959_v31 = vrot.slane %v10864_v34, 5  ;;  %v10868_v7 = vshll.u32 %v10867_v4, 16  ;;  %v2798_v34 = vld [vmem:[#allocation2 + $0xfc] sm:$0x1] }
 0x2f0   : > { %v2958_v20 = vrot.slane %v2957_v52, 4  ;;  %v2979_v8 = vshll.u32 %v2797_v57, 16  ;;  %v2967_v3 = vrot.slane %v2965_v13, 5  ;;  %v2972_v43 = vrot.slane %v2971_v42, 4  ;;  %v6518_v13 = vpop.f32.mrb[109].mxu0 }
 0x2f1   : > { %v2954_v36 = vsel %vm7721_vm11, %v2949_v38, %v2953_v0  ;;  %v2973_v30 = vrot.slane %v10868_v7, 5  ;;  %v2962_v21 = vor.u32 %v10869_v49, %v2959_v31  ;;  %v10871_v60 = vshrl.u32 %v10870_v29, 16  ;;  %v2799_v47 = vld [vmem:[#allocation2 + $0x10c] sm:$0x1]  ;;  %v6520_v27 = vpop.f32.mrb[110].mxu0  ;;  %v10879_v49 = vld [vmem:[#allocation96_spill] sm:$0xff] }
 0x2f2   : > { %v6037_v39 = vcombine.low %v2946_v14, %v2954_v36  ;;  %6852 = vmatmul.mubr.bf16.gmra.mrb[140].mxu1 %v6036_v24  ;;  %v2981_v40 = vrot.slane %v2979_v8, 5  ;;  %v6401_v0 = vadd.f32 %v10873_v46, %v9770_v41  ;;  %v4387_v38 = vadd.f32 %v6395_v48, %v9417_v6  ;;  %v10877_v36 = vld [vmem:[#allocation115_spill] sm:$0xff]  ;;  %v6521_v4 = vpop.f32.mrb[111].mxu0  ;;  %v10878_v8 = vld [vmem:[#allocation32_spill] sm:$0xff] }
 0x2f3   : > { %v3003_v26 = vrot.slane %v10871_v60, 4  ;;  %v2976_v12 = vor.u32 %v10872_v28, %v2973_v30  ;;  %v2963_v11 = vrot.slane %v2962_v21, 4  ;;  %v6507_v57 = vadd.f32 %v9850_v1, %v9842_v45 }
 0x2f4   : > { %6855 = vmatprep.mubr.bf16.mxu1 %v6037_v39  ;;  %v6404_v14 = vadd.f32 %v9793_v15, %v9785_v63  ;;  %v4390_v52 = vadd.f32 %v6398_v44, %v9417_v6  ;;  %v2960_v24 = vsel %vm7721_vm11, %v2958_v20, %v2959_v31  ;;  %v6510_v41 = vadd.f32 %v9870_v16, %v9862_v10  ;;  %v10874_v63 = vld [vmem:[#allocation106_spill] sm:$0xff] }
 0x2f5   : > { %v2977_v56 = vrot.slane %v2976_v12, 4  ;;  %v2968_v48 = vsel %vm7721_vm11, %v2963_v11, %v2967_v3  ;;  %v2974_v45 = vsel %vm7721_vm11, %v2972_v43, %v2973_v30  ;;  %v9984_v1 = vadd.f32 %v6507_v57, %v4387_v38  ;;  %v10876_v16 = vld [vmem:[#allocation114_spill] sm:$0xff]  ;;  %v840_v11 = vld [vmem:[#allocation2 + $0x11c] sm:$0x1] }
 0x2f6   : > { %v10875_v15 = vshll.u32 %v10874_v63, 16  ;;  %v6038_v31 = vcombine.low %v2960_v24, %v2968_v48  ;;  %v9990_v10 = vadd.f32 %v6510_v41, %v4390_v52  ;;  %v2985_v20 = vor.u32 %v10877_v36, %v10876_v16  ;;  %v7138_v24 = vld [vmem:[#allocation10] sm:$0xff]   ;;  %v6417_v41 = vpop.f32.mrb[52].mxu1 }
 0x2f7   : > { %v2982_v42 = vsel %vm7721_vm11, %v2977_v56, %v2981_v40  ;;  %v2993_v39 = vshll.u32 %v2798_v34, 16  ;;  %v2999_v21 = vor.u32 %v9888_v9, %v10879_v49  ;;  %v10880_v3 = vshll.u32 %v10870_v29, 16  ;;  %6867 = vmatprep.subr.bf16.mxu1 %v7138_v24 }
 0x2f8   : > { %v2987_v44 = vrot.slane %v10875_v15, 5  ;;  %v6039_v7 = vcombine.low %v2974_v45, %v2982_v42  ;;  %v3007_v60 = vshll.u32 %v2799_v47, 16  ;;  %v6407_v28 = vadd.f32 %v9835_v33, %v9830_v5  ;;  %6868 = vmatpush3.bf16.msra.mxu1 %v7138_v24 }
 0x2f9   : > { %v3001_v43 = vrot.slane %v10880_v3, 5  ;;  %v4395_v12 = vadd.f32 %v6401_v0, %v9417_v6  ;;  %v2995_v46 = vrot.slane %v2993_v39, 5  ;;  %v6513_v38 = vadd.f32 %v9916_v2, %v9906_v18  ;;  %v10885_v39 = vld [vmem:[#allocation68_spill] sm:$0xff] }
 0x2fa   : > { %v2990_v30 = vor.u32 %v10878_v8, %v2987_v44  ;;  %6856 = vmatmul.mubr.bf16.gmra.mrb[144].mxu1 %v6038_v31  ;;  %v4398_v57 = vadd.f32 %v6404_v14, %v9417_v6  ;;  %v3009_v9 = vrot.slane %v3007_v60, 5  ;;  %v6410_v29 = vadd.f32 %v9852_v51, %v9844_v50  ;;  %v6418_v14 = vpop.f32.mrb[53].mxu1  ;;  %v6523_v8 = vpop.f32.mrb[112].mxu0 }
 0x2fb   : > { %v3004_v52 = vor.u32 %v3003_v26, %v3001_v43  ;;  %6859 = vmatprep.mubr.bf16.mxu1 %v6039_v7  ;;  %v2986_v56 = vrot.slane %v2985_v20, 4  ;;  %v3000_v5 = vrot.slane %v2999_v21, 4  ;;  %v10007_v33 = vadd.f32 %v6513_v38, %v4395_v12  ;;  %v6524_v60 = vpop.f32.mrb[113].mxu0  ;;  %v10046_v12 = vld [vmem:[%s10357_s4] ss:$0 sm:$0xff] }
 0x2fc   : > { %v2991_v40 = vrot.slane %v2990_v30, 4  ;;  %v6516_v0 = vadd.f32 %v9931_v58, %v9921_v59  ;;  %v4403_v2 = vadd.f32 %v6407_v28, %v9417_v6  ;;  %v841_v26 = vsel %vm7692_vm6, 0, %v840_v11  ;;  %v6420_v58 = vpop.f32.mrb[54].mxu1  ;;  %v7139_v30 = vld [vmem:[#allocation10 + $0x8] sm:$0xff]   ;;  %v6526_v38 = vpop.f32.mrb[114].mxu0 }
 0x2fd   : > { %v3005_v18 = vrot.slane %v3004_v52, 4  ;;  %v4406_v51 = vadd.f32 %v6410_v29, %v9417_v6  ;;  %842 = vst [vmem:[#allocation2 + $0x11c] sm:$0x1] %v841_v26  ;;  %v6413_v59 = vadd.f32 %v9918_v35, %v9908_v61  ;;  %v6519_v63 = vadd.f32 %v6518_v13, %v6517_v32  ;;  %v6421_v31 = vpop.f32.mrb[55].mxu1  ;;  %v10882_v32 = vld [vmem:[#allocation92_spill] sm:$0xff]  ;;  %6869 = vmatprep.subr.bf16.mxu1 %v7139_v30  ;;  %v6527_v52 = vpop.f32.mrb[115].mxu0 }
 0x2fe   : > { %v2996_v50 = vsel %vm7721_vm11, %v2991_v40, %v2995_v46  ;;  %v10017_v48 = vadd.f32 %v6516_v0, %v4398_v57  ;;  %v6416_v15 = vadd.f32 %v9933_v53, %v9923_v17  ;;  %v6522_v47 = vadd.f32 %v6521_v4, %v6520_v27  ;;  %v6423_v28 = vpop.f32.mrb[56].mxu1  ;;  %6870 = vmatpush3.bf16.msra.mxu1 %v7139_v30 }
 0x2ff   : > { %v3010_v45 = vsel %vm7721_vm11, %v3005_v18, %v3009_v9  ;;  %v2988_v6 = vsel %vm7721_vm11, %v2986_v56, %v2987_v44  ;;  %v3002_v42 = vsel %vm7721_vm11, %v3000_v5, %v3001_v43  ;;  %v10029_v36 = vadd.f32 %v6519_v63, %v4403_v2  ;;  %v6424_v11 = vpop.f32.mrb[57].mxu1 }
 0x300   : > { %v6040_v16 = vcombine.low %v2988_v6, %v2996_v50  ;;  %v10031_v61 = vadd.f32 %v6522_v47, %v4406_v51  ;;  %v6419_v35 = vadd.f32 %v6418_v14, %v6417_v41  ;;  %v6041_v20 = vcombine.low %v3002_v42, %v3010_v45  ;;  %v6426_v29 = vpop.f32.mrb[58].mxu1  ;;  %v7140_v14 = vld [vmem:[#allocation10 + $0x10] sm:$0xff]  }
 0x301   : > { %v6422_v7 = vadd.f32 %v6421_v31, %v6420_v58  ;;  %v10883_v17 = vshrl.u32 %v10882_v32, 16  ;;  %v10884_v13 = vshll.u32 %v10882_v32, 16  ;;  %v10886_v49 = vshrl.u32 %v10885_v39, 16  ;;  %v6427_v0 = vpop.f32.mrb[59].mxu1  ;;  %6871 = vmatprep.subr.bf16.mxu1 %v7140_v14 }
 0x302   : > { %6860 = vmatmul.mubr.bf16.gmra.mrb[148].mxu1 %v6040_v16  ;;  %v10887_v3 = vshll.u32 %v10885_v39, 16  ;;  %v4411_v40 = vadd.f32 %v10046_v12, %v6413_v59  ;;  %v6525_v46 = vadd.f32 %v6524_v60, %v6523_v8  ;;  %v6425_v9 = vadd.f32 %v6424_v11, %v6423_v28  ;;  %v6529_v59 = vpop.f32.mrb[116].mxu0  ;;  %v7141_v16 = vld [vmem:[#allocation10 + $0x18] sm:$0xff]  }
 0x303   : > { %6863 = vmatprep.mubr.bf16.mxu1 %v6041_v20  ;;  %v3011_v53 = vrot.slane %v10883_v17, 4  ;;  %v3012_v27 = vrot.slane %v10884_v13, 5  ;;  %v3017_v21 = vrot.slane %v10886_v49, 4  ;;  %v4414_v24 = vadd.f32 %v10046_v12, %v6416_v15  ;;  %v6530_v63 = vpop.f32.mrb[117].mxu0  ;;  %v6429_v15 = vpop.f32.mrb[60].mxu1  ;;  %6872 = vmatpush3.bf16.msra.mxu1 %v7140_v14 }
 0x304   : > { %v951_v44 = vld [vmem:[#allocation2 + $0x11c] sm:$0x1]  ;;  %v3015_v43 = vrot.slane %v10887_v3, 5  ;;  %v10050_v56 = vadd.f32 %v6525_v46, %v4411_v40  ;;  %v6528_v5 = vadd.f32 %v6527_v52, %v6526_v38  ;;  %v6428_v18 = vadd.f32 %v6427_v0, %v6426_v29  ;;  %v6532_v6 = vpop.f32.mrb[118].mxu0  ;;  %v6430_v42 = vpop.f32.mrb[61].mxu1  ;;  %6873 = vmatprep.subr.bf16.mxu1 %v7141_v16  ;;  %v7142_v46 = vld [vmem:[#allocation10 + $0x20] sm:$0xff]  }
 0x305   : > { %v952_v4 = vsel %vm7692_vm6, 0, %v951_v44  ;;  %v3013_v57 = vor.u32 %v3012_v27, %v3011_v53  ;;  %v4419_v47 = vadd.f32 %v10046_v12, %v6419_v35  ;;  %v6531_v31 = vadd.f32 %v6530_v63, %v6529_v59  ;;  %v6533_v32 = vpop.f32.mrb[119].mxu0  ;;  %v6432_v53 = vpop.f32.mrb[62].mxu1  ;;  %v10888_v29 = vld [vmem:[#allocation60_spill] sm:$0xff] }
 0x306   : > { %953 = vst [vmem:[#allocation2 + $0x11c] sm:$0x1] %v952_v4  ;;  %v3018_v41 = vor.u32 %v3017_v21, %v3015_v43  ;;  %v10052_v2 = vadd.f32 %v6528_v5, %v4414_v24  ;;  %v6431_v17 = vadd.f32 %v6430_v42, %v6429_v15  ;;  %v4422_v27 = vadd.f32 %v10046_v12, %v6422_v7  ;;  %v6433_v8 = vpop.f32.mrb[63].mxu1  ;;  %v6535_v39 = vpop.f32.mrb[120].mxu0  ;;  %v10890_v42 = vld [vmem:[#allocation104_spill] sm:$0xff] }
 0x307   : > { %v3014_v34 = vrot.slane %v3013_v57, 4  ;;  %v10060_v44 = vadd.f32 %v6531_v31, %v4419_v47  ;;  %v6534_v4 = vadd.f32 %v6533_v32, %v6532_v6  ;;  %v6434_v30 = vadd.f32 %v6433_v8, %v6432_v53  ;;  %6874 = vmatpush3.bf16.msra.mxu1 %v7141_v16  ;;  %v6536_v49 = vpop.f32.mrb[121].mxu0  ;;  %v6563_v25 = vpop.f32.mrb[64].mxu1  ;;  %v7143_v32 = vld [vmem:[#allocation10 + $0x28] sm:$0xff]  }
 0x308   : > { %v3019_v50 = vrot.slane %v3018_v41, 4  ;;  %v4427_v21 = vadd.f32 %v10046_v12, %v6425_v9  ;;  %v6537_v3 = vadd.f32 %v6536_v49, %v6535_v39  ;;  %v6564_v60 = vpop.f32.mrb[65].mxu1  ;;  %v4430_v38 = vadd.f32 %v10046_v12, %v6428_v18  ;;  %6875 = vmatprep.subr.bf16.mxu1 %v7142_v46  ;;  %v10889_v9 = vld [vmem:[#allocation61_spill] sm:$0xff] }
 0x309   : > { %v3016_v58 = vsel %vm7721_vm11, %v3014_v34, %v3015_v43  ;;  %v10062_v35 = vadd.f32 %v6534_v4, %v4422_v27  ;;  %v6538_v43 = vpop.f32.mrb[122].mxu0  ;;  %v6565_v7 = vadd.f32 %v6564_v60, %v6563_v25  ;;  %v6566_v40 = vpop.f32.mrb[66].mxu1  ;;  %v4435_v18 = vadd.f32 %v10046_v12, %v6431_v17  ;;  %v10892_v60 = vld [vmem:[#allocation110_spill] sm:$0xff] }
 0x30a   : > { %v6539_v28 = vpop.f32.mrb[123].mxu0  ;;  %v10066_v11 = vadd.f32 %v6537_v3, %v4427_v21  ;;  %v6567_v52 = vpop.f32.mrb[67].mxu1  ;;  %v4438_v63 = vadd.f32 %v10046_v12, %v6434_v30 }
 0x30b   : > { %v6540_v57 = vadd.f32 %v6539_v28, %v6538_v43  ;;  %v10069_v24 = vadd.f32 %v6565_v7, %v10888_v29  ;;  %v6568_v5 = vadd.f32 %v6567_v52, %v6566_v40  ;;  %6876 = vmatpush3.bf16.msra.mxu1 %v7142_v46  ;;  %v6541_v34 = vpop.f32.mrb[124].mxu0  ;;  %v10893_v40 = vld [vmem:[#allocation111_spill] sm:$0xff] }
 0x30c   : > { %v6542_v14 = vpop.f32.mrb[125].mxu0  ;;  %6877 = vmatprep.subr.bf16.mxu1 %v7143_v32 }
 0x30d   : > { %v2800_v26 = vld [vmem:[#allocation2 + $0x11c] sm:$0x1]  ;;  %v10071_v0 = vadd.f32 %v6540_v57, %v4430_v38  ;;  %v10074_v41 = vadd.f32 %v6568_v5, %v10889_v9  ;;  %v6544_v59 = vpop.f32.mrb[126].mxu0 }
 0x30e   : > { %v3021_v51 = vshll.u32 %v2800_v26, 16  ;;  %v6569_v26 = vpop.f32.mrb[68].mxu1  ;;  %v6545_v15 = vpop.f32.mrb[127].mxu0 }
 0x30f   : > { %v6546_v6 = vadd.f32 %v6545_v15, %v6544_v59  ;;  %6878 = vmatpush3.bf16.msra.mxu1 %v7143_v32  ;;  %v7144_v15 = vld [vmem:[#allocation10 + $0x30] sm:$0xff]  }
 0x310   : > { %v3023_v45 = vrot.slane %v3021_v51, 5  ;;  %v6543_v51 = vadd.f32 %v6542_v14, %v6541_v34  ;;  %v6675_v17 = vpop.f32.mrb[128].mxu0  ;;  %6879 = vmatprep.subr.bf16.mxu1 %v7144_v15 }
 0x311   : > { %v10081_v53 = vadd.f32 %v6546_v6, %v4438_v63  ;;  %v6676_v8 = vpop.f32.mrb[129].mxu0 }
 0x312   : > { %v3024_v20 = vsel %vm7721_vm11, %v3019_v50, %v3023_v45  ;;  %v6570_v50 = vpop.f32.mrb[69].mxu1  ;;  %v10078_v31 = vadd.f32 %v6543_v51, %v4435_v18  ;;  %v6677_v12 = vadd.f32 %v6676_v8, %v6675_v17  ;;  %v6678_v30 = vpop.f32.mrb[130].mxu0  ;;  %v10894_v51 = vld [vmem:[#allocation90_spill] sm:$0xff] }
 0x313   : > { %v6042_v13 = vcombine.low %v3016_v58, %v3024_v20  ;;  %v6571_v58 = vadd.f32 %v6570_v50, %v6569_v26  ;;  %v6572_v45 = vpop.f32.mrb[70].mxu1  ;;  %v6679_v21 = vpop.f32.mrb[131].mxu0  ;;  %6880 = vmatpush3.bf16.msra.mxu1 %v7144_v15 }
 0x314   : > { %v6573_v47 = vpop.f32.mrb[71].mxu1  ;;  %v6680_v43 = vadd.f32 %v6679_v21, %v6678_v30  ;;  %v10896_v21 = vld [vmem:[#allocation69_spill] sm:$0xff] }
 0x315   : > { %6864 = vmatmul.mubr.bf16.gmra.mrb[152].mxu1 %v6042_v13  ;;  %v4645_v16 = vadd.f32 %v6571_v58, %v10890_v42  ;;  %v6574_v20 = vadd.f32 %v6573_v47, %v6572_v45  ;;  %v10891_v13 = vld [vmem:[#allocation105_spill] sm:$0xff]  ;;  %v6575_v4 = vpop.f32.mrb[72].mxu1  ;;  %v10895_v45 = vld [vmem:[#allocation91_spill] sm:$0xff] }
 0x316   : > { %v6576_v39 = vpop.f32.mrb[73].mxu1 }
 0x317   : > { %v4648_v27 = vadd.f32 %v6574_v20, %v10891_v13  ;;  %v6577_v49 = vadd.f32 %v6576_v39, %v6575_v4  ;;  %v6578_v25 = vpop.f32.mrb[74].mxu1 }
 0x318   : > { %v6579_v3 = vpop.f32.mrb[75].mxu1  ;;  %v6681_v38 = vpop.f32.mrb[132].mxu0 }
 0x319   : > { %v4653_v28 = vadd.f32 %v6577_v49, %v10892_v60  ;;  %v6580_v7 = vadd.f32 %v6579_v3, %v6578_v25  ;;  %v6682_v52 = vpop.f32.mrb[133].mxu0 }
 0x31a   : > { %v6683_v5 = vadd.f32 %v6682_v52, %v6681_v38  ;;  %v6684_v9 = vpop.f32.mrb[134].mxu0  ;;  %v10897_v38 = vld [vmem:[#allocation26_spill] sm:$0xff] }
 0x31b   : > { %v4656_v46 = vadd.f32 %v6580_v7, %v10893_v40  ;;  %v6685_v14 = vpop.f32.mrb[135].mxu0  ;;  %v10094_v7 = vadd.f32 %v6677_v12, %v10069_v24 }
 0x31c   : > { %v6581_v57 = vpop.f32.mrb[76].mxu1  ;;  %v6686_v18 = vadd.f32 %v6685_v14, %v6684_v9  ;;  %v10088_v6 = vadd.f32 %v6683_v5, %v4645_v16  ;;  %v10102_v9 = vadd.f32 %v6680_v43, %v10074_v41  ;;  %v7145_v14 = vld [vmem:[#allocation10 + $0x38] sm:$0xff]   ;;  %v10898_v41 = vld [vmem:[#allocation98_spill] sm:$0xff] }
 0x31d   : > { %v6582_v29 = vpop.f32.mrb[77].mxu1  ;;  %6881 = vmatprep.subr.bf16.mxu1 %v7145_v14 }
 0x31e   : > { %v6583_v34 = vadd.f32 %v6582_v29, %v6581_v57  ;;  %v6584_v26 = vpop.f32.mrb[78].mxu1  ;;  %v10098_v40 = vadd.f32 %v6686_v18, %v4648_v27  ;;  %6882 = vmatpush3.bf16.msra.mxu1 %v7145_v14 }
 0x31f   : > { %v6585_v50 = vpop.f32.mrb[79].mxu1 }
 0x320   : > { %v4661_v59 = vadd.f32 %v6583_v34, %v10894_v51  ;;  %v6586_v58 = vadd.f32 %v6585_v50, %v6584_v26  ;;  %v6687_v47 = vpop.f32.mrb[136].mxu0 }
 0x321   : > { %v6688_v42 = vpop.f32.mrb[137].mxu0 }
 0x322   : > { %v4664_v63 = vadd.f32 %v6586_v58, %v10895_v45  ;;  %v6689_v32 = vadd.f32 %v6688_v42, %v6687_v47  ;;  %v6690_v13 = vpop.f32.mrb[138].mxu0 }
 0x323   : > { %v6691_v4 = vpop.f32.mrb[139].mxu0 }
 0x324   : > { %v6587_v20 = vpop.f32.mrb[80].mxu1  ;;  %v6692_v30 = vadd.f32 %v6691_v4, %v6690_v13  ;;  %v10090_v25 = vadd.f32 %v6689_v32, %v4653_v28 }
 0x325   : > { %v6588_v17 = vpop.f32.mrb[81].mxu1 }
 0x326   : > { %v6589_v8 = vadd.f32 %v6588_v17, %v6587_v20  ;;  %v6590_v39 = vpop.f32.mrb[82].mxu1  ;;  %v10096_v16 = vadd.f32 %v6692_v30, %v4656_v46 }
 0x327   : > { %v6591_v49 = vpop.f32.mrb[83].mxu1 }
 0x328   : > { %v4669_v3 = vadd.f32 %v6589_v8, %v10896_v21  ;;  %v6592_v60 = vadd.f32 %v6591_v49, %v6590_v39 }
 0x32a   : > { %v4672_v57 = vadd.f32 %v6592_v60, %v10897_v38 }
 0x32c   : > { %v6693_v52 = vpop.f32.mrb[140].mxu0 }
 0x32d   : > { %v6694_v29 = vpop.f32.mrb[141].mxu0  ;;  %v6593_v5 = vpop.f32.mrb[84].mxu1 }
 0x32e   : > { %v6695_v28 = vadd.f32 %v6694_v29, %v6693_v52  ;;  %v6696_v34 = vpop.f32.mrb[142].mxu0  ;;  %v6594_v26 = vpop.f32.mrb[85].mxu1 }
 0x32f   : > { %v6697_v50 = vpop.f32.mrb[143].mxu0  ;;  %v6595_v51 = vadd.f32 %v6594_v26, %v6593_v5  ;;  %v6596_v24 = vpop.f32.mrb[86].mxu1 }
 0x330   : > { %v6698_v12 = vadd.f32 %v6697_v50, %v6696_v34  ;;  %v6597_v46 = vpop.f32.mrb[87].mxu1  ;;  %v10104_v58 = vadd.f32 %v6695_v28, %v4661_v59 }
 0x331   : > { %v4677_v27 = vadd.f32 %v6595_v51, %v9814_v55  ;;  %v6598_v18 = vadd.f32 %v6597_v46, %v6596_v24 }
 0x332   : > { %v10107_v45 = vadd.f32 %v6698_v12, %v4664_v63 }
 0x333   : > { %v4680_v43 = vadd.f32 %v6598_v18, %v10898_v41 }
 0x336   : > { %v6699_v15 = vpop.f32.mrb[144].mxu0 }
 0x337   : > { %v6700_v47 = vpop.f32.mrb[145].mxu0 }
 0x338   : > { %v6701_v42 = vadd.f32 %v6700_v47, %v6699_v15  ;;  %v6702_v20 = vpop.f32.mrb[146].mxu0  ;;  %v6599_v32 = vpop.f32.mrb[88].mxu1 }
 0x339   : > { %v6703_v13 = vpop.f32.mrb[147].mxu0  ;;  %v6600_v17 = vpop.f32.mrb[89].mxu1 }
 0x33a   : > { %v6704_v4 = vadd.f32 %v6703_v13, %v6702_v20  ;;  %v6601_v8 = vadd.f32 %v6600_v17, %v6599_v32  ;;  %v6602_v59 = vpop.f32.mrb[90].mxu1  ;;  %v10110_v39 = vadd.f32 %v6701_v42, %v4669_v3 }
 0x33b   : > { %v6603_v30 = vpop.f32.mrb[91].mxu1 }
 0x33c   : > { %v4685_v55 = vadd.f32 %v6601_v8, %v9866_v54  ;;  %v6604_v49 = vadd.f32 %v6603_v30, %v6602_v59  ;;  %v10113_v63 = vadd.f32 %v6704_v4, %v4672_v57 }
 0x33e   : > { %v6705_v21 = vpop.f32.mrb[148].mxu0  ;;  %v4688_v60 = vadd.f32 %v6604_v49, %v9873_v19 }
 0x33f   : > { %v6706_v38 = vpop.f32.mrb[149].mxu0 }
 0x340   : > { %v6707_v52 = vadd.f32 %v6706_v38, %v6705_v21  ;;  %v6708_v29 = vpop.f32.mrb[150].mxu0 }
 0x341   : > { %v6709_v28 = vpop.f32.mrb[151].mxu0 }
 0x342   : > { %v6605_v5 = vpop.f32.mrb[92].mxu1  ;;  %v6710_v26 = vadd.f32 %v6709_v28, %v6708_v29  ;;  %v10116_v3 = vadd.f32 %v6707_v52, %v4677_v27 }
 0x343   : > { %v6606_v34 = vpop.f32.mrb[93].mxu1 }
 0x344   : > { %v6607_v14 = vadd.f32 %v6606_v34, %v6605_v5  ;;  %v6608_v50 = vpop.f32.mrb[94].mxu1  ;;  %v10119_v57 = vadd.f32 %v6710_v26, %v4680_v43 }
 0x345   : > { %v6609_v51 = vpop.f32.mrb[95].mxu1 }
 0x346   : > { %v4693_v54 = vadd.f32 %v6607_v14, %v9892_v37  ;;  %v6610_v24 = vadd.f32 %v6609_v51, %v6608_v50 }
 0x348   : > { %v6711_v12 = vpop.f32.mrb[152].mxu0  ;;  %v4696_v19 = vadd.f32 %v6610_v24, %v9914_v62 }
 0x349   : > { %v6712_v46 = vpop.f32.mrb[153].mxu0 }
 0x34a   : > { %v6713_v18 = vadd.f32 %v6712_v46, %v6711_v12  ;;  %v6714_v41 = vpop.f32.mrb[154].mxu0  ;;  %v6611_v15 = vpop.f32.mrb[96].mxu1 }
 0x34b   : > { %v6715_v47 = vpop.f32.mrb[155].mxu0  ;;  %v6612_v42 = vpop.f32.mrb[97].mxu1 }
 0x34c   : > { %v6716_v20 = vadd.f32 %v6715_v47, %v6714_v41  ;;  %v6613_v32 = vadd.f32 %v6612_v42, %v6611_v15  ;;  %v6614_v13 = vpop.f32.mrb[98].mxu1  ;;  %v10122_v27 = vadd.f32 %v6713_v18, %v4685_v55 }
 0x34d   : > { %v6615_v17 = vpop.f32.mrb[99].mxu1 }
 0x34e   : > { %v4701_v37 = vadd.f32 %v6613_v32, %v9946_v23  ;;  %v6616_v4 = vadd.f32 %v6615_v17, %v6614_v13  ;;  %v10125_v43 = vadd.f32 %v6716_v20, %v4688_v60 }
 0x350   : > { %v4704_v62 = vadd.f32 %v6616_v4, %v9954_v22 }
 0x352   : > { %v6717_v8 = vpop.f32.mrb[156].mxu0 }
 0x353   : > { %v6718_v59 = vpop.f32.mrb[157].mxu0 }
 0x354   : > { %v6719_v30 = vadd.f32 %v6718_v59, %v6717_v8  ;;  %v6720_v49 = vpop.f32.mrb[158].mxu0  ;;  %v6617_v21 = vpop.f32.mrb[100].mxu1 }
 0x355   : > { %v6721_v38 = vpop.f32.mrb[159].mxu0  ;;  %v6618_v52 = vpop.f32.mrb[101].mxu1 }
 0x356   : > { %v6722_v29 = vadd.f32 %v6721_v38, %v6720_v49  ;;  %v6619_v5 = vadd.f32 %v6618_v52, %v6617_v21  ;;  %v6620_v28 = vpop.f32.mrb[102].mxu1  ;;  %v10128_v55 = vadd.f32 %v6719_v30, %v4693_v54 }
 0x357   : > { %v6621_v34 = vpop.f32.mrb[103].mxu1 }
 0x358   : > { %v4709_v23 = vadd.f32 %v6619_v5, %v9984_v1  ;;  %v6622_v26 = vadd.f32 %v6621_v34, %v6620_v28  ;;  %v10131_v60 = vadd.f32 %v6722_v29, %v4696_v19 }
 0x35a   : > { %v4712_v22 = vadd.f32 %v6622_v26, %v9990_v10 }
 0x35c   : > { %v6723_v14 = vpop.f32.mrb[160].mxu0 }
 0x35d   : > { %v6724_v50 = vpop.f32.mrb[161].mxu0 }
 0x35e   : > { %v6725_v51 = vadd.f32 %v6724_v50, %v6723_v14  ;;  %v6726_v24 = vpop.f32.mrb[162].mxu0  ;;  %v6623_v12 = vpop.f32.mrb[104].mxu1 }
 0x35f   : > { %v6727_v46 = vpop.f32.mrb[163].mxu0  ;;  %v6624_v18 = vpop.f32.mrb[105].mxu1 }
 0x360   : > { %v6728_v41 = vadd.f32 %v6727_v46, %v6726_v24  ;;  %v6625_v15 = vadd.f32 %v6624_v18, %v6623_v12  ;;  %v6626_v47 = vpop.f32.mrb[106].mxu1  ;;  %v10134_v54 = vadd.f32 %v6725_v51, %v4701_v37 }
 0x361   : > { %v6627_v42 = vpop.f32.mrb[107].mxu1 }
 0x362   : > { %v4717_v1 = vadd.f32 %v6625_v15, %v10007_v33  ;;  %v6628_v20 = vadd.f32 %v6627_v42, %v6626_v47  ;;  %v10137_v19 = vadd.f32 %v6728_v41, %v4704_v62 }
 0x364   : > { %v4720_v10 = vadd.f32 %v6628_v20, %v10017_v48 }
 0x366   : > { %v6729_v32 = vpop.f32.mrb[164].mxu0 }
 0x367   : > { %v6730_v13 = vpop.f32.mrb[165].mxu0 }
 0x368   : > { %v6731_v17 = vadd.f32 %v6730_v13, %v6729_v32  ;;  %v6732_v4 = vpop.f32.mrb[166].mxu0  ;;  %v6629_v8 = vpop.f32.mrb[108].mxu1 }
 0x369   : > { %v6733_v59 = vpop.f32.mrb[167].mxu0  ;;  %v6630_v30 = vpop.f32.mrb[109].mxu1 }
 0x36a   : > { %v6734_v49 = vadd.f32 %v6733_v59, %v6732_v4  ;;  %v6631_v21 = vadd.f32 %v6630_v30, %v6629_v8  ;;  %v6632_v38 = vpop.f32.mrb[110].mxu1  ;;  %v10140_v37 = vadd.f32 %v6731_v17, %v4709_v23 }
 0x36b   : > { %v6633_v52 = vpop.f32.mrb[111].mxu1 }
 0x36c   : > { %v4725_v33 = vadd.f32 %v6631_v21, %v10029_v36  ;;  %v6634_v29 = vadd.f32 %v6633_v52, %v6632_v38  ;;  %v10143_v62 = vadd.f32 %v6734_v49, %v4712_v22 }
 0x36e   : > { %v4728_v48 = vadd.f32 %v6634_v29, %v10031_v61 }
 0x370   : > { %v6735_v5 = vpop.f32.mrb[168].mxu0 }
 0x371   : > { %v6736_v28 = vpop.f32.mrb[169].mxu0 }
 0x372   : > { %v6737_v34 = vadd.f32 %v6736_v28, %v6735_v5  ;;  %v6738_v26 = vpop.f32.mrb[170].mxu0 }
 0x373   : > { %v6739_v14 = vpop.f32.mrb[171].mxu0  ;;  %v6635_v50 = vpop.f32.mrb[112].mxu1 }
 0x374   : > { %v6740_v51 = vadd.f32 %v6739_v14, %v6738_v26  ;;  %v6636_v24 = vpop.f32.mrb[113].mxu1  ;;  %v10146_v12 = vadd.f32 %v6737_v34, %v4717_v1 }
 0x375   : > { %v6637_v23 = vadd.f32 %v6636_v24, %v6635_v50  ;;  %v6638_v46 = vpop.f32.mrb[114].mxu1 }
 0x376   : > { %v6639_v18 = vpop.f32.mrb[115].mxu1  ;;  %v10148_v41 = vadd.f32 %v6740_v51, %v4720_v10 }
 0x377   : > { %v4733_v36 = vadd.f32 %v6637_v23, %v10050_v56  ;;  %v6640_v22 = vadd.f32 %v6639_v18, %v6638_v46 }
 0x379   : > { %v4736_v15 = vadd.f32 %v6640_v22, %v10052_v2 }
 0x37c   : > { %v6741_v61 = vpop.f32.mrb[172].mxu0 }
 0x37d   : > { %v6742_v47 = vpop.f32.mrb[173].mxu0 }
 0x37e   : > { %v6743_v42 = vadd.f32 %v6742_v47, %v6741_v61  ;;  %v6744_v20 = vpop.f32.mrb[174].mxu0 }
 0x37f   : > { %v6641_v32 = vpop.f32.mrb[116].mxu1  ;;  %v6745_v13 = vpop.f32.mrb[175].mxu0 }
 0x380   : > { %v6642_v17 = vpop.f32.mrb[117].mxu1  ;;  %v6746_v4 = vadd.f32 %v6745_v13, %v6744_v20  ;;  %v10152_v59 = vadd.f32 %v6743_v42, %v4725_v33 }
 0x381   : > { %v6643_v1 = vadd.f32 %v6642_v17, %v6641_v32  ;;  %v6644_v8 = vpop.f32.mrb[118].mxu1 }
 0x382   : > { %v6645_v30 = vpop.f32.mrb[119].mxu1  ;;  %v10155_v56 = vadd.f32 %v6746_v4, %v4728_v48 }
 0x383   : > { %v4741_v10 = vadd.f32 %v6643_v1, %v10060_v44  ;;  %v6646_v49 = vadd.f32 %v6645_v30, %v6644_v8 }
 0x385   : > { %v4744_v2 = vadd.f32 %v6646_v49, %v10062_v35 }
 0x388   : > { %v6747_v21 = vpop.f32.mrb[176].mxu0 }
 0x389   : > { %v6748_v38 = vpop.f32.mrb[177].mxu0 }
 0x38a   : > { %v6749_v52 = vadd.f32 %v6748_v38, %v6747_v21  ;;  %v6750_v29 = vpop.f32.mrb[178].mxu0 }
 0x38b   : > { %v6647_v5 = vpop.f32.mrb[120].mxu1  ;;  %v6751_v28 = vpop.f32.mrb[179].mxu0 }
 0x38c   : > { %v6648_v34 = vpop.f32.mrb[121].mxu1  ;;  %v6752_v26 = vadd.f32 %v6751_v28, %v6750_v29  ;;  %v10158_v33 = vadd.f32 %v6749_v52, %v4733_v36 }
 0x38d   : > { %v6649_v14 = vadd.f32 %v6648_v34, %v6647_v5  ;;  %v6650_v50 = vpop.f32.mrb[122].mxu1 }
 0x38e   : > { %v6651_v51 = vpop.f32.mrb[123].mxu1  ;;  %v10161_v48 = vadd.f32 %v6752_v26, %v4736_v15 }
 0x38f   : > { %v4749_v44 = vadd.f32 %v6649_v14, %v10066_v11  ;;  %v6652_v24 = vadd.f32 %v6651_v51, %v6650_v50 }
 0x391   : > { %v4752_v35 = vadd.f32 %v6652_v24, %v10071_v0 }
 0x392   : > { %v6753_v23 = vpop.f32.mrb[180].mxu0 }
 0x393   : > { %v6754_v46 = vpop.f32.mrb[181].mxu0 }
 0x394   : > { %v6755_v18 = vadd.f32 %v6754_v46, %v6753_v23  ;;  %v6756_v22 = vpop.f32.mrb[182].mxu0 }
 0x395   : > { %v6757_v61 = vpop.f32.mrb[183].mxu0 }
 0x396   : > { %v6758_v47 = vadd.f32 %v6757_v61, %v6756_v22  ;;  %v10164_v42 = vadd.f32 %v6755_v18, %v4741_v10 }
 0x398   : > { %v10166_v20 = vadd.f32 %v6758_v47, %v4744_v2 }
 0x39a   : > { %v6653_v36 = vpop.f32.mrb[124].mxu1 }
 0x39b   : > { %v6654_v13 = vpop.f32.mrb[125].mxu1 }
 0x39c   : > { %v6759_v32 = vpop.f32.mrb[184].mxu0  ;;  %v6655_v11 = vadd.f32 %v6654_v13, %v6653_v36  ;;  %v6656_v4 = vpop.f32.mrb[126].mxu1 }
 0x39d   : > { %v6760_v17 = vpop.f32.mrb[185].mxu0  ;;  %v6657_v8 = vpop.f32.mrb[127].mxu1 }
 0x39e   : > { %v6761_v15 = vadd.f32 %v6760_v17, %v6759_v32  ;;  %v6762_v1 = vpop.f32.mrb[186].mxu0  ;;  %v4757_v30 = vadd.f32 %v6655_v11, %v10078_v31  ;;  %v6658_v49 = vadd.f32 %v6657_v8, %v6656_v4 }
 0x39f   : > { %v6763_v0 = vpop.f32.mrb[187].mxu0 }
 0x3a0   : > { %v6764_v21 = vadd.f32 %v6763_v0, %v6762_v1  ;;  %v10169_v38 = vadd.f32 %v6761_v15, %v4749_v44  ;;  %v4760_v10 = vadd.f32 %v6658_v49, %v10081_v53 }
 0x3a2   : > { %v10172_v2 = vadd.f32 %v6764_v21, %v4752_v35 }
 0x3a6   : > { %v6841_v52 = vpop.f32.mrb[128].mxu1 }
 0x3a7   : > { %v4983_v29 = vadd.f32 %v6841_v52, %v10104_v58  ;;  %v4974_v5 = vpop.f32.mrb[129].mxu1 }
 0x3a8   : > { %v4975_v28 = vadd.f32 %v4974_v5, %v10090_v25  ;;  %v6842_v34 = vpop.f32.mrb[130].mxu1 }
 0x3a9   : > { %v4986_v26 = vadd.f32 %v6842_v34, %v10107_v45  ;;  %v4977_v14 = vpop.f32.mrb[131].mxu1  ;;  %v5091_v50 = vmax.f32 %v4983_v29, 0.0 }
 0x3aa   : > { %v4978_v31 = vadd.f32 %v4977_v14, %v10096_v16  ;;  %v5089_v44 = vmax.f32 %v4975_v28, 0.0 }
 0x3ab   : > { %v5092_v51 = vmax.f32 %v4986_v26, 0.0 }
 0x3ac   : > { %v5090_v24 = vmax.f32 %v4978_v31, 0.0 }
 0x3ad   : > { %v10178_v23 = vpack.c.bf16 %v5092_v51, %v5091_v50 }
 0x3ae   : > { %v5119_v53 = vpack.c.bf16 %v5090_v24, %v5089_v44 }
 0x3b0   : > { %v6765_v35 = vpop.f32.mrb[188].mxu0 }
 0x3b1   : > { %v6766_v46 = vpop.f32.mrb[189].mxu0 }
 0x3b2   : > { %v6767_v18 = vadd.f32 %v6766_v46, %v6765_v35  ;;  %v6768_v58 = vpop.f32.mrb[190].mxu0 }
 0x3b3   : > { %v6769_v22 = vpop.f32.mrb[191].mxu0  ;;  %v6845_v61 = vpop.f32.mrb[132].mxu1 }
 0x3b4   : > { %v6770_v25 = vadd.f32 %v6769_v22, %v6768_v58  ;;  %v4999_v47 = vadd.f32 %v6845_v61, %v10116_v3  ;;  %v4990_v45 = vpop.f32.mrb[133].mxu1  ;;  %v10181_v36 = vadd.f32 %v6767_v18, %v4757_v30 }
 0x3b5   : > { %v4991_v16 = vadd.f32 %v4990_v45, %v10110_v39  ;;  %v6846_v32 = vpop.f32.mrb[134].mxu1 }
 0x3b6   : > { %v5002_v13 = vadd.f32 %v6846_v32, %v10119_v57  ;;  %v4993_v17 = vpop.f32.mrb[135].mxu1  ;;  %v10185_v11 = vadd.f32 %v6770_v25, %v4760_v10  ;;  %v5095_v15 = vmax.f32 %v4999_v47, 0.0 }
 0x3b7   : > { %v4994_v4 = vadd.f32 %v4993_v17, %v10113_v63  ;;  %v5093_v49 = vmax.f32 %v4991_v16, 0.0 }
 0x3b8   : > { %v6837_v1 = vpop.f32.mrb[192].mxu0  ;;  %v5096_v8 = vmax.f32 %v5002_v13, 0.0 }
 0x3b9   : > { %v4967_v0 = vadd.f32 %v6837_v1, %v10088_v6  ;;  %v4958_v3 = vpop.f32.mrb[193].mxu0  ;;  %v5094_v21 = vmax.f32 %v4994_v4, 0.0 }
 0x3ba   : > { %v4959_v30 = vadd.f32 %v4958_v3, %v10094_v7  ;;  %v5122_v52 = vpack.c.bf16 %v5096_v8, %v5095_v15  ;;  %v6838_v39 = vpop.f32.mrb[194].mxu0 }
 0x3bb   : > { %v4970_v29 = vadd.f32 %v6838_v39, %v10098_v40  ;;  %v5121_v57 = vpack.c.bf16 %v5094_v21, %v5093_v49  ;;  %v4961_v5 = vpop.f32.mrb[195].mxu0  ;;  %v5087_v26 = vmax.f32 %v4967_v0, 0.0 }
 0x3bc   : > { %v4962_v28 = vadd.f32 %v4961_v5, %v10102_v9  ;;  %v5085_v50 = vmax.f32 %v4959_v30, 0.0 }
 0x3bd   : > { %v6849_v10 = vpop.f32.mrb[136].mxu1  ;;  %v5088_v14 = vmax.f32 %v4970_v29, 0.0 }
 0x3be   : > { %v5015_v63 = vadd.f32 %v6849_v10, %v10128_v55  ;;  %v5006_v34 = vpop.f32.mrb[137].mxu1  ;;  %v5086_v51 = vmax.f32 %v4962_v28, 0.0 }
 0x3bf   : > { %v5007_v6 = vadd.f32 %v5006_v34, %v10122_v27  ;;  %v6850_v31 = vpop.f32.mrb[138].mxu1  ;;  %v5118_v24 = vpack.c.bf16 %v5088_v14, %v5087_v26 }
 0x3c0   : > { %v5018_v7 = vadd.f32 %v6850_v31, %v10131_v60  ;;  %v5009_v44 = vpop.f32.mrb[139].mxu1  ;;  %v5117_v35 = vpack.c.bf16 %v5086_v51, %v5085_v50  ;;  %v5099_v46 = vmax.f32 %v5015_v63, 0.0 }
 0x3c1   : > { %v5010_v40 = vadd.f32 %v5009_v44, %v10125_v43  ;;  %v5097_v9 = vmax.f32 %v5007_v6, 0.0 }
 0x3c2   : > { %v5100_v18 = vmax.f32 %v5018_v7, 0.0  ;;  %6883 = vmatprep.mubr.bf16.mxu1 %v5117_v35 }
 0x3c3   : > { %v5098_v58 = vmax.f32 %v5010_v40, 0.0  ;;  %6884 = vmatmul.mubr.bf16.vlgmr.msra.gmra.mrb[156].mxu1 %v5118_v24 }
 0x3c4   : > { %v5124_v55 = vpack.c.bf16 %v5100_v18, %v5099_v46  ;;  %6887 = vmatprep.mubr.bf16.mxu1 %v5119_v53 }
 0x3c5   : > { %v5123_v22 = vpack.c.bf16 %v5098_v58, %v5097_v9  ;;  %v6853_v61 = vpop.f32.mrb[140].mxu1  ;;  %v10900_v58 = vld [vmem:[#allocation20_spill] sm:$0xff] }
 0x3c6   : > { %v5031_v27 = vadd.f32 %v6853_v61, %v10140_v37  ;;  %v5022_v25 = vpop.f32.mrb[141].mxu1 }
 0x3c7   : > { %v5023_v60 = vadd.f32 %v5022_v25, %v10134_v54  ;;  %v6854_v47 = vpop.f32.mrb[142].mxu1 }
 0x3c8   : > { %v5034_v45 = vadd.f32 %v6854_v47, %v10143_v62  ;;  %v5025_v43 = vpop.f32.mrb[143].mxu1  ;;  %v5103_v32 = vmax.f32 %v5031_v27, 0.0  ;;  %v10901_v27 = vld [vmem:[#allocation23_spill] sm:$0xff] }
 0x3c9   : > { %v5026_v16 = vadd.f32 %v5025_v43, %v10137_v19  ;;  %v5101_v17 = vmax.f32 %v5023_v60, 0.0 }
 0x3ca   : > { %v5104_v13 = vmax.f32 %v5034_v45, 0.0  ;;  %v10902_v45 = vld [vmem:[#allocation21_spill] sm:$0xff] }
 0x3cb   : > { %v5102_v4 = vmax.f32 %v5026_v16, 0.0  ;;  %6888 = vmatmul.mubr.bf16.gmra.mrb[160].mxu1 %v10178_v23 }
 0x3cc   : > { %v5126_v15 = vpack.c.bf16 %v5104_v13, %v5103_v32  ;;  %6891 = vmatprep.mubr.bf16.mxu1 %v5121_v57 }
 0x3cd   : > { %v5125_v1 = vpack.c.bf16 %v5102_v4, %v5101_v17  ;;  %v6857_v53 = vpop.f32.mrb[144].mxu1 }
 0x3ce   : > { %v5047_v37 = vadd.f32 %v6857_v53, %v10152_v59  ;;  %v5038_v8 = vpop.f32.mrb[145].mxu1 }
 0x3cf   : > { %v5039_v54 = vadd.f32 %v5038_v8, %v10146_v12  ;;  %v6858_v0 = vpop.f32.mrb[146].mxu1 }
 0x3d0   : > { %v5050_v62 = vadd.f32 %v6858_v0, %v10155_v56  ;;  %v5041_v49 = vpop.f32.mrb[147].mxu1  ;;  %v5107_v3 = vmax.f32 %v5047_v37, 0.0  ;;  %v10903_v37 = vld [vmem:[#allocation30_spill] sm:$0xff] }
 0x3d1   : > { %v5042_v19 = vadd.f32 %v5041_v49, %v10148_v41  ;;  %v5105_v30 = vmax.f32 %v5039_v54, 0.0 }
 0x3d2   : > { %v5108_v21 = vmax.f32 %v5050_v62, 0.0  ;;  %v10904_v62 = vld [vmem:[#allocation25_spill] sm:$0xff] }
 0x3d3   : > { %v5106_v39 = vmax.f32 %v5042_v19, 0.0  ;;  %6892 = vmatmul.mubr.bf16.gmra.mrb[164].mxu1 %v5122_v52 }
 0x3d4   : > { %v5128_v29 = vpack.c.bf16 %v5108_v21, %v5107_v3  ;;  %6895 = vmatprep.mubr.bf16.mxu1 %v5123_v22  ;;  %v10905_v21 = vld [vmem:[#allocation31_spill] sm:$0xff] }
 0x3d5   : > { %v5127_v5 = vpack.c.bf16 %v5106_v39, %v5105_v30  ;;  %v6861_v23 = vpop.f32.mrb[148].mxu1 }
 0x3d6   : > { %v5063_v59 = vadd.f32 %v6861_v23, %v10164_v42  ;;  %v5054_v57 = vpop.f32.mrb[149].mxu1 }
 0x3d7   : > { %v5055_v12 = vadd.f32 %v5054_v57, %v10158_v33  ;;  %v6862_v10 = vpop.f32.mrb[150].mxu1 }
 0x3d8   : > { %v5066_v56 = vadd.f32 %v6862_v10, %v10166_v20  ;;  %v5057_v28 = vpop.f32.mrb[151].mxu1  ;;  %v5111_v63 = vmax.f32 %v5063_v59, 0.0 }
 0x3d9   : > { %v5058_v41 = vadd.f32 %v5057_v28, %v10161_v48  ;;  %v5109_v26 = vmax.f32 %v5055_v12, 0.0 }
 0x3da   : > { %v5112_v34 = vmax.f32 %v5066_v56, 0.0 }
 0x3db   : > { %v5110_v14 = vmax.f32 %v5058_v41, 0.0  ;;  %6896 = vmatmul.mubr.bf16.gmra.mrb[168].mxu1 %v5124_v55 }
 0x3dc   : > { %v5130_v6 = vpack.c.bf16 %v5112_v34, %v5111_v63  ;;  %6899 = vmatprep.mubr.bf16.mxu1 %v5125_v1  ;;  %v10907_v34 = vld [vmem:[#allocation37_spill] sm:$0xff] }
 0x3dd   : > { %v5129_v31 = vpack.c.bf16 %v5110_v14, %v5109_v26 }
 0x3e3   : > { %6900 = vmatmul.mubr.bf16.gmra.mrb[172].mxu1 %v5126_v15 }
 0x3e4   : > { %6903 = vmatprep.mubr.bf16.mxu1 %v5127_v5  ;;  %v10906_v5 = vld [vmem:[#allocation27_spill] sm:$0xff] }
 0x3e8   : > { %v6865_v42 = vpop.f32.mrb[152].mxu1 }
 0x3e9   : > { %v5079_v52 = vadd.f32 %v6865_v42, %v10181_v36  ;;  %v5070_v33 = vpop.f32.mrb[153].mxu1 }
 0x3ea   : > { %v5071_v50 = vadd.f32 %v5070_v33, %v10169_v38  ;;  %v6866_v20 = vpop.f32.mrb[154].mxu1  ;;  %v10216_v38 = vld [vmem:[%s10359_s6] ss:$0 sm:$0xff] }
 0x3eb   : > { %v5082_v51 = vadd.f32 %v6866_v20, %v10185_v11  ;;  %v5073_v48 = vpop.f32.mrb[155].mxu1  ;;  %v5115_v44 = vmax.f32 %v5079_v52, 0.0  ;;  %6904 = vmatmul.mubr.bf16.gmra.mrb[176].mxu1 %v5128_v29  ;;  %v10899_v11 = vld [vmem:[#allocation22_spill] sm:$0xff] }
 0x3ec   : > { %v5074_v7 = vadd.f32 %v5073_v48, %v10172_v2  ;;  %v5113_v40 = vmax.f32 %v5071_v50, 0.0  ;;  %6907 = vmatprep.mubr.bf16.mxu1 %v5129_v31  ;;  %v10908_v31 = vld [vmem:[#allocation34_spill] sm:$0xff] }
 0x3ed   : > { %v5116_v24 = vmax.f32 %v5082_v51, 0.0  ;;  %v10909_v50 = vld [vmem:[#allocation38_spill] sm:$0xff] }
 0x3ee   : > { %v5114_v35 = vmax.f32 %v5074_v7, 0.0  ;;  %v10910_v7 = vld [vmem:[#allocation35_spill] sm:$0xff] }
 0x3ef   : > { %v5132_v46 = vpack.c.bf16 %v5116_v24, %v5115_v44 }
 0x3f0   : > { %v5131_v18 = vpack.c.bf16 %v5114_v35, %v5113_v40 }
 0x3f3   : > { %6908 = vmatmul.mubr.bf16.gmra.mrb[180].mxu1 %v5130_v6 }
 0x3f4   : > { %6911 = vmatprep.mubr.bf16.mxu1 %v5131_v18 }
 0x3fb   : > { %6912 = vmatmul.mubr.bf16.gmra.mrb[184].mxu1 %v5132_v46 }
 0x496   : > { %v6885_v36 = vpop.f32.mrb[156].mxu1 }
 0x497   : > { %v5392_v9 = vadd.f32 %v6885_v36, %v10899_v11  ;;  %v5231_v2 = vpop.f32.mrb[157].mxu1 }
 0x498   : > { %v5390_v55 = vadd.f32 %v5231_v2, %v10900_v58  ;;  %v6886_v22 = vpop.f32.mrb[158].mxu1  ;;  %v10911_v2 = vld [vmem:[#allocation41_spill] sm:$0xff] }
 0x499   : > { %v5431_v61 = vadd.f32 %v10216_v38, %v5392_v9  ;;  %v5393_v25 = vadd.f32 %v6886_v22, %v10901_v27  ;;  %v5234_v60 = vpop.f32.mrb[159].mxu1 }
 0x49a   : > { %v5429_v47 = vadd.f32 %v10216_v38, %v5390_v55  ;;  %v5391_v43 = vadd.f32 %v5234_v60, %v10902_v45 }
 0x49b   : > { %v5432_v16 = vadd.f32 %v10216_v38, %v5393_v25  ;;  %v5463_v13 = vmax.f32 %v5431_v61, 0.0  ;;  %v10912_v61 = vld [vmem:[#allocation39_spill] sm:$0xff] }
 0x49c   : > { %v5430_v32 = vadd.f32 %v10216_v38, %v5391_v43  ;;  %v5461_v4 = vmax.f32 %v5429_v47, 0.0  ;;  %v10913_v47 = vld [vmem:[#allocation42_spill] sm:$0xff] }
 0x49d   : > { %v5464_v17 = vmax.f32 %v5432_v16, 0.0 }
 0x49e   : > { %v5462_v15 = vmax.f32 %v5430_v32, 0.0  ;;  %v6889_v1 = vpop.f32.mrb[160].mxu1  ;;  %v10914_v32 = vld [vmem:[#allocation40_spill] sm:$0xff] }
 0x49f   : > { %v6236_v53 = vpack.c.bf16 %v5464_v17, %v5463_v13  ;;  %v5396_v8 = vadd.f32 %v6889_v1, %v10903_v37  ;;  %v5247_v54 = vpop.f32.mrb[161].mxu1 }
 0x4a0   : > { %v6231_v0 = vpack.c.bf16 %v5462_v15, %v5461_v4  ;;  %v5394_v49 = vadd.f32 %v5247_v54, %v10904_v62  ;;  %v6890_v19 = vpop.f32.mrb[162].mxu1 }
 0x4a1   : > { %6308 = vst [vmem:[%s10230_s12 + $0x8] sm:$0xff] %v6236_v53   ;;  %v5435_v3 = vadd.f32 %v10216_v38, %v5396_v8  ;;  %v5397_v30 = vadd.f32 %v6890_v19, %v10905_v21  ;;  %v5250_v39 = vpop.f32.mrb[163].mxu1 }
 0x4a2   : > { %6232 = vst [vmem:[%s10230_s12] sm:$0xff] %v6231_v0   ;;  %v5433_v29 = vadd.f32 %v10216_v38, %v5394_v49  ;;  %v5395_v23 = vadd.f32 %v5250_v39, %v10906_v5  ;;  %v10915_v0 = vld [vmem:[#allocation45_spill] sm:$0xff] }
 0x4a3   : > { %v5436_v59 = vadd.f32 %v10216_v38, %v5397_v30  ;;  %v5467_v12 = vmax.f32 %v5435_v3, 0.0  ;;  %v10916_v3 = vld [vmem:[#allocation43_spill] sm:$0xff] }
 0x4a4   : > { %v5434_v57 = vadd.f32 %v10216_v38, %v5395_v23  ;;  %v5465_v56 = vmax.f32 %v5433_v29, 0.0  ;;  %v10917_v29 = vld [vmem:[#allocation46_spill] sm:$0xff] }
 0x4a5   : > { %v5468_v10 = vmax.f32 %v5436_v59, 0.0 }
 0x4a6   : > { %v5466_v28 = vmax.f32 %v5434_v57, 0.0  ;;  %v6893_v41 = vpop.f32.mrb[164].mxu1  ;;  %v10918_v57 = vld [vmem:[#allocation44_spill] sm:$0xff] }
 0x4a7   : > { %v6246_v63 = vpack.c.bf16 %v5468_v10, %v5467_v12  ;;  %v5400_v26 = vadd.f32 %v6893_v41, %v10907_v34  ;;  %v5263_v14 = vpop.f32.mrb[165].mxu1 }
 0x4a8   : > { %v6241_v6 = vpack.c.bf16 %v5466_v28, %v5465_v56  ;;  %v5398_v42 = vadd.f32 %v5263_v14, %v10908_v31  ;;  %v6894_v52 = vpop.f32.mrb[166].mxu1 }
 0x4a9   : > { %6310 = vst [vmem:[%s10230_s12 + $0x18] sm:$0xff] %v6246_v63   ;;  %v5439_v33 = vadd.f32 %v10216_v38, %v5400_v26  ;;  %v5401_v20 = vadd.f32 %v6894_v52, %v10909_v50  ;;  %v5266_v51 = vpop.f32.mrb[167].mxu1 }
 0x4aa   : > { %6309 = vst [vmem:[%s10230_s12 + $0x10] sm:$0xff] %v6241_v6   ;;  %v5437_v48 = vadd.f32 %v10216_v38, %v5398_v42  ;;  %v5399_v44 = vadd.f32 %v5266_v51, %v10910_v7  ;;  %v10919_v6 = vld [vmem:[#allocation49_spill] sm:$0xff] }
 0x4ab   : > { %v5440_v24 = vadd.f32 %v10216_v38, %v5401_v20  ;;  %v5471_v35 = vmax.f32 %v5439_v33, 0.0  ;;  %v10920_v33 = vld [vmem:[#allocation47_spill] sm:$0xff] }
 0x4ac   : > { %v5438_v40 = vadd.f32 %v10216_v38, %v5399_v44  ;;  %v5469_v18 = vmax.f32 %v5437_v48, 0.0  ;;  %v10921_v48 = vld [vmem:[#allocation50_spill] sm:$0xff] }
 0x4ad   : > { %v5472_v46 = vmax.f32 %v5440_v24, 0.0 }
 0x4ae   : > { %v5470_v36 = vmax.f32 %v5438_v40, 0.0  ;;  %v6897_v11 = vpop.f32.mrb[168].mxu1  ;;  %v10922_v40 = vld [vmem:[#allocation48_spill] sm:$0xff] }
 0x4af   : > { %v6256_v9 = vpack.c.bf16 %v5472_v46, %v5471_v35  ;;  %v5404_v58 = vadd.f32 %v6897_v11, %v10911_v2  ;;  %v5279_v55 = vpop.f32.mrb[169].mxu1 }
 0x4b0   : > { %v6251_v22 = vpack.c.bf16 %v5470_v36, %v5469_v18  ;;  %v5402_v27 = vadd.f32 %v5279_v55, %v10912_v61  ;;  %v6898_v25 = vpop.f32.mrb[170].mxu1 }
 0x4b1   : > { %6312 = vst [vmem:[%s10230_s12 + $0x28] sm:$0xff] %v6256_v9   ;;  %v5443_v60 = vadd.f32 %v10216_v38, %v5404_v58  ;;  %v5405_v45 = vadd.f32 %v6898_v25, %v10913_v47  ;;  %v5282_v43 = vpop.f32.mrb[171].mxu1 }
 0x4b2   : > { %6311 = vst [vmem:[%s10230_s12 + $0x20] sm:$0xff] %v6251_v22   ;;  %v5441_v16 = vadd.f32 %v10216_v38, %v5402_v27  ;;  %v5403_v13 = vadd.f32 %v5282_v43, %v10914_v32  ;;  %v10923_v22 = vld [vmem:[#allocation53_spill] sm:$0xff] }
 0x4b3   : > { %v5444_v17 = vadd.f32 %v10216_v38, %v5405_v45  ;;  %v5475_v15 = vmax.f32 %v5443_v60, 0.0  ;;  %v10924_v60 = vld [vmem:[#allocation51_spill] sm:$0xff] }
 0x4b4   : > { %v5442_v4 = vadd.f32 %v10216_v38, %v5403_v13  ;;  %v5473_v53 = vmax.f32 %v5441_v16, 0.0  ;;  %v10925_v16 = vld [vmem:[#allocation54_spill] sm:$0xff] }
 0x4b5   : > { %v5476_v1 = vmax.f32 %v5444_v17, 0.0 }
 0x4b6   : > { %v5474_v37 = vmax.f32 %v5442_v4, 0.0  ;;  %v6901_v8 = vpop.f32.mrb[172].mxu1  ;;  %v10926_v4 = vld [vmem:[#allocation52_spill] sm:$0xff] }
 0x4b7   : > { %v6266_v54 = vpack.c.bf16 %v5476_v1, %v5475_v15  ;;  %v5408_v62 = vadd.f32 %v6901_v8, %v10915_v0  ;;  %v5295_v49 = vpop.f32.mrb[173].mxu1 }
 0x4b8   : > { %v6261_v19 = vpack.c.bf16 %v5474_v37, %v5473_v53  ;;  %v5406_v21 = vadd.f32 %v5295_v49, %v10916_v3  ;;  %v6902_v30 = vpop.f32.mrb[174].mxu1 }
 0x4b9   : > { %6314 = vst [vmem:[%s10230_s12 + $0x38] sm:$0xff] %v6266_v54   ;;  %v5447_v39 = vadd.f32 %v10216_v38, %v5408_v62  ;;  %v5409_v5 = vadd.f32 %v6902_v30, %v10917_v29  ;;  %v5298_v23 = vpop.f32.mrb[175].mxu1 }
 0x4ba   : > { %6313 = vst [vmem:[%s10230_s12 + $0x30] sm:$0xff] %v6261_v19   ;;  %v5445_v59 = vadd.f32 %v10216_v38, %v5406_v21  ;;  %v5407_v12 = vadd.f32 %v5298_v23, %v10918_v57  ;;  %v10927_v19 = vld [vmem:[#allocation57_spill] sm:$0xff] }
 0x4bb   : > { %v5448_v10 = vadd.f32 %v10216_v38, %v5409_v5  ;;  %v5479_v28 = vmax.f32 %v5447_v39, 0.0  ;;  %v10928_v39 = vld [vmem:[#allocation55_spill] sm:$0xff] }
 0x4bc   : > { %v5446_v56 = vadd.f32 %v10216_v38, %v5407_v12  ;;  %v5477_v63 = vmax.f32 %v5445_v59, 0.0  ;;  %v10929_v59 = vld [vmem:[#allocation58_spill] sm:$0xff] }
 0x4bd   : > { %v5480_v41 = vmax.f32 %v5448_v10, 0.0 }
 0x4be   : > { %v5478_v34 = vmax.f32 %v5446_v56, 0.0  ;;  %v6905_v26 = vpop.f32.mrb[176].mxu1  ;;  %v10930_v56 = vld [vmem:[#allocation56_spill] sm:$0xff] }
 0x4bf   : > { %v6276_v14 = vpack.c.bf16 %v5480_v41, %v5479_v28  ;;  %v5412_v31 = vadd.f32 %v6905_v26, %v10919_v6  ;;  %v5311_v42 = vpop.f32.mrb[177].mxu1 }
 0x4c0   : > { %v6271_v52 = vpack.c.bf16 %v5478_v34, %v5477_v63  ;;  %v5410_v50 = vadd.f32 %v5311_v42, %v10920_v33  ;;  %v6906_v20 = vpop.f32.mrb[178].mxu1 }
 0x4c1   : > { %6316 = vst [vmem:[%s10230_s12 + $0x48] sm:$0xff] %v6276_v14   ;;  %v5451_v51 = vadd.f32 %v10216_v38, %v5412_v31  ;;  %v5413_v7 = vadd.f32 %v6906_v20, %v10921_v48  ;;  %v5314_v44 = vpop.f32.mrb[179].mxu1 }
 0x4c2   : > { %6315 = vst [vmem:[%s10230_s12 + $0x40] sm:$0xff] %v6271_v52   ;;  %v5449_v24 = vadd.f32 %v10216_v38, %v5410_v50  ;;  %v5411_v35 = vadd.f32 %v5314_v44, %v10922_v40 }
 0x4c3   : > { %v5452_v46 = vadd.f32 %v10216_v38, %v5413_v7  ;;  %v5483_v36 = vmax.f32 %v5451_v51, 0.0 }
 0x4c4   : > { %v5450_v18 = vadd.f32 %v10216_v38, %v5411_v35  ;;  %v5481_v9 = vmax.f32 %v5449_v24, 0.0 }
 0x4c5   : > { %v5484_v11 = vmax.f32 %v5452_v46, 0.0 }
 0x4c6   : > { %v5482_v2 = vmax.f32 %v5450_v18, 0.0  ;;  %v6909_v58 = vpop.f32.mrb[180].mxu1 }
 0x4c7   : > { %v6286_v55 = vpack.c.bf16 %v5484_v11, %v5483_v36  ;;  %v5416_v61 = vadd.f32 %v6909_v58, %v10923_v22  ;;  %v5327_v27 = vpop.f32.mrb[181].mxu1 }
 0x4c8   : > { %v6281_v25 = vpack.c.bf16 %v5482_v2, %v5481_v9  ;;  %v5414_v47 = vadd.f32 %v5327_v27, %v10924_v60  ;;  %v6910_v45 = vpop.f32.mrb[182].mxu1 }
 0x4c9   : > { %6318 = vst [vmem:[%s10230_s12 + $0x58] sm:$0xff] %v6286_v55   ;;  %v5455_v43 = vadd.f32 %v10216_v38, %v5416_v61  ;;  %v5417_v32 = vadd.f32 %v6910_v45, %v10925_v16  ;;  %v5330_v13 = vpop.f32.mrb[183].mxu1 }
 0x4ca   : > { %6317 = vst [vmem:[%s10230_s12 + $0x50] sm:$0xff] %v6281_v25   ;;  %v5453_v17 = vadd.f32 %v10216_v38, %v5414_v47  ;;  %v5415_v15 = vadd.f32 %v5330_v13, %v10926_v4 }
 0x4cb   : > { %v5456_v1 = vadd.f32 %v10216_v38, %v5417_v32  ;;  %v5487_v37 = vmax.f32 %v5455_v43, 0.0 }
 0x4cc   : > { %v5454_v53 = vadd.f32 %v10216_v38, %v5415_v15  ;;  %v5485_v54 = vmax.f32 %v5453_v17, 0.0 }
 0x4cd   : > { %v5488_v8 = vmax.f32 %v5456_v1, 0.0 }
 0x4ce   : > { %v5486_v0 = vmax.f32 %v5454_v53, 0.0  ;;  %v6913_v62 = vpop.f32.mrb[184].mxu1 }
 0x4cf   : > { %v6296_v49 = vpack.c.bf16 %v5488_v8, %v5487_v37  ;;  %v5420_v3 = vadd.f32 %v6913_v62, %v10927_v19  ;;  %v5343_v21 = vpop.f32.mrb[185].mxu1 }
 0x4d0   : > { %v6291_v30 = vpack.c.bf16 %v5486_v0, %v5485_v54  ;;  %v5418_v29 = vadd.f32 %v5343_v21, %v10928_v39  ;;  %v6914_v5 = vpop.f32.mrb[186].mxu1 }
 0x4d1   : > { %6320 = vst [vmem:[%s10230_s12 + $0x68] sm:$0xff] %v6296_v49   ;;  %v5459_v23 = vadd.f32 %v10216_v38, %v5420_v3  ;;  %v5421_v57 = vadd.f32 %v6914_v5, %v10929_v59  ;;  %v5346_v12 = vpop.f32.mrb[187].mxu1 }
 0x4d2   : > { %6319 = vst [vmem:[%s10230_s12 + $0x60] sm:$0xff] %v6291_v30   ;;  %v5457_v10 = vadd.f32 %v10216_v38, %v5418_v29  ;;  %v5419_v28 = vadd.f32 %v5346_v12, %v10930_v56 }
 0x4d3   : > { %v5460_v41 = vadd.f32 %v10216_v38, %v5421_v57  ;;  %v5491_v34 = vmax.f32 %v5459_v23, 0.0 }
 0x4d4   : > { %v5458_v63 = vadd.f32 %v10216_v38, %v5419_v28  ;;  %v5489_v14 = vmax.f32 %v5457_v10, 0.0 }
 0x4d5   : > { %v5492_v26 = vmax.f32 %v5460_v41, 0.0 }
 0x4d6   : > { %v5490_v6 = vmax.f32 %v5458_v63, 0.0 }
 0x4d7   : > { %v6306_v31 = vpack.c.bf16 %v5492_v26, %v5491_v34 }
 0x4d8   : > { %v6301_v42 = vpack.c.bf16 %v5490_v6, %v5489_v14 }
 0x4d9   : > { %6322 = vst [vmem:[%s10230_s12 + $0x78] sm:$0xff] %v6306_v31  }
 0x4da   : > { %6321 = vst [vmem:[%s10230_s12 + $0x70] sm:$0xff] %v6301_v42  }
 0x4db   : > { %7308 = shalt.err (!%p7305_p4)
}
 0x4dc   : > { %s7309_s14 = scalar_lea.hbm %s10305_s30, 2048  ;;  %s7313_s16 = scalar_lea.hbm %s10360_s7, 4096 }
 0x4dd   : > { %p7310_p9 = scmp.ne.s32.totalorder %s10305_s30, %s7309_s14  ;;  %p7314_p8 = scmp.lt.u32.totalorder %s10305_s30, %s10360_s7 }
 0x4de   : > { %p7315_p13 = scmp.lt.u32.totalorder %s7313_s16, %s7309_s14  ;;  %p7317_p10 = scmp.lt.u32.totalorder %s7309_s14, %s10305_s30 }
 0x4df   : > { %p7311_p0 = pnand %p7310_p9, %p7571_p5 }
 0x4e0   : > { %p7316_p6 = por %p7315_p13, %p7314_p8 }
 0x4e1   : > { %p7312_p11 = pneg %p7311_p0 }
 0x4e2   : > { %p7318_p3 = por %p7317_p10, %p7316_p6 }
 0x4e4   : > { %p7319_p7 = pnand %p7318_p3, %p7312_p11 }
 0x4e6   : > { %7322 = shalt.err (!%p7319_p7)
}
 0x4e7   : > { %s7381_s19 = smov 64   ;;  %s7382_s22 = smov 4  }
 0x4e8   : > { %6945 = dma.vmem_to_hbm [thread:$0]  (%p7571_p5), %s10307_s21, 2048, %s10305_s30, %s5654_s28, %s7381_s19, %s7381_s19, %s7382_s22  }
 0x4e9 PF: > { %s10931_s1 = sld [smem:[#allocation17_spill]]  ;;  %s5682_s9 = sand.u32 1, %s7357_s24  }
 0x4ea   : > { %p10933_p2 = scmp.ge.s32.totalorder %s7369_s27, 2  ;;  %s5683_s29 = scalar_lea.sflag [#allocation6], %s5682_s9 }
 0x4ef   : > { %p10932_p12 = scmp.ne.s32.totalorder %s10931_s1, 0 }
 0x4f1   : > { %p6962_p1 = pnand %p10933_p2, %p10932_p12 }
 0x4f3   : > { %7352 = dma.done.wait (!%p6962_p1), %s5683_s29, 2048  }
 0x4f4   : > { %7354 = vsyncadd (!%p6962_p1), %s5683_s29, 4294965248  ;;  %p22_p4 = scmp.ge.s32.totalorder %s7536_s18, 4   ;;  %s10934_s24 = smov %s7361_s25 }
 0x4f5   : > { %s10935_s25 = smov %s7365_s26  ;;  %s10936_s26 = smov %s7567_s13 }
 0x4f6   : > { %s10937_s27 = smov %s7536_s18  ;;  %24 = sbr.rel (!%p22_p4) target bundleno = 9 (0x9), region = 108 }
 0x4fd   :  { %5688 = vsyncpa [#allocation5], 1 }
 0x4fe   :  { %5690 = vsyncpa [#allocation5 + $0x1], 1 }
 0x4ff   :  { %5691 = vsyncpa [#allocation8], 1 }
 0x500   :  { %5692 = vsyncpa [#allocation11], 1 }
 0x501   :  { %5693 = vsyncpa [#allocation6], 1 }
 0x502   :  { %5695 = vsyncpa [#allocation6 + $0x1], 1 }

</bundles_post_ra>
